<compile_context>
chip_gen: v6e
topology: v6e:2x2x1
jax: 0.10.0
libtpu: 0.0.40
codegen_flags: <defaults>
</compile_context>

<pallas_src>
import math

import jax
import jax.numpy as jnp
from jax import lax
from jax.experimental import pallas as pl
from jax.experimental.pallas import tpu as pltpu

# ----------------------------- config (small) -----------------------------
VOCAB  = 64          # config.vocab_size
D      = 32          # config.n_embd
H      = 4           # config.n_head
DH     = D // H
NLAYER = 2           # config.n_layer
NPOS   = 16          # config.n_positions
B      = 2
T      = 8

# Plain Python floats only (jnp scalars at module scope would be captured as kernel consts).
LN_EPS  = 1e-5
NEG_BIG = -1e9
SCALE   = 1.0 / math.sqrt(DH)
GELU_C  = math.sqrt(2.0 / math.pi)

# ---- bias/scale slab layout: one vector per row, lane offset 0, row width 4*D = 128 ----
ROWS_PER_LAYER = 10
(R_LN1_G, R_LN1_B, R_BQ, R_BK, R_BV,
 R_PROJ_B, R_LN2_G, R_LN2_B, R_FC_B, R_FC2_B) = range(ROWS_PER_LAYER)
R_LNF_G   = NLAYER * ROWS_PER_LAYER          # 20
R_LNF_B   = R_LNF_G + 1                      # 21
R_HEAD_B  = R_LNF_G + 2                      # 22
R_WPE     = 24                               # rows 24..39: pre-tiled positional embeddings
BIAS_ROWS = R_WPE + B * T                    # 40 (multiple of 8)


def _layer_norm(x, g, b):
    # Parallel-form variance: two independent cross-lane reductions (E[x^2], E[x]) overlap.
    mu = jnp.mean(x, axis=-1, keepdims=True)
    ms = jnp.mean(x * x, axis=-1, keepdims=True)
    var = ms - mu * mu
    return (x - mu) * lax.rsqrt(var + LN_EPS) * g + b


def _gelu_new(x):
    # GPT-2 "gelu_new"
    return 0.5 * x * (1.0 + jnp.tanh(GELU_C * (x + 0.044715 * x * x * x)))


# --------------------------- fused forward kernel ---------------------------
def fused_gpt_kernel(ids_ref, mask_ref, wte_ref, w_sq_ref, w_fch_ref, w_fc2_ref,
                     bias_ref, out_ref, hid_ref):
    f32 = jnp.float32

    def bvec(row, width=D):                 # (1, width) bias/scale row, lane offset 0
        return bias_ref[pl.ds(row, 1), :width]

    # ---- fused embedding: token gather (dynamic leading-dim loads) + positional add ----
    for n in range(B * T):
        tok = ids_ref[n // T, n % T]                         # SMEM scalar read
        hid_ref[pl.ds(n, 1), :] = wte_ref[tok]               # (1, D) row from VMEM wte
    x = hid_ref[...] + bias_ref[pl.ds(R_WPE, B * T), :D]     # + wpe pre-tiled over (b, t)

    # ---- additive attention bias (causal + key padding), built ONCE, shared everywhere ----
    mask = mask_ref[...].astype(f32)                         # (B, T); 1 = keep, 0 = pad
    ri = lax.broadcasted_iota(jnp.int32, (T, T), 0)
    ci = lax.broadcasted_iota(jnp.int32, (T, T), 1)
    causal = jnp.where(ri >= ci, 0.0, NEG_BIG)                                   # (T, T)
    bias_btt = causal[None, :, :] + (1.0 - mask)[:, None, :] * NEG_BIG           # (B, T, T)
    att_bias = jnp.broadcast_to(bias_btt[:, None], (B, H, T, T)).reshape(B * H, T, T)

    def heads(z):       # (B*T, D) -> (B*H, T, DH): heads folded into one leading batch dim
        return z.reshape(B, T, H, DH).transpose((0, 2, 1, 3)).reshape(B * H, T, DH)

    for li in range(NLAYER):                # NLAYER = 2: unrolled in Python
        base = li * ROWS_PER_LAYER

        # ---------------- attention ----------------
        h = _layer_norm(x, bvec(base + R_LN1_G), bvec(base + R_LN1_B))
        # Three lane-aligned projections (no lane-offset-32/64 slices); scale folded into Wq/bq.
        q = jnp.dot(h, w_sq_ref[li * 4 + 0], preferred_element_type=f32) + bvec(base + R_BQ)
        k = jnp.dot(h, w_sq_ref[li * 4 + 1], preferred_element_type=f32) + bvec(base + R_BK)
        v = jnp.dot(h, w_sq_ref[li * 4 + 2], preferred_element_type=f32) + bvec(base + R_BV)
        q3, k3, v3 = heads(q), heads(k), heads(v)

        s = jnp.einsum("btd,bsd->bts", q3, k3, preferred_element_type=f32)    # (BH, T, T)
        s = s + att_bias
        m = jnp.max(s, axis=-1, keepdims=True)
        p = jnp.exp(s - m)
        p = p * pl.reciprocal(jnp.sum(p, axis=-1, keepdims=True), approx=True)  # EUP slot
        ctx = jnp.einsum("bts,bsd->btd", p, v3, preferred_element_type=f32)   # (BH, T, DH)
        ctx = ctx.reshape(B, H, T, DH).transpose((0, 2, 1, 3)).reshape(B * T, D)

        attn_out = (jnp.dot(ctx, w_sq_ref[li * 4 + 3], preferred_element_type=f32)
                    + bvec(base + R_PROJ_B))
        x = x + attn_out

        # ---------------- MLP ----------------
        h2 = _layer_norm(x, bvec(base + R_LN2_G), bvec(base + R_LN2_B))
        ff = jnp.dot(h2, w_fch_ref[li], preferred_element_type=f32) + bvec(base + R_FC_B, 4 * D)
        ff = _gelu_new(ff)
        ff = jnp.dot(ff, w_fc2_ref[li], preferred_element_type=f32) + bvec(base + R_FC2_B)
        x = x + ff

    # ---------------- final LN + LM head (lane-dense matmul, VOCAB-wide store) ----------------
    hf = _layer_norm(x, bvec(R_LNF_G), bvec(R_LNF_B))
    logits = jnp.dot(hf, w_fch_ref[NLAYER], preferred_element_type=f32)       # (BT, 4*D)
    logits = logits[:, :VOCAB] + bvec(R_HEAD_B, VOCAB)                        # lane-offset-0 slice
    out_ref[...] = logits.reshape(B, T, VOCAB)


def fused_forward(input_ids, attention_mask, p):
    vmem = pl.BlockSpec(memory_space=pltpu.MemorySpace.VMEM)
    smem = pl.BlockSpec(memory_space=pltpu.MemorySpace.SMEM)
    return pl.pallas_call(
        fused_gpt_kernel,
        out_shape=jax.ShapeDtypeStruct((B, T, VOCAB), jnp.float32),
        in_specs=[smem, vmem, vmem, vmem, vmem, vmem, vmem],
        out_specs=vmem,
        scratch_shapes=[pltpu.VMEM((B * T, D), jnp.float32)],
    )(input_ids, attention_mask, p["wte"], p["w_sq"], p["w_fch"], p["w_fc2"], p["bias"])


# --------------------------- parameter init (packed slabs) ---------------------------
def init_params(key):
    def nrm(k, shape):
        return 0.02 * jax.random.normal(k, shape, dtype=jnp.float32)

    ks = jax.random.split(key, 8)
    k_wte, k_wpe, k_head, k_attn, k_proj, k_fc, k_fc2, k_bias = ks

    # Token embedding: (VOCAB, 1, D) so in-kernel gather is a dynamic leading-dim load.
    wte = nrm(k_wte, (VOCAB, D)).reshape(VOCAB, 1, D)
    wpe = nrm(k_wpe, (NPOS, D))
    wpe_btd = jnp.tile(wpe[:T], (B, 1))                     # (B*T, D): row n = wpe[n % T]

    # Per-layer square weights (GPT-2 Conv1D convention [in, out]): q (pre-scaled), k, v, proj.
    attn_w = nrm(k_attn, (NLAYER, D, 3 * D))
    proj_w = nrm(k_proj, (NLAYER, D, D))
    w_sq = jnp.stack([attn_w[:, :, :D] * SCALE,             # 1/sqrt(DH) folded into Wq
                      attn_w[:, :, D:2 * D],
                      attn_w[:, :, 2 * D:],
                      proj_w], axis=1).reshape(NLAYER * 4, D, D)

    # MLP fc weights + lane-padded LM head stacked into one (NLAYER+1, D, 4D) slab.
    fc_w = nrm(k_fc, (NLAYER, D, 4 * D))
    head_w = nrm(k_head, (VOCAB, D)).T                      # nn.Linear weight (out,in) -> (in,out)
    head_w = jnp.pad(head_w, ((0, 0), (0, 4 * D - VOCAB)))  # (D, 128); pad lanes sliced in-kernel
    w_fch = jnp.concatenate([fc_w, head_w[None]], axis=0)

    w_fc2 = nrm(k_fc2, (NLAYER, 4 * D, D))

    # Bias/scale slab: LN gains/biases, linear biases, LM-head bias, tiled positional rows.
    bks = jax.random.split(k_bias, NLAYER * 4 + 1)
    bias = jnp.zeros((BIAS_ROWS, 4 * D), jnp.float32)

    def put(slab, row, vec):
        return slab.at[row, :vec.shape[0]].set(vec)

    for li in range(NLAYER):
        base = li * ROWS_PER_LAYER
        kq, kp, kf, kf2 = bks[li * 4:(li + 1) * 4]
        attn_b = nrm(kq, (3 * D,))
        bias = put(bias, base + R_LN1_G, jnp.ones((D,), jnp.float32))
        bias = put(bias, base + R_LN2_G, jnp.ones((D,), jnp.float32))
        bias = put(bias, base + R_BQ, attn_b[:D] * SCALE)   # scale folded into bq too
        bias = put(bias, base + R_BK, attn_b[D:2 * D])
        bias = put(bias, base + R_BV, attn_b[2 * D:])
        bias = put(bias, base + R_PROJ_B, nrm(kp, (D,)))
        bias = put(bias, base + R_FC_B, nrm(kf, (4 * D,)))
        bias = put(bias, base + R_FC2_B, nrm(kf2, (D,)))
        # LN betas default to 0 (GPT-2 init); rows already zero.
    bias = put(bias, R_LNF_G, jnp.ones((D,), jnp.float32))
    bias = put(bias, R_HEAD_B, nrm(bks[-1], (VOCAB,)))
    bias = bias.at[R_WPE:R_WPE + B * T, :D].set(wpe_btd)

    return {"wte": wte, "w_sq": w_sq, "w_fch": w_fch, "w_fc2": w_fc2, "bias": bias}


# --------------------------- full model forward ---------------------------
def chess_gpt_forward(params, input_ids, attention_mask):
    # Entire forward (embeddings, both transformer layers, final LN, LM head) is ONE
    # pallas_call; inputs are passed straight through (int32 ids -> SMEM, int32 mask -> VMEM).
    return fused_forward(input_ids, attention_mask, params)   # (B, T, VOCAB)


if __name__ == "__main__":
    key = jax.random.PRNGKey(0)
    pkey, ikey = jax.random.split(key)
    params = init_params(pkey)

    input_ids = jax.random.randint(ikey, (B, T), 0, VOCAB, dtype=jnp.int32)
    attention_mask = jnp.ones((B, T), dtype=jnp.int32)
    # pad out the last 2 tokens of the second sequence
    attention_mask = attention_mask.at[1, -2:].set(0)

    logits = chess_gpt_forward(params, input_ids, attention_mask)
    jax.block_until_ready(logits)
    assert logits.shape == (B, T, VOCAB)
    assert bool(jnp.all(jnp.isfinite(logits)))
    print("KERNEL_OK")
</pallas_src>

<mosaic_0001>
module attributes {stable_mosaic.version = 11 : i64} {
  func.func @fused_gpt_kernel(%arg0: memref<2x8xi32, #tpu.memory_space<smem>>, %arg1: memref<2x8xi32, #tpu.memory_space<vmem>>, %arg2: memref<64x1x32xf32, #tpu.memory_space<vmem>>, %arg3: memref<8x32x32xf32, #tpu.memory_space<vmem>>, %arg4: memref<3x32x128xf32, #tpu.memory_space<vmem>>, %arg5: memref<2x128x32xf32, #tpu.memory_space<vmem>>, %arg6: memref<40x128xf32, #tpu.memory_space<vmem>>, %arg7: memref<2x8x64xf32, #tpu.memory_space<vmem>>, %arg8: memref<16x32xf32, #tpu.memory_space<vmem>>) attributes {dimension_semantics = [], scalar_prefetch = 0 : i64, scratch_operands = 1 : i64, tpu.core_type = #tpu.core_type<tc>} {
    %c0 = arith.constant 0 : index
    %c0_0 = arith.constant 0 : index
    %0 = memref.load %arg0[%c0, %c0_0] : memref<2x8xi32, #tpu.memory_space<smem>>
    %1 = arith.index_cast %0 : i32 to index
    %c0_1 = arith.constant 0 : index
    %c0_2 = arith.constant 0 : index
    %2 = vector.load %arg2[%1, %c0_1, %c0_2] : memref<64x1x32xf32, #tpu.memory_space<vmem>>, vector<1x1x32xf32>
    %3 = vector.shape_cast %2 : vector<1x1x32xf32> to vector<1x32xf32>
    %c0_3 = arith.constant 0 : index
    %c0_4 = arith.constant 0 : index
    %4 = vector.load %arg8[%c0_3, %c0_4] : memref<16x32xf32, #tpu.memory_space<vmem>>, vector<1x32xf32>
    tpu.vector_store %arg8[%c0_3, %c0_4], %3 {strides = array<i32>} : memref<16x32xf32, #tpu.memory_space<vmem>>, vector<1x32xf32>,
    %c0_5 = arith.constant 0 : index
    %c1 = arith.constant 1 : index
    %5 = memref.load %arg0[%c0_5, %c1] : memref<2x8xi32, #tpu.memory_space<smem>>
    %6 = arith.index_cast %5 : i32 to index
    %c0_6 = arith.constant 0 : index
    %c0_7 = arith.constant 0 : index
    %7 = vector.load %arg2[%6, %c0_6, %c0_7] : memref<64x1x32xf32, #tpu.memory_space<vmem>>, vector<1x1x32xf32>
    %8 = vector.shape_cast %7 : vector<1x1x32xf32> to vector<1x32xf32>
    %c1_8 = arith.constant 1 : index
    %c0_9 = arith.constant 0 : index
    %9 = vector.load %arg8[%c1_8, %c0_9] : memref<16x32xf32, #tpu.memory_space<vmem>>, vector<1x32xf32>
    tpu.vector_store %arg8[%c1_8, %c0_9], %8 {strides = array<i32>} : memref<16x32xf32, #tpu.memory_space<vmem>>, vector<1x32xf32>,
    %c0_10 = arith.constant 0 : index
    %c2 = arith.constant 2 : index
    %10 = memref.load %arg0[%c0_10, %c2] : memref<2x8xi32, #tpu.memory_space<smem>>
    %11 = arith.index_cast %10 : i32 to index
    %c0_11 = arith.constant 0 : index
    %c0_12 = arith.constant 0 : index
    %12 = vector.load %arg2[%11, %c0_11, %c0_12] : memref<64x1x32xf32, #tpu.memory_space<vmem>>, vector<1x1x32xf32>
    %13 = vector.shape_cast %12 : vector<1x1x32xf32> to vector<1x32xf32>
    %c2_13 = arith.constant 2 : index
    %c0_14 = arith.constant 0 : index
    %14 = vector.load %arg8[%c2_13, %c0_14] : memref<16x32xf32, #tpu.memory_space<vmem>>, vector<1x32xf32>
    tpu.vector_store %arg8[%c2_13, %c0_14], %13 {strides = array<i32>} : memref<16x32xf32, #tpu.memory_space<vmem>>, vector<1x32xf32>,
    %c0_15 = arith.constant 0 : index
    %c3 = arith.constant 3 : index
    %15 = memref.load %arg0[%c0_15, %c3] : memref<2x8xi32, #tpu.memory_space<smem>>
    %16 = arith.index_cast %15 : i32 to index
    %c0_16 = arith.constant 0 : index
    %c0_17 = arith.constant 0 : index
    %17 = vector.load %arg2[%16, %c0_16, %c0_17] : memref<64x1x32xf32, #tpu.memory_space<vmem>>, vector<1x1x32xf32>
    %18 = vector.shape_cast %17 : vector<1x1x32xf32> to vector<1x32xf32>
    %c3_18 = arith.constant 3 : index
    %c0_19 = arith.constant 0 : index
    %19 = vector.load %arg8[%c3_18, %c0_19] : memref<16x32xf32, #tpu.memory_space<vmem>>, vector<1x32xf32>
    tpu.vector_store %arg8[%c3_18, %c0_19], %18 {strides = array<i32>} : memref<16x32xf32, #tpu.memory_space<vmem>>, vector<1x32xf32>,
    %c0_20 = arith.constant 0 : index
    %c4 = arith.constant 4 : index
    %20 = memref.load %arg0[%c0_20, %c4] : memref<2x8xi32, #tpu.memory_space<smem>>
    %21 = arith.index_cast %20 : i32 to index
    %c0_21 = arith.constant 0 : index
    %c0_22 = arith.constant 0 : index
    %22 = vector.load %arg2[%21, %c0_21, %c0_22] : memref<64x1x32xf32, #tpu.memory_space<vmem>>, vector<1x1x32xf32>
    %23 = vector.shape_cast %22 : vector<1x1x32xf32> to vector<1x32xf32>
    %c4_23 = arith.constant 4 : index
    %c0_24 = arith.constant 0 : index
    %24 = vector.load %arg8[%c4_23, %c0_24] : memref<16x32xf32, #tpu.memory_space<vmem>>, vector<1x32xf32>
    tpu.vector_store %arg8[%c4_23, %c0_24], %23 {strides = array<i32>} : memref<16x32xf32, #tpu.memory_space<vmem>>, vector<1x32xf32>,
    %c0_25 = arith.constant 0 : index
    %c5 = arith.constant 5 : index
    %25 = memref.load %arg0[%c0_25, %c5] : memref<2x8xi32, #tpu.memory_space<smem>>
    %26 = arith.index_cast %25 : i32 to index
    %c0_26 = arith.constant 0 : index
    %c0_27 = arith.constant 0 : index
    %27 = vector.load %arg2[%26, %c0_26, %c0_27] : memref<64x1x32xf32, #tpu.memory_space<vmem>>, vector<1x1x32xf32>
    %28 = vector.shape_cast %27 : vector<1x1x32xf32> to vector<1x32xf32>
    %c5_28 = arith.constant 5 : index
    %c0_29 = arith.constant 0 : index
    %29 = vector.load %arg8[%c5_28, %c0_29] : memref<16x32xf32, #tpu.memory_space<vmem>>, vector<1x32xf32>
    tpu.vector_store %arg8[%c5_28, %c0_29], %28 {strides = array<i32>} : memref<16x32xf32, #tpu.memory_space<vmem>>, vector<1x32xf32>,
    %c0_30 = arith.constant 0 : index
    %c6 = arith.constant 6 : index
    %30 = memref.load %arg0[%c0_30, %c6] : memref<2x8xi32, #tpu.memory_space<smem>>
    %31 = arith.index_cast %30 : i32 to index
    %c0_31 = arith.constant 0 : index
    %c0_32 = arith.constant 0 : index
    %32 = vector.load %arg2[%31, %c0_31, %c0_32] : memref<64x1x32xf32, #tpu.memory_space<vmem>>, vector<1x1x32xf32>
    %33 = vector.shape_cast %32 : vector<1x1x32xf32> to vector<1x32xf32>
    %c6_33 = arith.constant 6 : index
    %c0_34 = arith.constant 0 : index
    %34 = vector.load %arg8[%c6_33, %c0_34] : memref<16x32xf32, #tpu.memory_space<vmem>>, vector<1x32xf32>
    tpu.vector_store %arg8[%c6_33, %c0_34], %33 {strides = array<i32>} : memref<16x32xf32, #tpu.memory_space<vmem>>, vector<1x32xf32>,
    %c0_35 = arith.constant 0 : index
    %c7 = arith.constant 7 : index
    %35 = memref.load %arg0[%c0_35, %c7] : memref<2x8xi32, #tpu.memory_space<smem>>
    %36 = arith.index_cast %35 : i32 to index
    %c0_36 = arith.constant 0 : index
    %c0_37 = arith.constant 0 : index
    %37 = vector.load %arg2[%36, %c0_36, %c0_37] : memref<64x1x32xf32, #tpu.memory_space<vmem>>, vector<1x1x32xf32>
    %38 = vector.shape_cast %37 : vector<1x1x32xf32> to vector<1x32xf32>
    %c7_38 = arith.constant 7 : index
    %c0_39 = arith.constant 0 : index
    %39 = vector.load %arg8[%c7_38, %c0_39] : memref<16x32xf32, #tpu.memory_space<vmem>>, vector<1x32xf32>
    tpu.vector_store %arg8[%c7_38, %c0_39], %38 {strides = array<i32>} : memref<16x32xf32, #tpu.memory_space<vmem>>, vector<1x32xf32>,
    %c1_40 = arith.constant 1 : index
    %c0_41 = arith.constant 0 : index
    %40 = memref.load %arg0[%c1_40, %c0_41] : memref<2x8xi32, #tpu.memory_space<smem>>
    %41 = arith.index_cast %40 : i32 to index
    %c0_42 = arith.constant 0 : index
    %c0_43 = arith.constant 0 : index
    %42 = vector.load %arg2[%41, %c0_42, %c0_43] : memref<64x1x32xf32, #tpu.memory_space<vmem>>, vector<1x1x32xf32>
    %43 = vector.shape_cast %42 : vector<1x1x32xf32> to vector<1x32xf32>
    %c8 = arith.constant 8 : index
    %c0_44 = arith.constant 0 : index
    %44 = vector.load %arg8[%c8, %c0_44] : memref<16x32xf32, #tpu.memory_space<vmem>>, vector<1x32xf32>
    tpu.vector_store %arg8[%c8, %c0_44], %43 {strides = array<i32>} : memref<16x32xf32, #tpu.memory_space<vmem>>, vector<1x32xf32>,
    %c1_45 = arith.constant 1 : index
    %c1_46 = arith.constant 1 : index
    %45 = memref.load %arg0[%c1_45, %c1_46] : memref<2x8xi32, #tpu.memory_space<smem>>
    %46 = arith.index_cast %45 : i32 to index
    %c0_47 = arith.constant 0 : index
    %c0_48 = arith.constant 0 : index
    %47 = vector.load %arg2[%46, %c0_47, %c0_48] : memref<64x1x32xf32, #tpu.memory_space<vmem>>, vector<1x1x32xf32>
    %48 = vector.shape_cast %47 : vector<1x1x32xf32> to vector<1x32xf32>
    %c9 = arith.constant 9 : index
    %c0_49 = arith.constant 0 : index
    %49 = vector.load %arg8[%c9, %c0_49] : memref<16x32xf32, #tpu.memory_space<vmem>>, vector<1x32xf32>
    tpu.vector_store %arg8[%c9, %c0_49], %48 {strides = array<i32>} : memref<16x32xf32, #tpu.memory_space<vmem>>, vector<1x32xf32>,
    %c1_50 = arith.constant 1 : index
    %c2_51 = arith.constant 2 : index
    %50 = memref.load %arg0[%c1_50, %c2_51] : memref<2x8xi32, #tpu.memory_space<smem>>
    %51 = arith.index_cast %50 : i32 to index
    %c0_52 = arith.constant 0 : index
    %c0_53 = arith.constant 0 : index
    %52 = vector.load %arg2[%51, %c0_52, %c0_53] : memref<64x1x32xf32, #tpu.memory_space<vmem>>, vector<1x1x32xf32>
    %53 = vector.shape_cast %52 : vector<1x1x32xf32> to vector<1x32xf32>
    %c10 = arith.constant 10 : index
    %c0_54 = arith.constant 0 : index
    %54 = vector.load %arg8[%c10, %c0_54] : memref<16x32xf32, #tpu.memory_space<vmem>>, vector<1x32xf32>
    tpu.vector_store %arg8[%c10, %c0_54], %53 {strides = array<i32>} : memref<16x32xf32, #tpu.memory_space<vmem>>, vector<1x32xf32>,
    %c1_55 = arith.constant 1 : index
    %c3_56 = arith.constant 3 : index
    %55 = memref.load %arg0[%c1_55, %c3_56] : memref<2x8xi32, #tpu.memory_space<smem>>
    %56 = arith.index_cast %55 : i32 to index
    %c0_57 = arith.constant 0 : index
    %c0_58 = arith.constant 0 : index
    %57 = vector.load %arg2[%56, %c0_57, %c0_58] : memref<64x1x32xf32, #tpu.memory_space<vmem>>, vector<1x1x32xf32>
    %58 = vector.shape_cast %57 : vector<1x1x32xf32> to vector<1x32xf32>
    %c11 = arith.constant 11 : index
    %c0_59 = arith.constant 0 : index
    %59 = vector.load %arg8[%c11, %c0_59] : memref<16x32xf32, #tpu.memory_space<vmem>>, vector<1x32xf32>
    tpu.vector_store %arg8[%c11, %c0_59], %58 {strides = array<i32>} : memref<16x32xf32, #tpu.memory_space<vmem>>, vector<1x32xf32>,
    %c1_60 = arith.constant 1 : index
    %c4_61 = arith.constant 4 : index
    %60 = memref.load %arg0[%c1_60, %c4_61] : memref<2x8xi32, #tpu.memory_space<smem>>
    %61 = arith.index_cast %60 : i32 to index
    %c0_62 = arith.constant 0 : index
    %c0_63 = arith.constant 0 : index
    %62 = vector.load %arg2[%61, %c0_62, %c0_63] : memref<64x1x32xf32, #tpu.memory_space<vmem>>, vector<1x1x32xf32>
    %63 = vector.shape_cast %62 : vector<1x1x32xf32> to vector<1x32xf32>
    %c12 = arith.constant 12 : index
    %c0_64 = arith.constant 0 : index
    %64 = vector.load %arg8[%c12, %c0_64] : memref<16x32xf32, #tpu.memory_space<vmem>>, vector<1x32xf32>
    tpu.vector_store %arg8[%c12, %c0_64], %63 {strides = array<i32>} : memref<16x32xf32, #tpu.memory_space<vmem>>, vector<1x32xf32>,
    %c1_65 = arith.constant 1 : index
    %c5_66 = arith.constant 5 : index
    %65 = memref.load %arg0[%c1_65, %c5_66] : memref<2x8xi32, #tpu.memory_space<smem>>
    %66 = arith.index_cast %65 : i32 to index
    %c0_67 = arith.constant 0 : index
    %c0_68 = arith.constant 0 : index
    %67 = vector.load %arg2[%66, %c0_67, %c0_68] : memref<64x1x32xf32, #tpu.memory_space<vmem>>, vector<1x1x32xf32>
    %68 = vector.shape_cast %67 : vector<1x1x32xf32> to vector<1x32xf32>
    %c13 = arith.constant 13 : index
    %c0_69 = arith.constant 0 : index
    %69 = vector.load %arg8[%c13, %c0_69] : memref<16x32xf32, #tpu.memory_space<vmem>>, vector<1x32xf32>
    tpu.vector_store %arg8[%c13, %c0_69], %68 {strides = array<i32>} : memref<16x32xf32, #tpu.memory_space<vmem>>, vector<1x32xf32>,
    %c1_70 = arith.constant 1 : index
    %c6_71 = arith.constant 6 : index
    %70 = memref.load %arg0[%c1_70, %c6_71] : memref<2x8xi32, #tpu.memory_space<smem>>
    %71 = arith.index_cast %70 : i32 to index
    %c0_72 = arith.constant 0 : index
    %c0_73 = arith.constant 0 : index
    %72 = vector.load %arg2[%71, %c0_72, %c0_73] : memref<64x1x32xf32, #tpu.memory_space<vmem>>, vector<1x1x32xf32>
    %73 = vector.shape_cast %72 : vector<1x1x32xf32> to vector<1x32xf32>
    %c14 = arith.constant 14 : index
    %c0_74 = arith.constant 0 : index
    %74 = vector.load %arg8[%c14, %c0_74] : memref<16x32xf32, #tpu.memory_space<vmem>>, vector<1x32xf32>
    tpu.vector_store %arg8[%c14, %c0_74], %73 {strides = array<i32>} : memref<16x32xf32, #tpu.memory_space<vmem>>, vector<1x32xf32>,
    %c1_75 = arith.constant 1 : index
    %c7_76 = arith.constant 7 : index
    %75 = memref.load %arg0[%c1_75, %c7_76] : memref<2x8xi32, #tpu.memory_space<smem>>
    %76 = arith.index_cast %75 : i32 to index
    %c0_77 = arith.constant 0 : index
    %c0_78 = arith.constant 0 : index
    %77 = vector.load %arg2[%76, %c0_77, %c0_78] : memref<64x1x32xf32, #tpu.memory_space<vmem>>, vector<1x1x32xf32>
    %78 = vector.shape_cast %77 : vector<1x1x32xf32> to vector<1x32xf32>
    %c15 = arith.constant 15 : index
    %c0_79 = arith.constant 0 : index
    %79 = vector.load %arg8[%c15, %c0_79] : memref<16x32xf32, #tpu.memory_space<vmem>>, vector<1x32xf32>
    tpu.vector_store %arg8[%c15, %c0_79], %78 {strides = array<i32>} : memref<16x32xf32, #tpu.memory_space<vmem>>, vector<1x32xf32>,
    %c0_80 = arith.constant 0 : index
    %c0_81 = arith.constant 0 : index
    %80 = vector.load %arg8[%c0_80, %c0_81] : memref<16x32xf32, #tpu.memory_space<vmem>>, vector<16x32xf32>
    %c24 = arith.constant 24 : index
    %c0_82 = arith.constant 0 : index
    %81 = vector.load %arg6[%c24, %c0_82] : memref<40x128xf32, #tpu.memory_space<vmem>>, vector<16x32xf32>
    %82 = arith.addf %80, %81 : vector<16x32xf32>
    %c0_83 = arith.constant 0 : index
    %c0_84 = arith.constant 0 : index
    %83 = vector.load %arg1[%c0_83, %c0_84] : memref<2x8xi32, #tpu.memory_space<vmem>>, vector<2x8xi32>
    %84 = arith.sitofp %83 : vector<2x8xi32> to vector<2x8xf32>
    %85 = tpu.iota {dimensions = array<i32: 0>} : vector<8x8xi32>
    %86 = tpu.iota {dimensions = array<i32: 1>} : vector<8x8xi32>
    %87 = arith.cmpi sge, %85, %86 : vector<8x8xi32>
    %cst = arith.constant 0.000000e+00 : f32
    %cst_85 = arith.constant -1.000000e+09 : f32
    %88 = vector.broadcast %cst : f32 to vector<8x8xf32>
    %89 = vector.broadcast %cst_85 : f32 to vector<8x8xf32>
    %90 = arith.select %87, %88, %89 : vector<8x8xi1>, vector<8x8xf32>
    %91 = vector.shape_cast %90 : vector<8x8xf32> to vector<1x8x8xf32>
    %cst_86 = arith.constant 1.000000e+00 : f32
    %92 = vector.broadcast %cst_86 : f32 to vector<2x8xf32>
    %93 = arith.subf %92, %84 : vector<2x8xf32>
    %94 = vector.shape_cast %93 : vector<2x8xf32> to vector<2x1x8xf32>
    %cst_87 = arith.constant -1.000000e+09 : f32
    %95 = vector.broadcast %cst_87 : f32 to vector<2x1x8xf32>
    %96 = arith.mulf %94, %95 : vector<2x1x8xf32>
    %97 = vector.broadcast %91 : vector<1x8x8xf32> to vector<2x8x8xf32>
    %98 = vector.broadcast %96 : vector<2x1x8xf32> to vector<2x8x8xf32>
    %99 = arith.addf %97, %98 : vector<2x8x8xf32>
    %100 = vector.shape_cast %99 : vector<2x8x8xf32> to vector<2x1x8x8xf32>
    %101 = vector.shape_cast %100 : vector<2x1x8x8xf32> to vector<2x1x8x8xf32>
    %102 = vector.broadcast %101 : vector<2x1x8x8xf32> to vector<2x4x8x8xf32>
    %103 = vector.shape_cast %102 : vector<2x4x8x8xf32> to vector<8x8x8xf32>
    %c0_88 = arith.constant 0 : index
    %c0_89 = arith.constant 0 : index
    %104 = vector.load %arg6[%c0_88, %c0_89] : memref<40x128xf32, #tpu.memory_space<vmem>>, vector<1x32xf32>
    %c1_90 = arith.constant 1 : index
    %c0_91 = arith.constant 0 : index
    %105 = vector.load %arg6[%c1_90, %c0_91] : memref<40x128xf32, #tpu.memory_space<vmem>>, vector<1x32xf32>
    %cst_92 = arith.constant dense<0.000000e+00> : vector<16xf32>
    %106 = vector.multi_reduction <add>, %82, %cst_92 [1] : vector<16x32xf32> to vector<16xf32>
    %107 = vector.shape_cast %106 : vector<16xf32> to vector<16x1xf32>
    %cst_93 = arith.constant 3.200000e+01 : f32
    %108 = vector.broadcast %cst_93 : f32 to vector<16x1xf32>
    %109 = arith.divf %107, %108 : vector<16x1xf32>
    %110 = arith.mulf %82, %82 : vector<16x32xf32>
    %cst_94 = arith.constant dense<0.000000e+00> : vector<16xf32>
    %111 = vector.multi_reduction <add>, %110, %cst_94 [1] : vector<16x32xf32> to vector<16xf32>
    %112 = vector.shape_cast %111 : vector<16xf32> to vector<16x1xf32>
    %cst_95 = arith.constant 3.200000e+01 : f32
    %113 = vector.broadcast %cst_95 : f32 to vector<16x1xf32>
    %114 = arith.divf %112, %113 : vector<16x1xf32>
    %115 = arith.mulf %109, %109 : vector<16x1xf32>
    %116 = arith.subf %114, %115 : vector<16x1xf32>
    %117 = vector.broadcast %109 : vector<16x1xf32> to vector<16x32xf32>
    %118 = arith.subf %82, %117 : vector<16x32xf32>
    %cst_96 = arith.constant 9.99999974E-6 : f32
    %119 = vector.broadcast %cst_96 : f32 to vector<16x1xf32>
    %120 = arith.addf %116, %119 : vector<16x1xf32>
    %121 = math.rsqrt %120 : vector<16x1xf32>
    %122 = vector.broadcast %121 : vector<16x1xf32> to vector<16x32xf32>
    %123 = arith.mulf %118, %122 : vector<16x32xf32>
    %124 = vector.broadcast %104 : vector<1x32xf32> to vector<16x32xf32>
    %125 = arith.mulf %123, %124 : vector<16x32xf32>
    %126 = vector.broadcast %105 : vector<1x32xf32> to vector<16x32xf32>
    %127 = arith.addf %125, %126 : vector<16x32xf32>
    %c0_97 = arith.constant 0 : index
    %c0_98 = arith.constant 0 : index
    %c0_99 = arith.constant 0 : index
    %128 = vector.load %arg3[%c0_97, %c0_98, %c0_99] : memref<8x32x32xf32, #tpu.memory_space<vmem>>, vector<1x32x32xf32>
    %129 = vector.shape_cast %128 : vector<1x32x32xf32> to vector<32x32xf32>
    %cst_100 = arith.constant dense<0.000000e+00> : vector<16x32xf32>
    %130 = tpu.matmul %127, %129, %cst_100 {dimension_numbers = #tpu.dot_dimension_numbers<[1], [0], [0], [1], [0, 0, 1, 1], [], []>} : vector<16x32xf32>, vector<32x32xf32>, vector<16x32xf32> -> vector<16x32xf32>
    %c2_101 = arith.constant 2 : index
    %c0_102 = arith.constant 0 : index
    %131 = vector.load %arg6[%c2_101, %c0_102] : memref<40x128xf32, #tpu.memory_space<vmem>>, vector<1x32xf32>
    %132 = vector.broadcast %131 : vector<1x32xf32> to vector<16x32xf32>
    %133 = arith.addf %130, %132 : vector<16x32xf32>
    %c1_103 = arith.constant 1 : index
    %c0_104 = arith.constant 0 : index
    %c0_105 = arith.constant 0 : index
    %134 = vector.load %arg3[%c1_103, %c0_104, %c0_105] : memref<8x32x32xf32, #tpu.memory_space<vmem>>, vector<1x32x32xf32>
    %135 = vector.shape_cast %134 : vector<1x32x32xf32> to vector<32x32xf32>
    %cst_106 = arith.constant dense<0.000000e+00> : vector<16x32xf32>
    %136 = tpu.matmul %127, %135, %cst_106 {dimension_numbers = #tpu.dot_dimension_numbers<[1], [0], [0], [1], [0, 0, 1, 1], [], []>} : vector<16x32xf32>, vector<32x32xf32>, vector<16x32xf32> -> vector<16x32xf32>
    %c3_107 = arith.constant 3 : index
    %c0_108 = arith.constant 0 : index
    %137 = vector.load %arg6[%c3_107, %c0_108] : memref<40x128xf32, #tpu.memory_space<vmem>>, vector<1x32xf32>
    %138 = vector.broadcast %137 : vector<1x32xf32> to vector<16x32xf32>
    %139 = arith.addf %136, %138 : vector<16x32xf32>
    %c2_109 = arith.constant 2 : index
    %c0_110 = arith.constant 0 : index
    %c0_111 = arith.constant 0 : index
    %140 = vector.load %arg3[%c2_109, %c0_110, %c0_111] : memref<8x32x32xf32, #tpu.memory_space<vmem>>, vector<1x32x32xf32>
    %141 = vector.shape_cast %140 : vector<1x32x32xf32> to vector<32x32xf32>
    %cst_112 = arith.constant dense<0.000000e+00> : vector<16x32xf32>
    %142 = tpu.matmul %127, %141, %cst_112 {dimension_numbers = #tpu.dot_dimension_numbers<[1], [0], [0], [1], [0, 0, 1, 1], [], []>} : vector<16x32xf32>, vector<32x32xf32>, vector<16x32xf32> -> vector<16x32xf32>
    %c4_113 = arith.constant 4 : index
    %c0_114 = arith.constant 0 : index
    %143 = vector.load %arg6[%c4_113, %c0_114] : memref<40x128xf32, #tpu.memory_space<vmem>>, vector<1x32xf32>
    %144 = vector.broadcast %143 : vector<1x32xf32> to vector<16x32xf32>
    %145 = arith.addf %142, %144 : vector<16x32xf32>
    %146 = vector.shape_cast %133 : vector<16x32xf32> to vector<2x8x4x8xf32>
    %147 = tpu.transpose %146, [0, 2, 1, 3] : vector<2x8x4x8xf32> -> vector<2x4x8x8xf32>
    %148 = vector.shape_cast %147 : vector<2x4x8x8xf32> to vector<8x8x8xf32>
    %149 = vector.shape_cast %139 : vector<16x32xf32> to vector<2x8x4x8xf32>
    %150 = tpu.transpose %149, [0, 2, 1, 3] : vector<2x8x4x8xf32> -> vector<2x4x8x8xf32>
    %151 = vector.shape_cast %150 : vector<2x4x8x8xf32> to vector<8x8x8xf32>
    %152 = vector.shape_cast %145 : vector<16x32xf32> to vector<2x8x4x8xf32>
    %153 = tpu.transpose %152, [0, 2, 1, 3] : vector<2x8x4x8xf32> -> vector<2x4x8x8xf32>
    %154 = vector.shape_cast %153 : vector<2x4x8x8xf32> to vector<8x8x8xf32>
    "tpu.trace_start"() <{level = 10 : i32, message = "btd,bsd->bts"}> : () -> ()
    %cst_115 = arith.constant dense<0.000000e+00> : vector<8x8x8xf32>
    %155 = tpu.matmul %148, %151, %cst_115 {dimension_numbers = #tpu.dot_dimension_numbers<[2], [2], [1], [1], [0, 0, 0, 1, 1, 1], [0], [0]>} : vector<8x8x8xf32>, vector<8x8x8xf32>, vector<8x8x8xf32> -> vector<8x8x8xf32>
    "tpu.trace_stop"() : () -> ()
    %156 = arith.addf %155, %103 : vector<8x8x8xf32>
    %cst_116 = arith.constant dense<0xFF800000> : vector<8x8xf32>
    %157 = vector.multi_reduction <maximumf>, %156, %cst_116 [2] : vector<8x8x8xf32> to vector<8x8xf32>
    %158 = vector.shape_cast %157 : vector<8x8xf32> to vector<8x8x1xf32>
    %159 = vector.broadcast %158 : vector<8x8x1xf32> to vector<8x8x8xf32>
    %160 = arith.subf %156, %159 : vector<8x8x8xf32>
    %161 = math.exp %160 : vector<8x8x8xf32>
    %cst_117 = arith.constant dense<0.000000e+00> : vector<8x8xf32>
    %162 = vector.multi_reduction <add>, %161, %cst_117 [2] : vector<8x8x8xf32> to vector<8x8xf32>
    %163 = vector.shape_cast %162 : vector<8x8xf32> to vector<8x8x1xf32>
    %164 = tpu.reciprocal %163 {approx = true} : vector<8x8x1xf32> -> vector<8x8x1xf32>
    %165 = vector.broadcast %164 : vector<8x8x1xf32> to vector<8x8x8xf32>
    %166 = arith.mulf %161, %165 : vector<8x8x8xf32>
    "tpu.trace_start"() <{level = 10 : i32, message = "bts,bsd->btd"}> : () -> ()
    %cst_118 = arith.constant dense<0.000000e+00> : vector<8x8x8xf32>
    %167 = tpu.matmul %166, %154, %cst_118 {dimension_numbers = #tpu.dot_dimension_numbers<[2], [1], [1], [2], [0, 0, 0, 1, 1, 2], [0], [0]>} : vector<8x8x8xf32>, vector<8x8x8xf32>, vector<8x8x8xf32> -> vector<8x8x8xf32>
    "tpu.trace_stop"() : () -> ()
    %168 = vector.shape_cast %167 : vector<8x8x8xf32> to vector<2x4x8x8xf32>
    %169 = tpu.transpose %168, [0, 2, 1, 3] : vector<2x4x8x8xf32> -> vector<2x8x4x8xf32>
    %170 = vector.shape_cast %169 : vector<2x8x4x8xf32> to vector<16x32xf32>
    %c3_119 = arith.constant 3 : index
    %c0_120 = arith.constant 0 : index
    %c0_121 = arith.constant 0 : index
    %171 = vector.load %arg3[%c3_119, %c0_120, %c0_121] : memref<8x32x32xf32, #tpu.memory_space<vmem>>, vector<1x32x32xf32>
    %172 = vector.shape_cast %171 : vector<1x32x32xf32> to vector<32x32xf32>
    %cst_122 = arith.constant dense<0.000000e+00> : vector<16x32xf32>
    %173 = tpu.matmul %170, %172, %cst_122 {dimension_numbers = #tpu.dot_dimension_numbers<[1], [0], [0], [1], [0, 0, 1, 1], [], []>} : vector<16x32xf32>, vector<32x32xf32>, vector<16x32xf32> -> vector<16x32xf32>
    %c5_123 = arith.constant 5 : index
    %c0_124 = arith.constant 0 : index
    %174 = vector.load %arg6[%c5_123, %c0_124] : memref<40x128xf32, #tpu.memory_space<vmem>>, vector<1x32xf32>
    %175 = vector.broadcast %174 : vector<1x32xf32> to vector<16x32xf32>
    %176 = arith.addf %173, %175 : vector<16x32xf32>
    %177 = arith.addf %82, %176 : vector<16x32xf32>
    %c6_125 = arith.constant 6 : index
    %c0_126 = arith.constant 0 : index
    %178 = vector.load %arg6[%c6_125, %c0_126] : memref<40x128xf32, #tpu.memory_space<vmem>>, vector<1x32xf32>
    %c7_127 = arith.constant 7 : index
    %c0_128 = arith.constant 0 : index
    %179 = vector.load %arg6[%c7_127, %c0_128] : memref<40x128xf32, #tpu.memory_space<vmem>>, vector<1x32xf32>
    %cst_129 = arith.constant dense<0.000000e+00> : vector<16xf32>
    %180 = vector.multi_reduction <add>, %177, %cst_129 [1] : vector<16x32xf32> to vector<16xf32>
    %181 = vector.shape_cast %180 : vector<16xf32> to vector<16x1xf32>
    %cst_130 = arith.constant 3.200000e+01 : f32
    %182 = vector.broadcast %cst_130 : f32 to vector<16x1xf32>
    %183 = arith.divf %181, %182 : vector<16x1xf32>
    %184 = arith.mulf %177, %177 : vector<16x32xf32>
    %cst_131 = arith.constant dense<0.000000e+00> : vector<16xf32>
    %185 = vector.multi_reduction <add>, %184, %cst_131 [1] : vector<16x32xf32> to vector<16xf32>
    %186 = vector.shape_cast %185 : vector<16xf32> to vector<16x1xf32>
    %cst_132 = arith.constant 3.200000e+01 : f32
    %187 = vector.broadcast %cst_132 : f32 to vector<16x1xf32>
    %188 = arith.divf %186, %187 : vector<16x1xf32>
    %189 = arith.mulf %183, %183 : vector<16x1xf32>
    %190 = arith.subf %188, %189 : vector<16x1xf32>
    %191 = vector.broadcast %183 : vector<16x1xf32> to vector<16x32xf32>
    %192 = arith.subf %177, %191 : vector<16x32xf32>
    %cst_133 = arith.constant 9.99999974E-6 : f32
    %193 = vector.broadcast %cst_133 : f32 to vector<16x1xf32>
    %194 = arith.addf %190, %193 : vector<16x1xf32>
    %195 = math.rsqrt %194 : vector<16x1xf32>
    %196 = vector.broadcast %195 : vector<16x1xf32> to vector<16x32xf32>
    %197 = arith.mulf %192, %196 : vector<16x32xf32>
    %198 = vector.broadcast %178 : vector<1x32xf32> to vector<16x32xf32>
    %199 = arith.mulf %197, %198 : vector<16x32xf32>
    %200 = vector.broadcast %179 : vector<1x32xf32> to vector<16x32xf32>
    %201 = arith.addf %199, %200 : vector<16x32xf32>
    %c0_134 = arith.constant 0 : index
    %c0_135 = arith.constant 0 : index
    %c0_136 = arith.constant 0 : index
    %202 = vector.load %arg4[%c0_134, %c0_135, %c0_136] : memref<3x32x128xf32, #tpu.memory_space<vmem>>, vector<1x32x128xf32>
    %203 = vector.shape_cast %202 : vector<1x32x128xf32> to vector<32x128xf32>
    %cst_137 = arith.constant dense<0.000000e+00> : vector<16x128xf32>
    %204 = tpu.matmul %201, %203, %cst_137 {dimension_numbers = #tpu.dot_dimension_numbers<[1], [0], [0], [1], [0, 0, 1, 1], [], []>} : vector<16x32xf32>, vector<32x128xf32>, vector<16x128xf32> -> vector<16x128xf32>
    %c8_138 = arith.constant 8 : index
    %c0_139 = arith.constant 0 : index
    %205 = vector.load %arg6[%c8_138, %c0_139] : memref<40x128xf32, #tpu.memory_space<vmem>>, vector<1x128xf32>
    %206 = vector.broadcast %205 : vector<1x128xf32> to vector<16x128xf32>
    %207 = arith.addf %204, %206 : vector<16x128xf32>
    %cst_140 = arith.constant 5.000000e-01 : f32
    %208 = vector.broadcast %cst_140 : f32 to vector<16x128xf32>
    %209 = arith.mulf %208, %207 : vector<16x128xf32>
    %cst_141 = arith.constant 4.471500e-02 : f32
    %210 = vector.broadcast %cst_141 : f32 to vector<16x128xf32>
    %211 = arith.mulf %210, %207 : vector<16x128xf32>
    %212 = arith.mulf %211, %207 : vector<16x128xf32>
    %213 = arith.mulf %212, %207 : vector<16x128xf32>
    %214 = arith.addf %207, %213 : vector<16x128xf32>
    %cst_142 = arith.constant 0.797884583 : f32
    %215 = vector.broadcast %cst_142 : f32 to vector<16x128xf32>
    %216 = arith.mulf %215, %214 : vector<16x128xf32>
    %217 = math.tanh %216 : vector<16x128xf32>
    %cst_143 = arith.constant 1.000000e+00 : f32
    %218 = vector.broadcast %cst_143 : f32 to vector<16x128xf32>
    %219 = arith.addf %218, %217 : vector<16x128xf32>
    %220 = arith.mulf %209, %219 : vector<16x128xf32>
    %c0_144 = arith.constant 0 : index
    %c0_145 = arith.constant 0 : index
    %c0_146 = arith.constant 0 : index
    %221 = vector.load %arg5[%c0_144, %c0_145, %c0_146] : memref<2x128x32xf32, #tpu.memory_space<vmem>>, vector<1x128x32xf32>
    %222 = vector.shape_cast %221 : vector<1x128x32xf32> to vector<128x32xf32>
    %cst_147 = arith.constant dense<0.000000e+00> : vector<16x32xf32>
    %223 = tpu.matmul %220, %222, %cst_147 {dimension_numbers = #tpu.dot_dimension_numbers<[1], [0], [0], [1], [0, 0, 1, 1], [], []>} : vector<16x128xf32>, vector<128x32xf32>, vector<16x32xf32> -> vector<16x32xf32>
    %c9_148 = arith.constant 9 : index
    %c0_149 = arith.constant 0 : index
    %224 = vector.load %arg6[%c9_148, %c0_149] : memref<40x128xf32, #tpu.memory_space<vmem>>, vector<1x32xf32>
    %225 = vector.broadcast %224 : vector<1x32xf32> to vector<16x32xf32>
    %226 = arith.addf %223, %225 : vector<16x32xf32>
    %227 = arith.addf %177, %226 : vector<16x32xf32>
    %c10_150 = arith.constant 10 : index
    %c0_151 = arith.constant 0 : index
    %228 = vector.load %arg6[%c10_150, %c0_151] : memref<40x128xf32, #tpu.memory_space<vmem>>, vector<1x32xf32>
    %c11_152 = arith.constant 11 : index
    %c0_153 = arith.constant 0 : index
    %229 = vector.load %arg6[%c11_152, %c0_153] : memref<40x128xf32, #tpu.memory_space<vmem>>, vector<1x32xf32>
    %cst_154 = arith.constant dense<0.000000e+00> : vector<16xf32>
    %230 = vector.multi_reduction <add>, %227, %cst_154 [1] : vector<16x32xf32> to vector<16xf32>
    %231 = vector.shape_cast %230 : vector<16xf32> to vector<16x1xf32>
    %cst_155 = arith.constant 3.200000e+01 : f32
    %232 = vector.broadcast %cst_155 : f32 to vector<16x1xf32>
    %233 = arith.divf %231, %232 : vector<16x1xf32>
    %234 = arith.mulf %227, %227 : vector<16x32xf32>
    %cst_156 = arith.constant dense<0.000000e+00> : vector<16xf32>
    %235 = vector.multi_reduction <add>, %234, %cst_156 [1] : vector<16x32xf32> to vector<16xf32>
    %236 = vector.shape_cast %235 : vector<16xf32> to vector<16x1xf32>
    %cst_157 = arith.constant 3.200000e+01 : f32
    %237 = vector.broadcast %cst_157 : f32 to vector<16x1xf32>
    %238 = arith.divf %236, %237 : vector<16x1xf32>
    %239 = arith.mulf %233, %233 : vector<16x1xf32>
    %240 = arith.subf %238, %239 : vector<16x1xf32>
    %241 = vector.broadcast %233 : vector<16x1xf32> to vector<16x32xf32>
    %242 = arith.subf %227, %241 : vector<16x32xf32>
    %cst_158 = arith.constant 9.99999974E-6 : f32
    %243 = vector.broadcast %cst_158 : f32 to vector<16x1xf32>
    %244 = arith.addf %240, %243 : vector<16x1xf32>
    %245 = math.rsqrt %244 : vector<16x1xf32>
    %246 = vector.broadcast %245 : vector<16x1xf32> to vector<16x32xf32>
    %247 = arith.mulf %242, %246 : vector<16x32xf32>
    %248 = vector.broadcast %228 : vector<1x32xf32> to vector<16x32xf32>
    %249 = arith.mulf %247, %248 : vector<16x32xf32>
    %250 = vector.broadcast %229 : vector<1x32xf32> to vector<16x32xf32>
    %251 = arith.addf %249, %250 : vector<16x32xf32>
    %c4_159 = arith.constant 4 : index
    %c0_160 = arith.constant 0 : index
    %c0_161 = arith.constant 0 : index
    %252 = vector.load %arg3[%c4_159, %c0_160, %c0_161] : memref<8x32x32xf32, #tpu.memory_space<vmem>>, vector<1x32x32xf32>
    %253 = vector.shape_cast %252 : vector<1x32x32xf32> to vector<32x32xf32>
    %cst_162 = arith.constant dense<0.000000e+00> : vector<16x32xf32>
    %254 = tpu.matmul %251, %253, %cst_162 {dimension_numbers = #tpu.dot_dimension_numbers<[1], [0], [0], [1], [0, 0, 1, 1], [], []>} : vector<16x32xf32>, vector<32x32xf32>, vector<16x32xf32> -> vector<16x32xf32>
    %c12_163 = arith.constant 12 : index
    %c0_164 = arith.constant 0 : index
    %255 = vector.load %arg6[%c12_163, %c0_164] : memref<40x128xf32, #tpu.memory_space<vmem>>, vector<1x32xf32>
    %256 = vector.broadcast %255 : vector<1x32xf32> to vector<16x32xf32>
    %257 = arith.addf %254, %256 : vector<16x32xf32>
    %c5_165 = arith.constant 5 : index
    %c0_166 = arith.constant 0 : index
    %c0_167 = arith.constant 0 : index
    %258 = vector.load %arg3[%c5_165, %c0_166, %c0_167] : memref<8x32x32xf32, #tpu.memory_space<vmem>>, vector<1x32x32xf32>
    %259 = vector.shape_cast %258 : vector<1x32x32xf32> to vector<32x32xf32>
    %cst_168 = arith.constant dense<0.000000e+00> : vector<16x32xf32>
    %260 = tpu.matmul %251, %259, %cst_168 {dimension_numbers = #tpu.dot_dimension_numbers<[1], [0], [0], [1], [0, 0, 1, 1], [], []>} : vector<16x32xf32>, vector<32x32xf32>, vector<16x32xf32> -> vector<16x32xf32>
    %c13_169 = arith.constant 13 : index
    %c0_170 = arith.constant 0 : index
    %261 = vector.load %arg6[%c13_169, %c0_170] : memref<40x128xf32, #tpu.memory_space<vmem>>, vector<1x32xf32>
    %262 = vector.broadcast %261 : vector<1x32xf32> to vector<16x32xf32>
    %263 = arith.addf %260, %262 : vector<16x32xf32>
    %c6_171 = arith.constant 6 : index
    %c0_172 = arith.constant 0 : index
    %c0_173 = arith.constant 0 : index
    %264 = vector.load %arg3[%c6_171, %c0_172, %c0_173] : memref<8x32x32xf32, #tpu.memory_space<vmem>>, vector<1x32x32xf32>
    %265 = vector.shape_cast %264 : vector<1x32x32xf32> to vector<32x32xf32>
    %cst_174 = arith.constant dense<0.000000e+00> : vector<16x32xf32>
    %266 = tpu.matmul %251, %265, %cst_174 {dimension_numbers = #tpu.dot_dimension_numbers<[1], [0], [0], [1], [0, 0, 1, 1], [], []>} : vector<16x32xf32>, vector<32x32xf32>, vector<16x32xf32> -> vector<16x32xf32>
    %c14_175 = arith.constant 14 : index
    %c0_176 = arith.constant 0 : index
    %267 = vector.load %arg6[%c14_175, %c0_176] : memref<40x128xf32, #tpu.memory_space<vmem>>, vector<1x32xf32>
    %268 = vector.broadcast %267 : vector<1x32xf32> to vector<16x32xf32>
    %269 = arith.addf %266, %268 : vector<16x32xf32>
    %270 = vector.shape_cast %257 : vector<16x32xf32> to vector<2x8x4x8xf32>
    %271 = tpu.transpose %270, [0, 2, 1, 3] : vector<2x8x4x8xf32> -> vector<2x4x8x8xf32>
    %272 = vector.shape_cast %271 : vector<2x4x8x8xf32> to vector<8x8x8xf32>
    %273 = vector.shape_cast %263 : vector<16x32xf32> to vector<2x8x4x8xf32>
    %274 = tpu.transpose %273, [0, 2, 1, 3] : vector<2x8x4x8xf32> -> vector<2x4x8x8xf32>
    %275 = vector.shape_cast %274 : vector<2x4x8x8xf32> to vector<8x8x8xf32>
    %276 = vector.shape_cast %269 : vector<16x32xf32> to vector<2x8x4x8xf32>
    %277 = tpu.transpose %276, [0, 2, 1, 3] : vector<2x8x4x8xf32> -> vector<2x4x8x8xf32>
    %278 = vector.shape_cast %277 : vector<2x4x8x8xf32> to vector<8x8x8xf32>
    "tpu.trace_start"() <{level = 10 : i32, message = "btd,bsd->bts"}> : () -> ()
    %cst_177 = arith.constant dense<0.000000e+00> : vector<8x8x8xf32>
    %279 = tpu.matmul %272, %275, %cst_177 {dimension_numbers = #tpu.dot_dimension_numbers<[2], [2], [1], [1], [0, 0, 0, 1, 1, 1], [0], [0]>} : vector<8x8x8xf32>, vector<8x8x8xf32>, vector<8x8x8xf32> -> vector<8x8x8xf32>
    "tpu.trace_stop"() : () -> ()
    %280 = arith.addf %279, %103 : vector<8x8x8xf32>
    %cst_178 = arith.constant dense<0xFF800000> : vector<8x8xf32>
    %281 = vector.multi_reduction <maximumf>, %280, %cst_178 [2] : vector<8x8x8xf32> to vector<8x8xf32>
    %282 = vector.shape_cast %281 : vector<8x8xf32> to vector<8x8x1xf32>
    %283 = vector.broadcast %282 : vector<8x8x1xf32> to vector<8x8x8xf32>
    %284 = arith.subf %280, %283 : vector<8x8x8xf32>
    %285 = math.exp %284 : vector<8x8x8xf32>
    %cst_179 = arith.constant dense<0.000000e+00> : vector<8x8xf32>
    %286 = vector.multi_reduction <add>, %285, %cst_179 [2] : vector<8x8x8xf32> to vector<8x8xf32>
    %287 = vector.shape_cast %286 : vector<8x8xf32> to vector<8x8x1xf32>
    %288 = tpu.reciprocal %287 {approx = true} : vector<8x8x1xf32> -> vector<8x8x1xf32>
    %289 = vector.broadcast %288 : vector<8x8x1xf32> to vector<8x8x8xf32>
    %290 = arith.mulf %285, %289 : vector<8x8x8xf32>
    "tpu.trace_start"() <{level = 10 : i32, message = "bts,bsd->btd"}> : () -> ()
    %cst_180 = arith.constant dense<0.000000e+00> : vector<8x8x8xf32>
    %291 = tpu.matmul %290, %278, %cst_180 {dimension_numbers = #tpu.dot_dimension_numbers<[2], [1], [1], [2], [0, 0, 0, 1, 1, 2], [0], [0]>} : vector<8x8x8xf32>, vector<8x8x8xf32>, vector<8x8x8xf32> -> vector<8x8x8xf32>
    "tpu.trace_stop"() : () -> ()
    %292 = vector.shape_cast %291 : vector<8x8x8xf32> to vector<2x4x8x8xf32>
    %293 = tpu.transpose %292, [0, 2, 1, 3] : vector<2x4x8x8xf32> -> vector<2x8x4x8xf32>
    %294 = vector.shape_cast %293 : vector<2x8x4x8xf32> to vector<16x32xf32>
    %c7_181 = arith.constant 7 : index
    %c0_182 = arith.constant 0 : index
    %c0_183 = arith.constant 0 : index
    %295 = vector.load %arg3[%c7_181, %c0_182, %c0_183] : memref<8x32x32xf32, #tpu.memory_space<vmem>>, vector<1x32x32xf32>
    %296 = vector.shape_cast %295 : vector<1x32x32xf32> to vector<32x32xf32>
    %cst_184 = arith.constant dense<0.000000e+00> : vector<16x32xf32>
    %297 = tpu.matmul %294, %296, %cst_184 {dimension_numbers = #tpu.dot_dimension_numbers<[1], [0], [0], [1], [0, 0, 1, 1], [], []>} : vector<16x32xf32>, vector<32x32xf32>, vector<16x32xf32> -> vector<16x32xf32>
    %c15_185 = arith.constant 15 : index
    %c0_186 = arith.constant 0 : index
    %298 = vector.load %arg6[%c15_185, %c0_186] : memref<40x128xf32, #tpu.memory_space<vmem>>, vector<1x32xf32>
    %299 = vector.broadcast %298 : vector<1x32xf32> to vector<16x32xf32>
    %300 = arith.addf %297, %299 : vector<16x32xf32>
    %301 = arith.addf %227, %300 : vector<16x32xf32>
    %c16 = arith.constant 16 : index
    %c0_187 = arith.constant 0 : index
    %302 = vector.load %arg6[%c16, %c0_187] : memref<40x128xf32, #tpu.memory_space<vmem>>, vector<1x32xf32>
    %c17 = arith.constant 17 : index
    %c0_188 = arith.constant 0 : index
    %303 = vector.load %arg6[%c17, %c0_188] : memref<40x128xf32, #tpu.memory_space<vmem>>, vector<1x32xf32>
    %cst_189 = arith.constant dense<0.000000e+00> : vector<16xf32>
    %304 = vector.multi_reduction <add>, %301, %cst_189 [1] : vector<16x32xf32> to vector<16xf32>
    %305 = vector.shape_cast %304 : vector<16xf32> to vector<16x1xf32>
    %cst_190 = arith.constant 3.200000e+01 : f32
    %306 = vector.broadcast %cst_190 : f32 to vector<16x1xf32>
    %307 = arith.divf %305, %306 : vector<16x1xf32>
    %308 = arith.mulf %301, %301 : vector<16x32xf32>
    %cst_191 = arith.constant dense<0.000000e+00> : vector<16xf32>
    %309 = vector.multi_reduction <add>, %308, %cst_191 [1] : vector<16x32xf32> to vector<16xf32>
    %310 = vector.shape_cast %309 : vector<16xf32> to vector<16x1xf32>
    %cst_192 = arith.constant 3.200000e+01 : f32
    %311 = vector.broadcast %cst_192 : f32 to vector<16x1xf32>
    %312 = arith.divf %310, %311 : vector<16x1xf32>
    %313 = arith.mulf %307, %307 : vector<16x1xf32>
    %314 = arith.subf %312, %313 : vector<16x1xf32>
    %315 = vector.broadcast %307 : vector<16x1xf32> to vector<16x32xf32>
    %316 = arith.subf %301, %315 : vector<16x32xf32>
    %cst_193 = arith.constant 9.99999974E-6 : f32
    %317 = vector.broadcast %cst_193 : f32 to vector<16x1xf32>
    %318 = arith.addf %314, %317 : vector<16x1xf32>
    %319 = math.rsqrt %318 : vector<16x1xf32>
    %320 = vector.broadcast %319 : vector<16x1xf32> to vector<16x32xf32>
    %321 = arith.mulf %316, %320 : vector<16x32xf32>
    %322 = vector.broadcast %302 : vector<1x32xf32> to vector<16x32xf32>
    %323 = arith.mulf %321, %322 : vector<16x32xf32>
    %324 = vector.broadcast %303 : vector<1x32xf32> to vector<16x32xf32>
    %325 = arith.addf %323, %324 : vector<16x32xf32>
    %c1_194 = arith.constant 1 : index
    %c0_195 = arith.constant 0 : index
    %c0_196 = arith.constant 0 : index
    %326 = vector.load %arg4[%c1_194, %c0_195, %c0_196] : memref<3x32x128xf32, #tpu.memory_space<vmem>>, vector<1x32x128xf32>
    %327 = vector.shape_cast %326 : vector<1x32x128xf32> to vector<32x128xf32>
    %cst_197 = arith.constant dense<0.000000e+00> : vector<16x128xf32>
    %328 = tpu.matmul %325, %327, %cst_197 {dimension_numbers = #tpu.dot_dimension_numbers<[1], [0], [0], [1], [0, 0, 1, 1], [], []>} : vector<16x32xf32>, vector<32x128xf32>, vector<16x128xf32> -> vector<16x128xf32>
    %c18 = arith.constant 18 : index
    %c0_198 = arith.constant 0 : index
    %329 = vector.load %arg6[%c18, %c0_198] : memref<40x128xf32, #tpu.memory_space<vmem>>, vector<1x128xf32>
    %330 = vector.broadcast %329 : vector<1x128xf32> to vector<16x128xf32>
    %331 = arith.addf %328, %330 : vector<16x128xf32>
    %cst_199 = arith.constant 5.000000e-01 : f32
    %332 = vector.broadcast %cst_199 : f32 to vector<16x128xf32>
    %333 = arith.mulf %332, %331 : vector<16x128xf32>
    %cst_200 = arith.constant 4.471500e-02 : f32
    %334 = vector.broadcast %cst_200 : f32 to vector<16x128xf32>
    %335 = arith.mulf %334, %331 : vector<16x128xf32>
    %336 = arith.mulf %335, %331 : vector<16x128xf32>
    %337 = arith.mulf %336, %331 : vector<16x128xf32>
    %338 = arith.addf %331, %337 : vector<16x128xf32>
    %cst_201 = arith.constant 0.797884583 : f32
    %339 = vector.broadcast %cst_201 : f32 to vector<16x128xf32>
    %340 = arith.mulf %339, %338 : vector<16x128xf32>
    %341 = math.tanh %340 : vector<16x128xf32>
    %cst_202 = arith.constant 1.000000e+00 : f32
    %342 = vector.broadcast %cst_202 : f32 to vector<16x128xf32>
    %343 = arith.addf %342, %341 : vector<16x128xf32>
    %344 = arith.mulf %333, %343 : vector<16x128xf32>
    %c1_203 = arith.constant 1 : index
    %c0_204 = arith.constant 0 : index
    %c0_205 = arith.constant 0 : index
    %345 = vector.load %arg5[%c1_203, %c0_204, %c0_205] : memref<2x128x32xf32, #tpu.memory_space<vmem>>, vector<1x128x32xf32>
    %346 = vector.shape_cast %345 : vector<1x128x32xf32> to vector<128x32xf32>
    %cst_206 = arith.constant dense<0.000000e+00> : vector<16x32xf32>
    %347 = tpu.matmul %344, %346, %cst_206 {dimension_numbers = #tpu.dot_dimension_numbers<[1], [0], [0], [1], [0, 0, 1, 1], [], []>} : vector<16x128xf32>, vector<128x32xf32>, vector<16x32xf32> -> vector<16x32xf32>
    %c19 = arith.constant 19 : index
    %c0_207 = arith.constant 0 : index
    %348 = vector.load %arg6[%c19, %c0_207] : memref<40x128xf32, #tpu.memory_space<vmem>>, vector<1x32xf32>
    %349 = vector.broadcast %348 : vector<1x32xf32> to vector<16x32xf32>
    %350 = arith.addf %347, %349 : vector<16x32xf32>
    %351 = arith.addf %301, %350 : vector<16x32xf32>
    %c20 = arith.constant 20 : index
    %c0_208 = arith.constant 0 : index
    %352 = vector.load %arg6[%c20, %c0_208] : memref<40x128xf32, #tpu.memory_space<vmem>>, vector<1x32xf32>
    %c21 = arith.constant 21 : index
    %c0_209 = arith.constant 0 : index
    %353 = vector.load %arg6[%c21, %c0_209] : memref<40x128xf32, #tpu.memory_space<vmem>>, vector<1x32xf32>
    %cst_210 = arith.constant dense<0.000000e+00> : vector<16xf32>
    %354 = vector.multi_reduction <add>, %351, %cst_210 [1] : vector<16x32xf32> to vector<16xf32>
    %355 = vector.shape_cast %354 : vector<16xf32> to vector<16x1xf32>
    %cst_211 = arith.constant 3.200000e+01 : f32
    %356 = vector.broadcast %cst_211 : f32 to vector<16x1xf32>
    %357 = arith.divf %355, %356 : vector<16x1xf32>
    %358 = arith.mulf %351, %351 : vector<16x32xf32>
    %cst_212 = arith.constant dense<0.000000e+00> : vector<16xf32>
    %359 = vector.multi_reduction <add>, %358, %cst_212 [1] : vector<16x32xf32> to vector<16xf32>
    %360 = vector.shape_cast %359 : vector<16xf32> to vector<16x1xf32>
    %cst_213 = arith.constant 3.200000e+01 : f32
    %361 = vector.broadcast %cst_213 : f32 to vector<16x1xf32>
    %362 = arith.divf %360, %361 : vector<16x1xf32>
    %363 = arith.mulf %357, %357 : vector<16x1xf32>
    %364 = arith.subf %362, %363 : vector<16x1xf32>
    %365 = vector.broadcast %357 : vector<16x1xf32> to vector<16x32xf32>
    %366 = arith.subf %351, %365 : vector<16x32xf32>
    %cst_214 = arith.constant 9.99999974E-6 : f32
    %367 = vector.broadcast %cst_214 : f32 to vector<16x1xf32>
    %368 = arith.addf %364, %367 : vector<16x1xf32>
    %369 = math.rsqrt %368 : vector<16x1xf32>
    %370 = vector.broadcast %369 : vector<16x1xf32> to vector<16x32xf32>
    %371 = arith.mulf %366, %370 : vector<16x32xf32>
    %372 = vector.broadcast %352 : vector<1x32xf32> to vector<16x32xf32>
    %373 = arith.mulf %371, %372 : vector<16x32xf32>
    %374 = vector.broadcast %353 : vector<1x32xf32> to vector<16x32xf32>
    %375 = arith.addf %373, %374 : vector<16x32xf32>
    %c2_215 = arith.constant 2 : index
    %c0_216 = arith.constant 0 : index
    %c0_217 = arith.constant 0 : index
    %376 = vector.load %arg4[%c2_215, %c0_216, %c0_217] : memref<3x32x128xf32, #tpu.memory_space<vmem>>, vector<1x32x128xf32>
    %377 = vector.shape_cast %376 : vector<1x32x128xf32> to vector<32x128xf32>
    %cst_218 = arith.constant dense<0.000000e+00> : vector<16x128xf32>
    %378 = tpu.matmul %375, %377, %cst_218 {dimension_numbers = #tpu.dot_dimension_numbers<[1], [0], [0], [1], [0, 0, 1, 1], [], []>} : vector<16x32xf32>, vector<32x128xf32>, vector<16x128xf32> -> vector<16x128xf32>
    %379 = vector.extract_strided_slice %378 {offsets = [0, 0], sizes = [16, 64], strides = [1, 1]} : vector<16x128xf32> to vector<16x64xf32>
    %c22 = arith.constant 22 : index
    %c0_219 = arith.constant 0 : index
    %380 = vector.load %arg6[%c22, %c0_219] : memref<40x128xf32, #tpu.memory_space<vmem>>, vector<1x64xf32>
    %381 = vector.broadcast %380 : vector<1x64xf32> to vector<16x64xf32>
    %382 = arith.addf %379, %381 : vector<16x64xf32>
    %383 = vector.shape_cast %382 : vector<16x64xf32> to vector<2x8x64xf32>
    %c0_220 = arith.constant 0 : index
    %c0_221 = arith.constant 0 : index
    %c0_222 = arith.constant 0 : index
    %384 = vector.load %arg7[%c0_220, %c0_221, %c0_222] : memref<2x8x64xf32, #tpu.memory_space<vmem>>, vector<2x8x64xf32>
    tpu.vector_store %arg7[%c0_220, %c0_221, %c0_222], %383 {strides = array<i32>} : memref<2x8x64xf32, #tpu.memory_space<vmem>>, vector<2x8x64xf32>,
    return
  }
}

</mosaic_0001>

<bundles_post_ra>
// kernel: tpu_custom_call.1
= control target key start
LH: loop header
LB: loop body
LE: loop exit
PB: predicated region body
PF: predicated region fallthrough
CT: control target
= control target key end

     0   :  { %12 = vsyncpa [#allocation6], 0  ;;  %s8658_s0 = inlined_call_operand.vmem [shape: s32[2,8], index: 0, kind: input, shape index: {}]   ;;  %s8659_s1 = inlined_call_operand.vmem [shape: s32[2,8], index: 1, kind: input, shape index: {}]   ;;  %s8660_s2 = inlined_call_operand.vmem [shape: f32[64,1,32], index: 2, kind: input, shape index: {}]   ;;  %s8661_s3 = inlined_call_operand.vmem [shape: f32[8,32,32], index: 3, kind: input, shape index: {}]   ;;  %s8662_s4 = inlined_call_operand.vmem [shape: f32[3,32,128], index: 4, kind: input, shape index: {}]   ;;  %s8663_s5 = inlined_call_operand.vmem [shape: f32[2,128,32], index: 5, kind: input, shape index: {}]   ;;  %s8664_s6 = inlined_call_operand.hbm [shape: f32[40,128], index: 6, kind: input, shape index: {}]   ;;  %s8665_s7 = inlined_call_operand.hbm [shape: f32[2,8,64], index: 7, kind: output, shape index: {}]  }
   0x1   :  { %13 = vsyncpa [#allocation4], 0 }
   0x2   :  { %14 = vsyncpa [#allocation5], 0  ;;  %s21_s26 = sshll.u32 %s8658_s0, 4  ;;  %s22_s26 = int_to_ptr.vmem [resolvable:$true] %s21_s26 }
   0x3   :  { %s7384_s27 = scalar_lea.vmem %s22_s26, 32  ;;  %p7389_p1 = scmp.lt.s32.totalorder %s22_s26, %s22_s26 }
   0x4   :  { %p7385_p0 = scmp.ne.s32.totalorder %s22_s26, %s7384_s27  ;;  %p7390_p2 = scmp.lt.s32.totalorder %s7384_s27, %s7384_s27 }
   0x6   :  { %p7391_p3 = por %p7390_p2, %p7389_p1 }
   0x8   :  { %p7392_p4 = pnand %p7391_p3, %p7385_p0 }
   0xa   :  { %7395 = shalt.err (!%p7392_p4)
}
   0xb   :  { %s7442_s28 = smov [#allocation3]   ;;  %s7443_s29 = smov [#allocation7]  }
   0xc   :  { %24 = dma.vmem_to_smem %s22_s26, 32, %s7442_s28, [#allocation6]  }
   0xd   :  { %s40_s30 = sshll.u32 %s7443_s29, 4  ;;  %s41_s30 = int_to_ptr.vmem [resolvable:$true] %s40_s30 }
   0xe   :  { %s7404_s8 = scalar_lea.vmem %s41_s30, 640  ;;  %p7409_p6 = scmp.lt.s32.totalorder %s41_s30, %s41_s30 }
   0xf   :  { %p7405_p5 = scmp.ne.s32.totalorder %s41_s30, %s7404_s8  ;;  %p7410_p7 = scmp.lt.s32.totalorder %s7404_s8, %s7404_s8 }
  0x11   :  { %p7411_p8 = por %p7410_p7, %p7409_p6 }
  0x13   :  { %p7412_p9 = pnand %p7411_p8, %p7405_p5 }
  0x15   :  { %7415 = shalt.err (!%p7412_p9)
}
  0x16   :  { %s7444_s0 = smov 128   ;;  %s7445_s9 = smov 8  }
  0x17   :  { %46 = dma.hbm_to_vmem [thread:$0]  %s8664_s6, 640, %s41_s30, [#allocation4], %s7444_s0, %s7444_s0, %s7445_s9  }
  0x18   :  { %7436 = dma.done.wait [#allocation6], 32  }
  0x19   :  { %7437 = vsyncadd [#allocation6], 4294967264 }
  0x1a   :  { %7438 = dma.done.wait [#allocation4], 640  }
  0x1b   :  { %7439 = vsyncadd [#allocation4], 4294966656 }
  0x1c   :  { %53 = sfence }
  0x1d   :  { %s54_s12 = sld [smem:[#allocation3]]  ;;  %vm57_vm0 = vcmask 253952   ;;  %v121_v13 = vld [vmem:[#allocation7 + $0x18] sm:$0xff]  ;;  %vm177_vm1 = vcmask 261120   ;;  %v122_v22 = vld [vmem:[#allocation7 + $0x20] sm:$0xff]  ;;  %v224_v28 = vld [vmem:[%s8661_s3 + $0x18] sm:$0xff] }
  0x1e   :  { %s6567_s13 = sld [smem:[#allocation3 + $0x1]]  ;;  %v6597_v29 = vld [vmem:[%s8661_s3 + $0x58] sm:$0xff]  ;;  %v223_v30 = vld [vmem:[%s8661_s3 + $0x10] sm:$0xff]  ;;  %6925 = vmatprep.subr.mxu1 %v224_v28  ;;  %v222_v32 = vld [vmem:[%s8661_s3 + $0x8] sm:$0xff]  ;;  %vm7450_vm2 = vmmov 0   ;;  %vm1357_vm3 = vcmask 64512  }
  0x1f   :  { %s6568_s14 = sld [smem:[#allocation3 + $0x2]]  ;;  %6947 = vmatprep.subr.mxu0 %v6597_v29  ;;  %v6596_v31 = vld [vmem:[%s8661_s3 + $0x50] sm:$0xff]  ;;  %6926 = vmatpush3.msra.mxu1 %v224_v28  ;;  %v6595_v33 = vld [vmem:[%s8661_s3 + $0x48] sm:$0xff]  ;;  %v221_v34 = vld [vmem:[%s8661_s3] sm:$0xff]  ;;  %vm2936_vm5 = vcmask 130048   ;;  %vm2939_vm6 = vcmask 195584  }
  0x20   :  { %s6569_s15 = sld [smem:[#allocation3 + $0x3]]  ;;  %6948 = vmatpush3.msra.mxu0 %v6597_v29  ;;  %6927 = vmatprep.subr.mxu1 %v223_v30  ;;  %v6594_v35 = vld [vmem:[%s8661_s3 + $0x40] sm:$0xff]  ;;  %v6590_v36 = vld [vmem:[%s8661_s3 + $0x38] sm:$0xff]  ;;  %v6582_v53 = vld [vmem:[#allocation7] ss:$0 sm:$0xff]  ;;  %vm6530_vm7 = vcmask 523264  }
  0x21   :  { %s6570_s16 = sld [smem:[#allocation3 + $0x4]]  ;;  %6949 = vmatprep.subr.mxu0 %v6596_v31  ;;  %6928 = vmatpush3.msra.mxu1 %v223_v30  ;;  %v6583_v55 = vld [vmem:[#allocation7 + $0x1] ss:$0 sm:$0xff] }
  0x22   :  { %s6571_s17 = sld [smem:[#allocation3 + $0x5]]  ;;  %6950 = vmatpush3.msra.mxu0 %v6596_v31  ;;  %6929 = vmatprep.subr.mxu1 %v222_v32  ;;  %v6589_v63 = vld [vmem:[%s8661_s3 + $0x30] sm:$0xff] }
  0x23   :  { %s55_s20 = scalar_lea.vmem %s8660_s2, %s54_s12  ;;  %s6572_s21 = sld [smem:[#allocation3 + $0x6]]  ;;  %6930 = vmatpush3.msra.mxu1 %v222_v32  ;;  %6951 = vmatprep.subr.mxu0 %v6595_v33 }
  0x24   :  { %v56_v0 = vld [vmem:[%s55_s20] sm:$0x1]  ;;  %s60_s23 = scalar_lea.vmem %s8660_s2, %s6567_s13  ;;  %s6573_s24 = sld [smem:[#allocation3 + $0x7]]  ;;  %6931 = vmatprep.subr.mxu1 %v221_v34  ;;  %6952 = vmatpush3.msra.mxu0 %v6595_v33 }
  0x25   :  { %58 = vst.msk [vmem:[#allocation2] sm:$0x1] %vm57_vm0, %v56_v0  ;;  %v61_v1 = vld [vmem:[%s60_s23] sm:$0x1]  ;;  %s64_s27 = scalar_lea.vmem %s8660_s2, %s6568_s14  ;;  %s6574_s28 = sld [smem:[#allocation3 + $0x80]]  ;;  %6932 = vmatpush3.msra.mxu1 %v221_v34  ;;  %6953 = vmatprep.subr.mxu0 %v6594_v35  ;;  %v6588_v0 = vld [vmem:[%s8661_s3 + $0x28] sm:$0xff] }
  0x26   :  { %62 = vst.msk [vmem:[#allocation2 + $0x1] sm:$0x1] %vm57_vm0, %v61_v1  ;;  %v65_v2 = vld [vmem:[%s64_s27] sm:$0x1]  ;;  %s68_s8 = scalar_lea.vmem %s8660_s2, %s6569_s15  ;;  %s6575_s10 = sld [smem:[#allocation3 + $0x81]]  ;;  %6936 = vmatprep.subr.mxu1 %v6590_v36  ;;  %6954 = vmatpush3.msra.mxu0 %v6594_v35 }
  0x27   :  { %66 = vst.msk [vmem:[#allocation2 + $0x2] sm:$0x1] %vm57_vm0, %v65_v2  ;;  %v69_v3 = vld [vmem:[%s68_s8] sm:$0x1]  ;;  %s72_s13 = scalar_lea.vmem %s8660_s2, %s6570_s16  ;;  %s6576_s18 = sld [smem:[#allocation3 + $0x82]] }
  0x28   :  { %70 = vst.msk [vmem:[#allocation2 + $0x3] sm:$0x1] %vm57_vm0, %v69_v3  ;;  %v73_v4 = vld [vmem:[%s72_s13] sm:$0x1]  ;;  %s76_s20 = scalar_lea.vmem %s8660_s2, %s6571_s17  ;;  %s6577_s22 = sld [smem:[#allocation3 + $0x83]] }
  0x29   :  { %74 = vst.msk [vmem:[#allocation2 + $0x4] sm:$0x1] %vm57_vm0, %v73_v4  ;;  %v77_v5 = vld [vmem:[%s76_s20] sm:$0x1]  ;;  %s80_s23 = scalar_lea.vmem %s8660_s2, %s6572_s21  ;;  %s6578_s25 = sld [smem:[#allocation3 + $0x84]] }
  0x2a   :  { %78 = vst.msk [vmem:[#allocation2 + $0x5] sm:$0x1] %vm57_vm0, %v77_v5  ;;  %v81_v6 = vld [vmem:[%s80_s23] sm:$0x1]  ;;  %s84_s27 = scalar_lea.vmem %s8660_s2, %s6573_s24  ;;  %s6579_s29 = sld [smem:[#allocation3 + $0x85]] }
  0x2b   :  { %82 = vst.msk [vmem:[#allocation2 + $0x6] sm:$0x1] %vm57_vm0, %v81_v6  ;;  %v85_v7 = vld [vmem:[%s84_s27] sm:$0x1]  ;;  %s88_s8 = scalar_lea.vmem %s8660_s2, %s6574_s28  ;;  %s6580_s11 = sld [smem:[#allocation3 + $0x86]] }
  0x2c   :  { %86 = vst.msk [vmem:[#allocation2 + $0x7] sm:$0x1] %vm57_vm0, %v85_v7  ;;  %v89_v8 = vld [vmem:[%s88_s8] sm:$0x1]  ;;  %s92_s13 = scalar_lea.vmem %s8660_s2, %s6575_s10  ;;  %s6581_s14 = sld [smem:[#allocation3 + $0x87]] }
  0x2d   :  { %90 = vst.msk [vmem:[#allocation2 + $0x8] sm:$0x1] %vm57_vm0, %v89_v8  ;;  %v93_v9 = vld [vmem:[%s92_s13] sm:$0x1]  ;;  %s96_s20 = scalar_lea.vmem %s8660_s2, %s6576_s18  ;;  %v7629_v2 = vld [vmem:[#allocation7 + $0x4] ss:$0 sm:$0xff] }
  0x2e   :  { %94 = vst.msk [vmem:[#allocation2 + $0x9] sm:$0x1] %vm57_vm0, %v93_v9  ;;  %v97_v10 = vld [vmem:[%s96_s20] sm:$0x1]  ;;  %s100_s6 = scalar_lea.vmem %s8660_s2, %s6577_s22  ;;  %v6584_v6 = vld [vmem:[#allocation7 + $0x2] ss:$0 sm:$0xff] }
  0x2f   :  { %98 = vst.msk [vmem:[#allocation2 + $0xa] sm:$0x1] %vm57_vm0, %v97_v10  ;;  %v101_v11 = vld [vmem:[%s100_s6] sm:$0x1]  ;;  %s104_s16 = scalar_lea.vmem %s8660_s2, %s6578_s25  ;;  %v6591_v10 = vld [vmem:[#allocation7 + $0x3] ss:$0 sm:$0xff] }
  0x30   :  { %102 = vst.msk [vmem:[#allocation2 + $0xb] sm:$0x1] %vm57_vm0, %v101_v11  ;;  %v105_v12 = vld [vmem:[%s104_s16] sm:$0x1]  ;;  %s108_s18 = scalar_lea.vmem %s8660_s2, %s6579_s29  ;;  %s7447_s29 = smov 112  }
  0x31   :  { %106 = vst.msk [vmem:[#allocation2 + $0xc] sm:$0x1] %vm57_vm0, %v105_v12  ;;  %v109_v14 = vld [vmem:[%s108_s18] sm:$0x1]  ;;  %s112_s30 = scalar_lea.vmem %s8660_s2, %s6580_s11  ;;  %s7448_s11 = smov 104  }
  0x32   :  { %110 = vst.msk [vmem:[#allocation2 + $0xd] sm:$0x1] %vm57_vm0, %v109_v14  ;;  %v113_v15 = vld [vmem:[%s112_s30] sm:$0x1]  ;;  %s116_s21 = scalar_lea.vmem %s8660_s2, %s6581_s14  ;;  %s7446_s2 = smov 120  }
  0x33   :  { %v119_v16 = vld [vmem:[#allocation2] sm:$0xff]  ;;  %114 = vst.msk [vmem:[#allocation2 + $0xe] sm:$0x1] %vm57_vm0, %v113_v15  ;;  %v7449_v15 = vmov 0.0   ;;  %s7456_s14 = smov 24  }
  0x34   :  { %v117_v17 = vld [vmem:[%s116_s21] sm:$0x1]  ;;  %v7570_v18 = vadd.f32 %v121_v13, %v119_v16  ;;  %6978 = vmatprep.subr.mxu0 %v7449_v15  ;;  %v127_v16 = vlaneseq }
  0x35   :  { %118 = vst.msk [vmem:[#allocation2 + $0xf] sm:$0x1] %vm57_vm0, %v117_v17  ;;  %v6587_v1 = vld [vmem:[%s8661_s3 + $0x20] sm:$0xff]  ;;  %v7451_v17 = vmov 1983009808  }
  0x36   :  { %v178_v19 = vsel %vm177_vm1, %v7570_v18, 0.0  ;;  %v187_v20 = vmul.f32 %v7570_v18, %v7570_v18 }
  0x37   :  { %179 = vadd.xlane.f32.xlu0 %v178_v19  ;;  %v504_v19 = vunpack.c.l.s4 %v7451_v17 }
  0x38   :  { %v189_v21 = vsel %vm177_vm1, %v187_v20, 0.0 }
  0x39   :  { %190 = vadd.xlane.f32.xlu1 %v189_v21  ;;  %v7452_v21 = vmov 1934713408  }
  0x3c   :  { %v120_v23 = vld [vmem:[#allocation2 + $0x8] sm:$0xff] }
  0x3d   :  { %v7578_v24 = vadd.f32 %v122_v22, %v120_v23  ;;  %v536_v22 = vunpack.c.l.s4 %v7452_v21  ;;  %v7668_v23 = vshrl.u32 %v127_v16, 7 }
  0x3f   :  { %v181_v25 = vsel %vm177_vm1, %v7578_v24, 0.0  ;;  %v188_v26 = vmul.f32 %v7578_v24, %v7578_v24  ;;  %v537_v28 = vunpack.c.0.s8 %v536_v22 }
  0x40   :  { %182 = vadd.xlane.f32.xlu0 %v181_v25  ;;  %v505_v25 = vunpack.c.0.s8 %v504_v19 }
  0x41   :  { %v192_v27 = vsel %vm177_vm1, %v188_v26, 0.0 }
  0x42   :  { %193 = vadd.xlane.f32.xlu1 %v192_v27  ;;  %v7671_v29 = vsub.s32 %v505_v25, %v7668_v23 }
  0xc0   :  { %v180_v37 = vpop.xlane.xlu0 %179 }
  0xc1   :  { %v185_v38 = vmul.f32 0.03125, %v180_v37 }
  0xc2   :  { %v191_v39 = vpop.xlane.xlu1 %190 }
  0xc3   :  { %v197_v40 = vmul.f32 %v185_v38, %v185_v38  ;;  %v195_v41 = vmul.f32 0.03125, %v191_v39  ;;  %v201_v51 = vsub.f32 %v7570_v18, %v185_v38 }
  0xc5   :  { %v199_v42 = vsub.f32 %v195_v41, %v197_v40 }
  0xc7   :  { %v203_v43 = vadd.f32 1e-05, %v199_v42 }
  0xc9   :  { %v183_v44 = vpop.xlane.xlu0 %182  ;;  %7292 = vrsqrt.f32 %v203_v43 }
  0xca   :  { %v186_v45 = vmul.f32 0.03125, %v183_v44 }
  0xcb   :  { %v194_v46 = vpop.xlane.xlu1 %193 }
  0xcc   :  { %v198_v47 = vmul.f32 %v186_v45, %v186_v45  ;;  %v196_v48 = vmul.f32 0.03125, %v194_v46  ;;  %v202_v58 = vsub.f32 %v7578_v24, %v186_v45 }
  0xce   :  { %v200_v49 = vsub.f32 %v196_v48, %v198_v47 }
  0xd0   :  { %v204_v50 = vadd.f32 1e-05, %v200_v49 }
  0xd2   :  { %7294 = vrsqrt.f32 %v204_v50 }
  0xd6   :  { %v7293_v52 = vpop.eup %7292 }
  0xd7   :  { %v207_v54 = vmul.f32 %v7293_v52, %v201_v51 }
  0xd9   :  { %v213_v56 = vmul.f32 %v6582_v53, %v207_v54 }
  0xdb   :  { %v219_v57 = vadd.f32 %v6583_v55, %v213_v56 }
  0xdd   :  { %6933 = vmatprep.mubr.msk.f32.mxu1 %vm177_vm1, %v219_v57  ;;  %6955 = vmatprep.mubr.msk.f32.mxu0 %vm177_vm1, %v219_v57 }
  0xdf   :  { %v7295_v59 = vpop.eup %7294 }
  0xe0   :  { %v208_v60 = vmul.f32 %v7295_v59, %v202_v58 }
  0xe2   :  { %v214_v61 = vmul.f32 %v6582_v53, %v208_v60 }
  0xe4   :  { %v220_v62 = vadd.f32 %v6583_v55, %v214_v61 }
  0xe6   :  { %6934 = vmatmul.mubr.msk.f32.vlgmr.msra.gmra.mxu1 %vm177_vm1, %v220_v62  ;;  %6956 = vmatmul.mubr.msk.f32.vlgmr.msra.gmra.mxu0 %vm177_vm1, %v220_v62 }
  0xe7   :  { %6937 = vmatpush3.msra.mxu1 %v6590_v36  ;;  %6944 = vmatprep.mubr.msk.f32.mxu1 %vm177_vm1, %v219_v57  ;;  %v7674_v36 = vsub.s32 %v537_v28, %v7668_v23 }
  0xe8   :  { %6938 = vmatprep.subr.mxu1 %v6589_v63  ;;  %6980 = vmatprep.mubr.msk.f32.mxu0 %vm7450_vm2, %v7449_v15 }
  0xe9   :  { %6939 = vmatpush3.msra.mxu1 %v6589_v63 }
  0xea   :  { %6940 = vmatprep.subr.mxu1 %v6588_v0 }
  0xeb   :  { %6941 = vmatpush3.msra.mxu1 %v6588_v0 }
  0xec   :  { %6942 = vmatprep.subr.mxu1 %v6587_v1 }
  0xed   :  { %6943 = vmatpush3.msra.mxu1 %v6587_v1 }
  0xee   :  { %6945 = vmatmul.mubr.msk.f32.vlgmr.msra.gmra.mxu1 %vm177_vm1, %v220_v62  ;;  %6958 = vmatprep.subr.mxu1 %v7449_v15 }
  0xef   :  { %6960 = vmatprep.mubr.msk.f32.mxu1 %vm7450_vm2, %v7449_v15 }
 0x1a6   :  { %v6935_v3 = vpop.f32.mrf.mxu1  ;;  %v6957_v4 = vpop.f32.mrf.mxu0 }
 0x1a7   :  { %v7632_v5 = vadd.f32 %v6957_v4, %v7629_v2  ;;  %v7653_v14 = vadd.f32 %v6935_v3, %v6584_v6 }
 0x1a8   :  { %v302_v7 = vpop.f32.mrf.mxu1 }
 0x1a9   :  { %v7634_v8 = vadd.f32 %v6584_v6, %v302_v7 }
 0x1ab   :  { %483 = vrot.lane.b32.xlu1 %v7634_v8, %s7446_s2 }
 0x1ae   :  { %v6946_v9 = vpop.f32.mrf.mxu1 }
 0x1af   :  { %v7643_v13 = vadd.f32 %v6946_v9, %v6591_v10 }
 0x1b0   :  { %v387_v11 = vpop.f32.mrf.mxu1 }
 0x1b1   :  { %v388_v12 = vadd.f32 %v6591_v10, %v387_v11 }
 0x1b3   :  { %775 = vrot.lane.b32.xlu0 %v388_v12, %s7446_s2  ;;  %781 = vrot.lane.b32.xlu1 %v388_v12, %s7447_s29 }
 0x1b7   :  { %489 = vrot.lane.b32.xlu0 %v7634_v8, %s7447_s29  ;;  %787 = vrot.lane.b32.xlu1 %v388_v12, %s7448_s11 }
 0x1bb   :  { %777 = vrot.lane.b32.xlu0 %v7643_v13, %s7446_s2  ;;  %495 = vrot.lane.b32.xlu1 %v7634_v8, %s7448_s11 }
 0x1bf   :  { %789 = vrot.lane.b32.xlu0 %v7643_v13, %s7448_s11  ;;  %783 = vrot.lane.b32.xlu1 %v7643_v13, %s7447_s29 }
 0x1c3   :  { %491 = vrot.lane.b32.xlu0 %v7653_v14, %s7447_s29  ;;  %485 = vrot.lane.b32.xlu1 %v7653_v14, %s7446_s2 }
 0x1c7   :  { %497 = vrot.lane.b32.xlu1 %v7653_v14, %s7448_s11 }
 0x21d   :  { %v484_v20 = vpop.permute.xlu1 %483 }
 0x225   :  { %v776_v26 = vpop.permute.xlu0 %775  ;;  %v782_v27 = vpop.permute.xlu1 %781 }
 0x226   :  { %v793_v30 = vcombine.low %v388_v12, %v782_v27  ;;  %v794_v31 = vcombine.high %v388_v12, %v782_v27 }
 0x228   :  { %v801_v37 = vrot.slane %v793_v30, %v7671_v29  ;;  %v808_v38 = vrot.slane %v794_v31, %v7671_v29 }
 0x229   :  { %v490_v32 = vpop.permute.xlu0 %489  ;;  %v788_v33 = vpop.permute.xlu1 %787 }
 0x22a   :  { %v809_v34 = vcombine.low %v776_v26, %v788_v33  ;;  %v810_v35 = vcombine.high %v776_v26, %v788_v33  ;;  %v501_v41 = vcombine.low %v7634_v8, %v490_v32  ;;  %v502_v42 = vcombine.high %v7634_v8, %v490_v32 }
 0x22c   :  { %v817_v39 = vrot.slane %v809_v34, %v7671_v29  ;;  %v824_v40 = vrot.slane %v810_v35, %v7671_v29  ;;  %v509_v55 = vrot.slane %v501_v41, %v7671_v29  ;;  %v516_v56 = vrot.slane %v502_v42, %v7671_v29 }
 0x22d   :  { %v496_v43 = vpop.permute.xlu1 %495  ;;  %v778_v48 = vpop.permute.xlu0 %777 }
 0x22e   :  { %v825_v44 = vcombine.low %v801_v37, %v817_v39  ;;  %v826_v45 = vcombine.high %v801_v37, %v817_v39  ;;  %v841_v46 = vcombine.low %v808_v38, %v824_v40  ;;  %v842_v47 = vcombine.high %v808_v38, %v824_v40 }
 0x22f   :  { %v517_v49 = vcombine.low %v484_v20, %v496_v43  ;;  %v518_v50 = vcombine.high %v484_v20, %v496_v43 }
 0x230   :  { %v833_v51 = vrot.slane %v825_v44, %v7674_v36  ;;  %v840_v52 = vrot.slane %v826_v45, %v7674_v36  ;;  %v849_v53 = vrot.slane %v841_v46, %v7674_v36  ;;  %v856_v54 = vrot.slane %v842_v47, %v7674_v36 }
 0x231   :  { %v525_v57 = vrot.slane %v517_v49, %v7671_v29  ;;  %v532_v58 = vrot.slane %v518_v50, %v7671_v29  ;;  %v784_v59 = vpop.permute.xlu1 %783  ;;  %v790_v6 = vpop.permute.xlu0 %789 }
 0x232   :  { %v929_v60 = vcombine.low %v833_v51, %v840_v52  ;;  %v6605_v61 = vcombine.high %v833_v51, %v840_v52  ;;  %v945_v62 = vcombine.low %v849_v53, %v856_v54  ;;  %v6606_v63 = vcombine.high %v849_v53, %v856_v54 }
 0x233   :  { %v533_v0 = vcombine.low %v509_v55, %v525_v57  ;;  %v534_v1 = vcombine.high %v509_v55, %v525_v57  ;;  %v549_v3 = vcombine.low %v516_v56, %v532_v58  ;;  %v550_v4 = vcombine.high %v516_v56, %v532_v58 }
 0x234   :  { %v7695_v12 = vrot.slane %v929_v60, %v7671_v29  ;;  %v7698_v17 = vrot.slane %v6605_v61, %v7671_v29  ;;  %v7701_v19 = vrot.slane %v945_v62, %v7671_v29  ;;  %v7704_v20 = vrot.slane %v6606_v63, %v7671_v29 }
 0x235   :  { %v541_v7 = vrot.slane %v533_v0, %v7674_v36  ;;  %v548_v8 = vrot.slane %v534_v1, %v7674_v36  ;;  %v557_v9 = vrot.slane %v549_v3, %v7674_v36  ;;  %v564_v10 = vrot.slane %v550_v4, %v7674_v36  ;;  %v486_v11 = vpop.permute.xlu1 %485  ;;  %v492_v40 = vpop.permute.xlu0 %491 }
 0x236   :  { %v877_v27 = vcombine.low %v778_v48, %v790_v6  ;;  %v878_v28 = vcombine.high %v778_v48, %v790_v6  ;;  %v861_v30 = vcombine.low %v7643_v13, %v784_v59  ;;  %v862_v31 = vcombine.high %v7643_v13, %v784_v59 }
 0x237   :  { %v637_v21 = vcombine.low %v541_v7, %v548_v8  ;;  %v6601_v22 = vcombine.high %v541_v7, %v548_v8  ;;  %v653_v25 = vcombine.low %v557_v9, %v564_v10  ;;  %v6602_v26 = vcombine.high %v557_v9, %v564_v10 }
 0x238   :  { %v885_v37 = vrot.slane %v877_v27, %v7671_v29  ;;  %v892_v38 = vrot.slane %v878_v28, %v7671_v29  ;;  %v869_v39 = vrot.slane %v861_v30, %v7671_v29  ;;  %v876_v13 = vrot.slane %v862_v31, %v7671_v29 }
 0x239   :  { %v7709_v32 = vrot.slane %v637_v21, %v7671_v29  ;;  %v7712_v33 = vrot.slane %v6601_v22, %v7671_v29  ;;  %v7715_v34 = vrot.slane %v653_v25, %v7671_v29  ;;  %v7718_v35 = vrot.slane %v6602_v26, %v7671_v29  ;;  %v498_v41 = vpop.permute.xlu1 %497 }
 0x23a   :  { %v961_v42 = vcombine.low %v7695_v12, %v7698_v17  ;;  %v977_v43 = vcombine.low %v7701_v19, %v7704_v20  ;;  %v893_v46 = vcombine.low %v869_v39, %v885_v37  ;;  %v894_v47 = vcombine.high %v869_v39, %v885_v37 }
 0x23b   :  { %v669_v44 = vcombine.low %v7709_v32, %v7712_v33  ;;  %v685_v45 = vcombine.low %v7715_v34, %v7718_v35  ;;  %v909_v48 = vcombine.low %v876_v13, %v892_v38  ;;  %v910_v49 = vcombine.high %v876_v13, %v892_v38 }
 0x23c   :  { %v569_v50 = vcombine.low %v7653_v14, %v492_v40  ;;  %v570_v51 = vcombine.high %v7653_v14, %v492_v40  ;;  %v585_v52 = vcombine.low %v486_v11, %v498_v41  ;;  %v586_v53 = vcombine.high %v486_v11, %v498_v41 }
 0x23d   :  { %v901_v54 = vrot.slane %v893_v46, %v7674_v36  ;;  %v908_v55 = vrot.slane %v894_v47, %v7674_v36  ;;  %v917_v56 = vrot.slane %v909_v48, %v7674_v36  ;;  %v924_v57 = vrot.slane %v910_v49, %v7674_v36 }
 0x23e   :  { %v577_v58 = vrot.slane %v569_v50, %v7671_v29  ;;  %v584_v59 = vrot.slane %v570_v51, %v7671_v29  ;;  %v593_v60 = vrot.slane %v585_v52, %v7671_v29  ;;  %v600_v61 = vrot.slane %v586_v53, %v7671_v29 }
 0x23f   :  { %v997_v62 = vcombine.low %v901_v54, %v908_v55  ;;  %v6607_v14 = vcombine.high %v901_v54, %v908_v55  ;;  %v1013_v63 = vcombine.low %v917_v56, %v924_v57  ;;  %v6608_v0 = vcombine.high %v917_v56, %v924_v57 }
 0x240   :  { %v601_v1 = vcombine.low %v577_v58, %v593_v60  ;;  %v602_v3 = vcombine.high %v577_v58, %v593_v60  ;;  %v617_v4 = vcombine.low %v584_v59, %v600_v61  ;;  %v618_v6 = vcombine.high %v584_v59, %v600_v61 }
 0x241   :  { %v1004_v7 = vrot.slane %v997_v62, %v7671_v29  ;;  %v1012_v8 = vrot.slane %v6607_v14, %v7671_v29  ;;  %v1020_v9 = vrot.slane %v1013_v63, %v7671_v29  ;;  %v1028_v10 = vrot.slane %v6608_v0, %v7671_v29 }
 0x242   :  { %v609_v11 = vrot.slane %v601_v1, %v7674_v36  ;;  %v616_v21 = vrot.slane %v602_v3, %v7674_v36  ;;  %v625_v22 = vrot.slane %v617_v4, %v7674_v36  ;;  %v632_v25 = vrot.slane %v618_v6, %v7674_v36 }
 0x243   :  { %v1029_v26 = vcombine.low %v1004_v7, %v1012_v8  ;;  %v1045_v27 = vcombine.low %v1020_v9, %v1028_v10  ;;  %v969_v38 = vrot.slane %v961_v42, %v7674_v36  ;;  %v985_v39 = vrot.slane %v977_v43, %v7674_v36 }
 0x244   :  { %v705_v28 = vcombine.low %v609_v11, %v616_v21  ;;  %v6603_v30 = vcombine.high %v609_v11, %v616_v21  ;;  %v721_v31 = vcombine.low %v625_v22, %v632_v25  ;;  %v6604_v37 = vcombine.high %v625_v22, %v632_v25  ;;  %v125_v25 = vld [vmem:[%s8659_s1] sm:$0x3]  ;;  %s7455_s1 = smov 16  }
 0x245   :  { %v677_v13 = vrot.slane %v669_v44, %v7674_v36  ;;  %v693_v40 = vrot.slane %v685_v45, %v7674_v36  ;;  %v962_v49 = vcombine.high %v7695_v12, %v7698_v17  ;;  %v978_v42 = vcombine.high %v7701_v19, %v7704_v20 }
 0x246   :  { %v712_v41 = vrot.slane %v705_v28, %v7671_v29  ;;  %v720_v46 = vrot.slane %v6603_v30, %v7671_v29  ;;  %v728_v47 = vrot.slane %v721_v31, %v7671_v29  ;;  %v736_v48 = vrot.slane %v6604_v37, %v7671_v29 }
 0x247   :  { %v993_v50 = vcombine.low %v969_v38, %v985_v39  ;;  %v701_v44 = vcombine.low %v677_v13, %v693_v40  ;;  %v1030_v52 = vcombine.high %v1004_v7, %v1012_v8  ;;  %v1046_v45 = vcombine.high %v1020_v9, %v1028_v10 }
 0x248   :  { %v737_v43 = vcombine.low %v712_v41, %v720_v46  ;;  %v753_v51 = vcombine.low %v728_v47, %v736_v48  ;;  %v1037_v53 = vrot.slane %v1029_v26, %v7674_v36  ;;  %v1053_v54 = vrot.slane %v1045_v27, %v7674_v36 }
 0x249   :  { %6959 = vmatpush3.xpose.msk.msra.mxu1 %vm1357_vm3, %v993_v50  ;;  %v670_v55 = vcombine.high %v7709_v32, %v7712_v33  ;;  %v686_v12 = vcombine.high %v7715_v34, %v7718_v35  ;;  %v994_v20 = vcombine.high %v969_v38, %v985_v39  ;;  %v976_v56 = vrot.slane %v962_v49, %v7674_v36 }
 0x24a   :  { %6963 = vmatprep.subr.mxu1 %v7449_v15  ;;  %v745_v17 = vrot.slane %v737_v43, %v7674_v36  ;;  %v761_v19 = vrot.slane %v753_v51, %v7674_v36  ;;  %v992_v57 = vrot.slane %v978_v42, %v7674_v36  ;;  %v1061_v58 = vcombine.low %v1037_v53, %v1053_v54 }
 0x24b   :  { %v738_v59 = vcombine.high %v712_v41, %v720_v46  ;;  %v754_v60 = vcombine.high %v728_v47, %v736_v48  ;;  %v702_v32 = vcombine.high %v677_v13, %v693_v40  ;;  %v1044_v33 = vrot.slane %v1030_v52, %v7674_v36 }
 0x24c   :  { %6961 = vmatmul.mubr.msk.f32.vlgmr.msra.gmra.mxu1 %vm1357_vm3, %v701_v44  ;;  %v1060_v34 = vrot.slane %v1046_v45, %v7674_v36  ;;  %6979 = vmatpush3.xpose.msk.msra.mxu0 %vm1357_vm3, %v1061_v58  ;;  %v684_v35 = vrot.slane %v670_v55, %v7674_v36  ;;  %v700_v61 = vrot.slane %v686_v12, %v7674_v36  ;;  %v7453_v21 = vmov 1966171168  }
 0x24d   :  { %6964 = vmatpush3.xpose.msk.msra.mxu1 %vm1357_vm3, %v994_v20  ;;  %6965 = vmatprep.mubr.msk.f32.mxu1 %vm7450_vm2, %v7449_v15  ;;  %v769_v62 = vcombine.low %v745_v17, %v761_v19  ;;  %v995_v14 = vcombine.low %v976_v56, %v992_v57  ;;  %v752_v63 = vrot.slane %v738_v59, %v7674_v36  ;;  %v136_v22 = vunpack.c.l.s4 %v7453_v21 }
 0x24e   :  { %6968 = vmatprep.subr.mxu1 %v7449_v15  ;;  %6988 = vmatprep.subr.mxu0 %v7449_v15  ;;  %v768_v0 = vrot.slane %v754_v60, %v7674_v36  ;;  %v1063_v1 = vcombine.low %v1044_v33, %v1060_v34  ;;  %v703_v3 = vcombine.low %v684_v35, %v700_v61  ;;  %v126_v26 = vcvt.s32.f32 %v125_v25 }
 0x24f   :  { %6981 = vmatmul.mubr.msk.f32.vlgmr.msra.gmra.mxu0 %vm1357_vm3, %v769_v62  ;;  %v996_v4 = vcombine.high %v976_v56, %v992_v57  ;;  %v704_v7 = vcombine.high %v684_v35, %v700_v61  ;;  %v1062_v8 = vcombine.high %v1037_v53, %v1053_v54  ;;  %v770_v9 = vcombine.high %v745_v17, %v761_v19 }
 0x250   :  { %6966 = vmatmul.mubr.msk.f32.vlgmr.msra.gmra.mxu1 %vm1357_vm3, %v702_v32  ;;  %6989 = vmatpush3.xpose.msk.msra.mxu0 %vm1357_vm3, %v1063_v1  ;;  %v771_v6 = vcombine.low %v752_v63, %v768_v0  ;;  %v1064_v10 = vcombine.high %v1044_v33, %v1060_v34  ;;  %v772_v11 = vcombine.high %v752_v63, %v768_v0  ;;  %v137_v27 = vunpack.c.0.s8 %v136_v22 }
 0x251   :  { %6969 = vmatpush3.xpose.msk.msra.mxu1 %vm1357_vm3, %v995_v14  ;;  %6970 = vmatprep.mubr.msk.f32.mxu1 %vm7450_vm2, %v7449_v15  ;;  %v133_v28 = vsub.f32 1.0, %v126_v26  ;;  %v130_v38 = vand.u32 127, %v127_v16  ;;  %v165_v13 = vsub.s32 0, %v7668_v23  ;;  %v7454_v41 = vmov -1e+09   ;;  %v472_v16 = vpop.f32.mrf.mxu0 }
 0x252   :  { %6973 = vmatprep.subr.mxu1 %v7449_v15  ;;  %6990 = vmatprep.mubr.msk.f32.mxu0 %vm7450_vm2, %v7449_v15  ;;  %v140_v30 = vsub.s32 %v137_v27, %v7668_v23 }
 0x253   :  { %6998 = vmatprep.subr.mxu0 %v7449_v15  ;;  %6991 = vmatmul.mubr.msk.f32.vlgmr.msra.gmra.mxu0 %vm1357_vm3, %v771_v6  ;;  %vm131_vm4 = vcmp.ge.s32.totalorder %v7668_v23, %v130_v38 }
 0x254   :  { %6971 = vmatmul.mubr.msk.f32.vlgmr.msra.gmra.mxu1 %vm1357_vm3, %v703_v3  ;;  %7000 = vmatprep.mubr.msk.f32.mxu0 %vm7450_vm2, %v7449_v15  ;;  %v141_v31 = vrot.slane %v133_v28, %v140_v30  ;;  %v132_v46 = vsel %vm131_vm4, 0.0, %v7454_v41  ;;  %v7841_v3 = vadd.f32 %v7629_v2, %v472_v16 }
 0x255   :  { %6974 = vmatpush3.xpose.msk.msra.mxu1 %vm1357_vm3, %v996_v4  ;;  %6975 = vmatprep.mubr.msk.f32.mxu1 %vm7450_vm2, %v7449_v15 }
 0x256   :  { %6983 = vmatprep.subr.mxu1 %v7449_v15  ;;  %v149_v37 = vrot.slane %v141_v31, %v140_v30  ;;  %v142_v47 = vcombine.high %v141_v31, %v141_v31 }
 0x258   :  { %6976 = vmatmul.mubr.msk.f32.vlgmr.msra.gmra.mxu1 %vm1357_vm3, %v704_v7  ;;  %v159_v39 = vmul.f32 -1e+09, %v149_v37  ;;  %v156_v49 = vrot.slane %v142_v47, %v140_v30 }
 0x259   :  { %6984 = vmatpush3.xpose.msk.msra.mxu1 %vm1357_vm3, %v1062_v8  ;;  %6985 = vmatprep.mubr.msk.f32.mxu1 %vm7450_vm2, %v7449_v15 }
 0x25a   :  { %6993 = vmatprep.subr.mxu1 %v7449_v15  ;;  %v166_v40 = vrot.slane %v159_v39, %v165_v13  ;;  %v160_v44 = vmul.f32 -1e+09, %v156_v49 }
 0x25c   :  { %6986 = vmatmul.mubr.msk.f32.vlgmr.msra.gmra.mxu1 %vm1357_vm3, %v770_v9  ;;  %v7825_v48 = vadd.f32 %v166_v40, %v132_v46  ;;  %v170_v55 = vrot.slane %v160_v44, %v165_v13 }
 0x25d   :  { %6994 = vmatpush3.xpose.msk.msra.mxu1 %vm1357_vm3, %v1064_v10  ;;  %6995 = vmatprep.mubr.msk.f32.mxu1 %vm7450_vm2, %v7449_v15 }
 0x25e   :  { %7003 = vmatprep.subr.mxu1 %v7449_v15  ;;  %v7833_v58 = vadd.f32 %v170_v55, %v132_v46 }
 0x260   :  { %6996 = vmatmul.mubr.msk.f32.vlgmr.msra.gmra.mxu1 %vm1357_vm3, %v772_v11 }
 0x261   :  { %7005 = vmatprep.mubr.msk.f32.mxu1 %vm7450_vm2, %v7449_v15 }
 0x30c   :  { %v1430_v42 = vpop.f32.mrf.mxu1 }
 0x30d   :  { %v1431_v50 = vadd.f32 %v1430_v42, %v7825_v48 }
 0x30e   :  { %v6962_v43 = vpop.f32.mrf.mxu1 }
 0x30f   :  { %v1966_v51 = vsel %vm1357_vm3, %v1431_v50, -inf  ;;  %v1734_v53 = vpop.f32.mrf.mxu0 }
 0x310   :  { %1967 = vmax.xlane.f32.xlu0 %v1966_v51  ;;  %v1506_v52 = vpop.f32.mrf.mxu1  ;;  %v1735_v34 = vadd.f32 %v1734_v53, %v7833_v58 }
 0x311   :  { %v1507_v45 = vadd.f32 %v1506_v52, %v7825_v48  ;;  %v6982_v17 = vpop.f32.mrf.mxu0 }
 0x312   :  { %v6967_v23 = vpop.f32.mrf.mxu1  ;;  %v1978_v63 = vsel %vm1357_vm3, %v1735_v34, -inf }
 0x313   :  { %v1969_v54 = vsel %vm1357_vm3, %v1507_v45, -inf  ;;  %v1886_v56 = vpop.f32.mrf.mxu0 }
 0x314   :  { %1970 = vmax.xlane.f32.xlu1 %v1969_v54  ;;  %v1582_v12 = vpop.f32.mrf.mxu1  ;;  %v1887_v14 = vadd.f32 %v1886_v56, %v7833_v58 }
 0x315   :  { %v1583_v19 = vadd.f32 %v1582_v12, %v7825_v48  ;;  %v6992_v60 = vpop.f32.mrf.mxu0 }
 0x316   :  { %v6972_v20 = vpop.f32.mrf.mxu1  ;;  %v1984_v4 = vsel %vm1357_vm3, %v1887_v14, -inf }
 0x317   :  { %v1972_v57 = vsel %vm1357_vm3, %v1583_v19, -inf }
 0x318   :  { %1973 = vmax.xlane.f32.xlu0 %v1972_v57  ;;  %v1658_v59 = vpop.f32.mrf.mxu1 }
 0x319   :  { %v1659_v32 = vadd.f32 %v1658_v59, %v7825_v48 }
 0x31a   :  { %v6977_v33 = vpop.f32.mrf.mxu1 }
 0x31b   :  { %v1975_v35 = vsel %vm1357_vm3, %v1659_v32, -inf }
 0x31c   :  { %1976 = vmax.xlane.f32.xlu0 %v1975_v35  ;;  %v1810_v61 = vpop.f32.mrf.mxu1 }
 0x31d   :  { %v1811_v6 = vadd.f32 %v1810_v61, %v7833_v58 }
 0x31e   :  { %v6987_v62 = vpop.f32.mrf.mxu1 }
 0x31f   :  { %v1981_v8 = vsel %vm1357_vm3, %v1811_v6, -inf }
 0x320   :  { %v1962_v0 = vpop.f32.mrf.mxu1  ;;  %1979 = vmax.xlane.f32.xlu0 %v1978_v63 }
 0x321   :  { %v1963_v7 = vadd.f32 %v1962_v0, %v7833_v58 }
 0x322   :  { %v6997_v1 = vpop.f32.mrf.mxu1 }
 0x323   :  { %v1987_v9 = vsel %vm1357_vm3, %v1963_v7, -inf }
 0x324   :  { %1985 = vmax.xlane.f32.xlu0 %v1984_v4 }
 0x325   :  { %1073 = vrot.lane.b32.xlu1 %v7841_v3, %s7447_s29 }
 0x33a   :  { %1067 = vrot.lane.b32.xlu0 %v7841_v3, %s7446_s2 }
 0x349   :  { %1982 = vmax.xlane.f32.xlu1 %v1981_v8 }
 0x34d   :  { %1988 = vmax.xlane.f32.xlu1 %v1987_v9 }
 0x35e   :  { %1079 = vrot.lane.b32.xlu1 %v7841_v3, %s7448_s11 }
 0x399   :  { %v1968_v2 = vpop.xlane.xlu0 %1967 }
 0x39a   :  { %v1990_v21 = vsub.f32 %v1431_v50, %v1968_v2 }
 0x39c   :  { %v1998_v28 = vmul.f32 1.442695, %v1990_v21 }
 0x39d   :  { %v1971_v22 = vpop.xlane.xlu1 %1970 }
 0x39e   :  { %v1991_v27 = vsub.f32 %v1507_v45, %v1971_v22 }
 0x3a0   :  { %v2000_v39 = vmul.f32 1.442695, %v1991_v27 }
 0x3a1   :  { %v1974_v10 = vpop.xlane.xlu0 %1973  ;;  %v1074_v54 = vpop.permute.xlu1 %1073 }
 0x3a2   :  { %v1992_v30 = vsub.f32 %v1583_v19, %v1974_v10  ;;  %v1085_v56 = vcombine.low %v7841_v3, %v1074_v54  ;;  %v1086_v57 = vcombine.high %v7841_v3, %v1074_v54 }
 0x3a4   :  { %v2002_v13 = vmul.f32 1.442695, %v1992_v30  ;;  %v1093_v35 = vrot.slane %v1085_v56, %v7671_v29  ;;  %v1100_v61 = vrot.slane %v1086_v57, %v7671_v29 }
 0x3a5   :  { %v1977_v11 = vpop.xlane.xlu0 %1976 }
 0x3a6   :  { %v1993_v40 = vsub.f32 %v1659_v32, %v1977_v11 }
 0x3a8   :  { %v2004_v46 = vmul.f32 1.442695, %v1993_v40 }
 0x3a9   :  { %v1980_v25 = vpop.xlane.xlu0 %1979 }
 0x3aa   :  { %v1994_v26 = vsub.f32 %v1735_v34, %v1980_v25 }
 0x3ac   :  { %v2006_v31 = vmul.f32 1.442695, %v1994_v26 }
 0x3ad   :  { %v1986_v37 = vpop.xlane.xlu0 %1985 }
 0x3ae   :  { %7296 = vpow2.f32 %v2006_v31  ;;  %v1996_v38 = vsub.f32 %v1887_v14, %v1986_v37 }
 0x3af   :  { %7298 = vpow2.f32 %v1998_v28 }
 0x3b0   :  { %v2010_v41 = vmul.f32 1.442695, %v1996_v38 }
 0x3b1   :  { %v1068_v60 = vpop.permute.xlu0 %1067 }
 0x3b2   :  { %7300 = vpow2.f32 %v2010_v41 }
 0x3b3   :  { %7302 = vpow2.f32 %v2000_v39 }
 0x3b4   :  { %7304 = vpow2.f32 %v2002_v13 }
 0x3b5   :  { %7306 = vpow2.f32 %v2004_v46 }
 0x3bb   :  { %v7854_v47 = vpop.eup %7296 }
 0x3bc   :  { %v2026_v49 = vsel %vm1357_vm3, %v7854_v47, 0.0  ;;  %v7858_v42 = vpop.eup %7298 }
 0x3bd   :  { %2027 = vadd.xlane.f32.xlu0 %v2026_v49  ;;  %v2014_v51 = vsel %vm1357_vm3, %v7858_v42, 0.0 }
 0x3bf   :  { %v7860_v50 = vpop.eup %7300 }
 0x3c0   :  { %v7862_v43 = vpop.eup %7302  ;;  %v2032_v44 = vsel %vm1357_vm3, %v7860_v50, 0.0 }
 0x3c1   :  { %v7868_v16 = vpop.eup %7304  ;;  %2015 = vadd.xlane.f32.xlu0 %v2014_v51  ;;  %2033 = vadd.xlane.f32.xlu1 %v2032_v44  ;;  %v2017_v45 = vsel %vm1357_vm3, %v7862_v43, 0.0 }
 0x3c2   :  { %v2020_v52 = vsel %vm1357_vm3, %v7868_v16, 0.0  ;;  %v7874_v23 = vpop.eup %7306 }
 0x3c3   :  { %v2023_v53 = vsel %vm1357_vm3, %v7874_v23, 0.0 }
 0x3c5   :  { %2021 = vadd.xlane.f32.xlu0 %v2020_v52  ;;  %2018 = vadd.xlane.f32.xlu1 %v2017_v45 }
 0x3c9   :  { %2024 = vadd.xlane.f32.xlu1 %v2023_v53 }
 0x3d2   :  { %v1983_v55 = vpop.xlane.xlu1 %1982 }
 0x3d3   :  { %v1995_v12 = vsub.f32 %v1811_v6, %v1983_v55 }
 0x3d5   :  { %v2008_v17 = vmul.f32 1.442695, %v1995_v12 }
 0x3d6   :  { %v1989_v19 = vpop.xlane.xlu1 %1988 }
 0x3d7   :  { %7308 = vpow2.f32 %v2008_v17  ;;  %v1997_v20 = vsub.f32 %v1963_v7, %v1989_v19 }
 0x3d9   :  { %v2012_v59 = vmul.f32 1.442695, %v1997_v20 }
 0x3da   :  { %v1080_v32 = vpop.permute.xlu1 %1079 }
 0x3db   :  { %7310 = vpow2.f32 %v2012_v59  ;;  %v1101_v33 = vcombine.low %v1068_v60, %v1080_v32  ;;  %v1102_v34 = vcombine.high %v1068_v60, %v1080_v32 }
 0x3dd   :  { %v1109_v62 = vrot.slane %v1101_v33, %v7671_v29  ;;  %v1116_v14 = vrot.slane %v1102_v34, %v7671_v29 }
 0x3df   :  { %v1117_v63 = vcombine.low %v1093_v35, %v1109_v62  ;;  %v1118_v0 = vcombine.high %v1093_v35, %v1109_v62  ;;  %v1133_v1 = vcombine.low %v1100_v61, %v1116_v14  ;;  %v1134_v4 = vcombine.high %v1100_v61, %v1116_v14 }
 0x3e1   :  { %v1125_v3 = vrot.slane %v1117_v63, %v7674_v36  ;;  %v1132_v6 = vrot.slane %v1118_v0, %v7674_v36  ;;  %v1141_v7 = vrot.slane %v1133_v1, %v7674_v36  ;;  %v1148_v8 = vrot.slane %v1134_v4, %v7674_v36 }
 0x3e3   :  { %v1221_v9 = vcombine.low %v1125_v3, %v1132_v6  ;;  %v6609_v2 = vcombine.high %v1125_v3, %v1132_v6  ;;  %v1237_v10 = vcombine.low %v1141_v7, %v1148_v8  ;;  %v6610_v11 = vcombine.high %v1141_v7, %v1148_v8 }
 0x3e4   :  { %v7888_v21 = vpop.eup %7308 }
 0x3e5   :  { %v1228_v22 = vrot.slane %v1221_v9, %v7671_v29  ;;  %v1236_v25 = vrot.slane %v6609_v2, %v7671_v29  ;;  %v1244_v26 = vrot.slane %v1237_v10, %v7671_v29  ;;  %v1252_v27 = vrot.slane %v6610_v11, %v7671_v29 }
 0x3e6   :  { %v2029_v28 = vsel %vm1357_vm3, %v7888_v21, 0.0 }
 0x3e7   :  { %2030 = vadd.xlane.f32.xlu1 %v2029_v28  ;;  %v1253_v30 = vcombine.low %v1228_v22, %v1236_v25  ;;  %v1269_v31 = vcombine.low %v1244_v26, %v1252_v27  ;;  %v1254_v37 = vcombine.high %v1228_v22, %v1236_v25  ;;  %v1270_v38 = vcombine.high %v1244_v26, %v1252_v27 }
 0x3e8   :  { %v7896_v39 = vpop.eup %7310 }
 0x3e9   :  { %v2035_v13 = vsel %vm1357_vm3, %v7896_v39, 0.0  ;;  %v1261_v40 = vrot.slane %v1253_v30, %v7674_v36  ;;  %v1277_v41 = vrot.slane %v1269_v31, %v7674_v36  ;;  %v1268_v46 = vrot.slane %v1254_v37, %v7674_v36 }
 0x3ea   :  { %2036 = vadd.xlane.f32.xlu0 %v2035_v13  ;;  %v1284_v49 = vrot.slane %v1270_v38, %v7674_v36 }
 0x3eb   :  { %v1285_v51 = vcombine.low %v1261_v40, %v1277_v41  ;;  %v1286_v44 = vcombine.high %v1261_v40, %v1277_v41 }
 0x3ec   :  { %v1287_v52 = vcombine.low %v1268_v46, %v1284_v49  ;;  %v1288_v45 = vcombine.high %v1268_v46, %v1284_v49 }
 0x3ed   :  { %6999 = vmatpush3.msra.mxu0 %v1285_v51  ;;  %7004 = vmatpush3.msra.mxu1 %v1286_v44 }
 0x3ee   :  { %7008 = vmatprep.subr.mxu0 %v7449_v15  ;;  %7013 = vmatprep.subr.mxu1 %v7449_v15 }
 0x3f8   :  { %1075 = vrot.lane.b32.xlu1 %v7632_v5, %s7447_s29 }
 0x3fc   :  { %1081 = vrot.lane.b32.xlu1 %v7632_v5, %s7448_s11 }
 0x400   :  { %1069 = vrot.lane.b32.xlu0 %v7632_v5, %s7446_s2 }
 0x446   :  { %v2028_v53 = vpop.xlane.xlu0 %2027 }
 0x44a   :  { %v2016_v54 = vpop.xlane.xlu0 %2015  ;;  %v2034_v55 = vpop.xlane.xlu1 %2033 }
 0x44b   :  { %7312 = vrcp.f32 %v2016_v54 }
 0x44e   :  { %v2022_v12 = vpop.xlane.xlu0 %2021  ;;  %v2019_v17 = vpop.xlane.xlu1 %2018 }
 0x44f   :  { %7314 = vrcp.f32 %v2022_v12 }
 0x450   :  { %7316 = vrcp.f32 %v2019_v17 }
 0x452   :  { %v2025_v19 = vpop.xlane.xlu1 %2024 }
 0x453   :  { %7318 = vrcp.f32 %v2025_v19 }
 0x454   :  { %7320 = vrcp.f32 %v2028_v53 }
 0x458   :  { %v7313_v20 = vpop.eup %7312 }
 0x459   :  { %v2046_v56 = vmul.f32 %v7313_v20, %v7858_v42 }
 0x45b   :  { %7001 = vmatmul.mubr.msk.f32.vlgmr.msra.gmra.mxu0 %vm1357_vm3, %v2046_v56 }
 0x45c   :  { %v7315_v57 = vpop.eup %7314  ;;  %7009 = vmatpush3.msra.mxu0 %v1287_v52  ;;  %7010 = vmatprep.mubr.msk.f32.mxu0 %vm7450_vm2, %v7449_v15 }
 0x45d   :  { %v7317_v59 = vpop.eup %7316  ;;  %v2048_v60 = vmul.f32 %v7315_v57, %v7868_v16  ;;  %7018 = vmatprep.subr.mxu0 %v7449_v15 }
 0x45e   :  { %v2047_v32 = vmul.f32 %v7317_v59, %v7862_v43 }
 0x45f   :  { %7011 = vmatmul.mubr.msk.f32.vlgmr.msra.gmra.mxu0 %vm1357_vm3, %v2048_v60 }
 0x460   :  { %v7319_v33 = vpop.eup %7318  ;;  %7006 = vmatmul.mubr.msk.f32.vlgmr.msra.gmra.mxu1 %vm1357_vm3, %v2047_v32  ;;  %7020 = vmatprep.mubr.msk.f32.mxu0 %vm7450_vm2, %v7449_v15 }
 0x461   :  { %7014 = vmatpush3.msra.mxu1 %v1288_v45  ;;  %7015 = vmatprep.mubr.msk.f32.mxu1 %vm7450_vm2, %v7449_v15  ;;  %v2049_v42 = vmul.f32 %v7319_v33, %v7874_v23  ;;  %v7321_v46 = vpop.eup %7320 }
 0x462   :  { %7023 = vmatprep.subr.mxu1 %v7449_v15  ;;  %v2050_v12 = vmul.f32 %v7321_v46, %v7854_v47 }
 0x464   :  { %7016 = vmatmul.mubr.msk.f32.vlgmr.msra.gmra.mxu1 %vm1357_vm3, %v2049_v42 }
 0x465   :  { %7025 = vmatprep.mubr.msk.f32.mxu1 %vm7450_vm2, %v7449_v15 }
 0x470   :  { %v2031_v43 = vpop.xlane.xlu1 %2030 }
 0x471   :  { %7322 = vrcp.f32 %v2031_v43 }
 0x472   :  { %7324 = vrcp.f32 %v2034_v55 }
 0x473   :  { %v2037_v16 = vpop.xlane.xlu0 %2036 }
 0x474   :  { %v1076_v34 = vpop.permute.xlu1 %1075  ;;  %7326 = vrcp.f32 %v2037_v16 }
 0x475   :  { %v1153_v35 = vcombine.low %v7632_v5, %v1076_v34  ;;  %v1154_v61 = vcombine.high %v7632_v5, %v1076_v34 }
 0x477   :  { %v1070_v62 = vpop.permute.xlu0 %1069  ;;  %v1161_v23 = vrot.slane %v1153_v35, %v7671_v29  ;;  %v1168_v1 = vrot.slane %v1154_v61, %v7671_v29 }
 0x478   :  { %v1082_v14 = vpop.permute.xlu1 %1081 }
 0x479   :  { %v1169_v63 = vcombine.low %v1070_v62, %v1082_v14  ;;  %v1170_v0 = vcombine.high %v1070_v62, %v1082_v14 }
 0x47b   :  { %v1177_v4 = vrot.slane %v1169_v63, %v7671_v29  ;;  %v1184_v3 = vrot.slane %v1170_v0, %v7671_v29 }
 0x47d   :  { %v1185_v6 = vcombine.low %v1161_v23, %v1177_v4  ;;  %v1186_v7 = vcombine.high %v1161_v23, %v1177_v4  ;;  %v1201_v8 = vcombine.low %v1168_v1, %v1184_v3  ;;  %v1202_v9 = vcombine.high %v1168_v1, %v1184_v3 }
 0x47e   :  { %v7323_v49 = vpop.eup %7322 }
 0x47f   :  { %v1193_v5 = vrot.slane %v1185_v6, %v7674_v36  ;;  %v1200_v2 = vrot.slane %v1186_v7, %v7674_v36  ;;  %v1209_v10 = vrot.slane %v1201_v8, %v7674_v36  ;;  %v1216_v11 = vrot.slane %v1202_v9, %v7674_v36  ;;  %v7325_v53 = vpop.eup %7324 }
 0x480   :  { %v2051_v17 = vmul.f32 %v7323_v49, %v7888_v21  ;;  %v2052_v57 = vmul.f32 %v7325_v53, %v7860_v50 }
 0x481   :  { %v1289_v22 = vcombine.low %v1193_v5, %v1200_v2  ;;  %v6611_v25 = vcombine.high %v1193_v5, %v1200_v2  ;;  %v1305_v26 = vcombine.low %v1209_v10, %v1216_v11  ;;  %v6612_v27 = vcombine.high %v1209_v10, %v1216_v11  ;;  %v7327_v19 = vpop.eup %7326 }
 0x482   :  { %v2053_v47 = vmul.f32 %v7327_v19, %v7896_v39 }
 0x483   :  { %v1296_v28 = vrot.slane %v1289_v22, %v7671_v29  ;;  %v1304_v30 = vrot.slane %v6611_v25, %v7671_v29  ;;  %v1312_v31 = vrot.slane %v1305_v26, %v7671_v29  ;;  %v1320_v37 = vrot.slane %v6612_v27, %v7671_v29 }
 0x485   :  { %v1321_v38 = vcombine.low %v1296_v28, %v1304_v30  ;;  %v1337_v13 = vcombine.low %v1312_v31, %v1320_v37  ;;  %v1322_v40 = vcombine.high %v1296_v28, %v1304_v30  ;;  %v1338_v41 = vcombine.high %v1312_v31, %v1320_v37 }
 0x487   :  { %v1329_v51 = vrot.slane %v1321_v38, %v7674_v36  ;;  %v1345_v44 = vrot.slane %v1337_v13, %v7674_v36  ;;  %v1336_v52 = vrot.slane %v1322_v40, %v7674_v36  ;;  %v1352_v45 = vrot.slane %v1338_v41, %v7674_v36 }
 0x489   :  { %v1353_v54 = vcombine.low %v1329_v51, %v1345_v44  ;;  %v1354_v55 = vcombine.high %v1329_v51, %v1345_v44  ;;  %v1355_v20 = vcombine.low %v1336_v52, %v1352_v45  ;;  %v1356_v56 = vcombine.high %v1336_v52, %v1352_v45 }
 0x48b   :  { %7019 = vmatpush3.msra.mxu0 %v1353_v54  ;;  %7024 = vmatpush3.msra.mxu1 %v1354_v55 }
 0x48c   :  { %7021 = vmatmul.mubr.msk.f32.vlgmr.msra.gmra.mxu0 %vm1357_vm3, %v2050_v12  ;;  %7026 = vmatmul.mubr.msk.f32.vlgmr.msra.gmra.mxu1 %vm1357_vm3, %v2051_v17 }
 0x48d   :  { %7028 = vmatprep.subr.mxu0 %v7449_v15  ;;  %7033 = vmatprep.subr.mxu1 %v7449_v15 }
 0x48e   :  { %7029 = vmatpush3.msra.mxu0 %v1355_v20  ;;  %7034 = vmatpush3.msra.mxu1 %v1356_v56 }
 0x48f   :  { %7030 = vmatprep.mubr.msk.f32.mxu0 %vm7450_vm2, %v7449_v15  ;;  %7035 = vmatprep.mubr.msk.f32.mxu1 %vm7450_vm2, %v7449_v15 }
 0x490   :  { %7031 = vmatmul.mubr.msk.f32.vlgmr.msra.gmra.mxu0 %vm1357_vm3, %v2052_v57  ;;  %7036 = vmatmul.mubr.msk.f32.vlgmr.msra.gmra.mxu1 %vm1357_vm3, %v2053_v47 }
 0x51b   :  { %v2123_v21 = vpop.f32.mrf.mxu0 }
 0x51d   :  { %v7002_v59 = vpop.f32.mrf.mxu0 }
 0x51f   :  { %v2269_v60 = vpop.f32.mrf.mxu0 }
 0x520   :  { %v2196_v32 = vpop.f32.mrf.mxu1  ;;  %v2638_v43 = vcombine.low %v2123_v21, %v2269_v60  ;;  %v2639_v50 = vcombine.high %v2123_v21, %v2269_v60 }
 0x521   :  { %v7012_v33 = vpop.f32.mrf.mxu0 }
 0x522   :  { %v7007_v42 = vpop.f32.mrf.mxu1  ;;  %v2646_v61 = vrot.slane %v2638_v43, %v7671_v29  ;;  %v2653_v62 = vrot.slane %v2639_v50, %v7671_v29  ;;  %v6644_v50 = vld [vmem:[%s8661_s3 + $0x78] sm:$0xff] }
 0x523   :  { %7038 = vmatprep.subr.mxu0 %v6644_v50 }
 0x524   :  { %v2342_v16 = vpop.f32.mrf.mxu1  ;;  %7039 = vmatpush3.msra.mxu0 %v6644_v50 }
 0x525   :  { %v2654_v39 = vcombine.low %v2196_v32, %v2342_v16  ;;  %v2655_v34 = vcombine.high %v2196_v32, %v2342_v16  ;;  %v6643_v16 = vld [vmem:[%s8661_s3 + $0x70] sm:$0xff] }
 0x526   :  { %v7017_v35 = vpop.f32.mrf.mxu1  ;;  %7040 = vmatprep.subr.mxu0 %v6643_v16 }
 0x527   :  { %v2662_v14 = vrot.slane %v2654_v39, %v7671_v29  ;;  %v2669_v63 = vrot.slane %v2655_v34, %v7671_v29  ;;  %7041 = vmatpush3.msra.mxu0 %v6643_v16 }
 0x529   :  { %v2670_v0 = vcombine.low %v2646_v61, %v2662_v14  ;;  %v2671_v23 = vcombine.high %v2646_v61, %v2662_v14  ;;  %v2686_v1 = vcombine.low %v2653_v62, %v2669_v63  ;;  %v2687_v4 = vcombine.high %v2653_v62, %v2669_v63 }
 0x52b   :  { %v2678_v3 = vrot.slane %v2670_v0, %v7674_v36  ;;  %v2685_v6 = vrot.slane %v2671_v23, %v7674_v36  ;;  %v2694_v7 = vrot.slane %v2686_v1, %v7674_v36  ;;  %v2701_v8 = vrot.slane %v2687_v4, %v7674_v36  ;;  %v6642_v23 = vld [vmem:[%s8661_s3 + $0x68] sm:$0xff]  ;;  %v6641_v1 = vld [vmem:[%s8661_s3 + $0x60] sm:$0xff] }
 0x52c   :  { %7042 = vmatprep.subr.mxu0 %v6642_v23 }
 0x52d   :  { %v2774_v9 = vcombine.low %v2678_v3, %v2685_v6  ;;  %v6637_v5 = vcombine.high %v2678_v3, %v2685_v6  ;;  %v2790_v2 = vcombine.low %v2694_v7, %v2701_v8  ;;  %v6638_v10 = vcombine.high %v2694_v7, %v2701_v8  ;;  %7043 = vmatpush3.msra.mxu0 %v6642_v23 }
 0x52e   :  { %7044 = vmatprep.subr.mxu0 %v6641_v1 }
 0x52f   :  { %v2781_v11 = vrot.slane %v2774_v9, %v7671_v29  ;;  %v2789_v22 = vrot.slane %v6637_v5, %v7671_v29  ;;  %v2797_v25 = vrot.slane %v2790_v2, %v7671_v29  ;;  %v2805_v26 = vrot.slane %v6638_v10, %v7671_v29  ;;  %7045 = vmatpush3.msra.mxu0 %v6641_v1 }
 0x531   :  { %v2806_v27 = vcombine.low %v2781_v11, %v2789_v22  ;;  %v2822_v28 = vcombine.low %v2797_v25, %v2805_v26  ;;  %v2807_v30 = vcombine.high %v2781_v11, %v2789_v22  ;;  %v2823_v31 = vcombine.high %v2797_v25, %v2805_v26 }
 0x533   :  { %v7975_v37 = vrot.slane %v2806_v27, %v7674_v36  ;;  %v7978_v38 = vrot.slane %v2822_v28, %v7674_v36  ;;  %v2821_v41 = vrot.slane %v2807_v30, %v7674_v36  ;;  %v2837_v46 = vrot.slane %v2823_v31, %v7674_v36 }
 0x535   :  { %v2839_v13 = vcombine.high %v7975_v37, %v7978_v38  ;;  %v2838_v40 = vcombine.low %v7975_v37, %v7978_v38  ;;  %v2840_v49 = vcombine.low %v2821_v41, %v2837_v46  ;;  %v2841_v51 = vcombine.high %v2821_v41, %v2837_v46  ;;  %v6645_v37 = vld [vmem:[#allocation7 + $0x5] ss:$0 sm:$0xff] }
 0x537   :  { %2912 = vrot.lane.b32.xlu0 %v2839_v13, %s7445_s9 }
 0x53b   :  { %2920 = vrot.lane.b32.xlu0 %v2840_v49, %s7455_s1 }
 0x53f   :  { %2928 = vrot.lane.b32.xlu0 %v2841_v51, %s7456_s14 }
 0x54c   :  { %v2415_v44 = vpop.f32.mrf.mxu0  ;;  %v2488_v52 = vpop.f32.mrf.mxu1 }
 0x54e   :  { %v7022_v45 = vpop.f32.mrf.mxu0  ;;  %v7027_v53 = vpop.f32.mrf.mxu1 }
 0x550   :  { %v2561_v54 = vpop.f32.mrf.mxu0  ;;  %v2634_v55 = vpop.f32.mrf.mxu1 }
 0x551   :  { %v2706_v12 = vcombine.low %v2415_v44, %v2561_v54  ;;  %v2707_v17 = vcombine.high %v2415_v44, %v2561_v54  ;;  %v2722_v19 = vcombine.low %v2488_v52, %v2634_v55  ;;  %v2723_v20 = vcombine.high %v2488_v52, %v2634_v55 }
 0x552   :  { %v7032_v56 = vpop.f32.mrf.mxu0  ;;  %v7037_v57 = vpop.f32.mrf.mxu1 }
 0x553   :  { %v2714_v47 = vrot.slane %v2706_v12, %v7671_v29  ;;  %v2721_v21 = vrot.slane %v2707_v17, %v7671_v29  ;;  %v2730_v59 = vrot.slane %v2722_v19, %v7671_v29  ;;  %v2737_v60 = vrot.slane %v2723_v20, %v7671_v29 }
 0x555   :  { %v2738_v32 = vcombine.low %v2714_v47, %v2730_v59  ;;  %v2739_v33 = vcombine.high %v2714_v47, %v2730_v59  ;;  %v2754_v42 = vcombine.low %v2721_v21, %v2737_v60  ;;  %v2755_v43 = vcombine.high %v2721_v21, %v2737_v60  ;;  %v3082_v59 = vld [vmem:[%s8662_s4 + $0x18] sm:$0xff]  ;;  %v3081_v60 = vld [vmem:[%s8662_s4 + $0x10] sm:$0xff] }
 0x556   :  { %7049 = vmatprep.subr.mxu1 %v3082_v59 }
 0x557   :  { %v2746_v39 = vrot.slane %v2738_v32, %v7674_v36  ;;  %v2753_v34 = vrot.slane %v2739_v33, %v7674_v36  ;;  %v2762_v35 = vrot.slane %v2754_v42, %v7674_v36  ;;  %v2769_v61 = vrot.slane %v2755_v43, %v7674_v36  ;;  %7050 = vmatpush3.msra.mxu1 %v3082_v59  ;;  %v3080_v32 = vld [vmem:[%s8662_s4 + $0x8] sm:$0xff]  ;;  %v3079_v33 = vld [vmem:[%s8662_s4] sm:$0xff] }
 0x558   :  { %7051 = vmatprep.subr.mxu1 %v3081_v60 }
 0x559   :  { %v2842_v62 = vcombine.low %v2746_v39, %v2753_v34  ;;  %v6639_v14 = vcombine.high %v2746_v39, %v2753_v34  ;;  %v2858_v63 = vcombine.low %v2762_v35, %v2769_v61  ;;  %v6640_v0 = vcombine.high %v2762_v35, %v2769_v61  ;;  %7052 = vmatpush3.msra.mxu1 %v3081_v60 }
 0x55a   :  { %7053 = vmatprep.subr.mxu1 %v3080_v32 }
 0x55b   :  { %v2849_v4 = vrot.slane %v2842_v62, %v7671_v29  ;;  %v2857_v3 = vrot.slane %v6639_v14, %v7671_v29  ;;  %v2865_v6 = vrot.slane %v2858_v63, %v7671_v29  ;;  %v2873_v7 = vrot.slane %v6640_v0, %v7671_v29  ;;  %7054 = vmatpush3.msra.mxu1 %v3080_v32 }
 0x55c   :  { %7055 = vmatprep.subr.mxu1 %v3079_v33 }
 0x55d   :  { %v2874_v8 = vcombine.low %v2849_v4, %v2857_v3  ;;  %v2890_v9 = vcombine.low %v2865_v6, %v2873_v7  ;;  %v2875_v5 = vcombine.high %v2849_v4, %v2857_v3  ;;  %v2891_v2 = vcombine.high %v2865_v6, %v2873_v7  ;;  %7056 = vmatpush3.msra.mxu1 %v3079_v33  ;;  %v6648_v6 = vld [vmem:[#allocation7 + $0x6] ss:$0 sm:$0xff] }
 0x55f   :  { %v2882_v10 = vrot.slane %v2874_v8, %v7674_v36  ;;  %v2898_v11 = vrot.slane %v2890_v9, %v7674_v36  ;;  %v2889_v26 = vrot.slane %v2875_v5, %v7674_v36  ;;  %v2905_v27 = vrot.slane %v2891_v2, %v7674_v36  ;;  %v6649_v8 = vld [vmem:[#allocation7 + $0x7] ss:$0 sm:$0xff] }
 0x561   :  { %v2907_v22 = vcombine.high %v2882_v10, %v2898_v11  ;;  %v2906_v25 = vcombine.low %v2882_v10, %v2898_v11  ;;  %v2908_v28 = vcombine.low %v2889_v26, %v2905_v27  ;;  %v2909_v30 = vcombine.high %v2889_v26, %v2905_v27  ;;  %v3202_v26 = vld [vmem:[%s8663_s5 + $0x78] sm:$0xff]  ;;  %v3201_v27 = vld [vmem:[%s8663_s5 + $0x70] sm:$0xff] }
 0x562   :  { %7060 = vmatprep.subr.mxu0 %v3202_v26 }
 0x563   :  { %2914 = vrot.lane.b32.xlu1 %v2907_v22, %s7445_s9 }
 0x567   :  { %2922 = vrot.lane.b32.xlu1 %v2908_v28, %s7455_s1  ;;  %v3200_v28 = vld [vmem:[%s8663_s5 + $0x68] sm:$0xff] }
 0x56b   :  { %2930 = vrot.lane.b32.xlu1 %v2909_v30, %s7456_s14  ;;  %v3199_v30 = vld [vmem:[%s8663_s5 + $0x60] sm:$0xff] }
 0x5a9   :  { %v2913_v31 = vpop.permute.xlu0 %2912 }
 0x5aa   :  { %v2934_v41 = vsel %vm1357_vm3, %v2838_v40, %v2913_v31  ;;  %v3198_v31 = vld [vmem:[%s8663_s5 + $0x58] sm:$0xff] }
 0x5ad   :  { %v2921_v13 = vpop.permute.xlu0 %2920 }
 0x5ae   :  { %v2937_v46 = vsel %vm2936_vm5, %v2934_v41, %v2921_v13  ;;  %v3197_v13 = vld [vmem:[%s8663_s5 + $0x50] sm:$0xff]  ;;  %v3196_v41 = vld [vmem:[%s8663_s5 + $0x48] sm:$0xff] }
 0x5b1   :  { %v2929_v49 = vpop.permute.xlu0 %2928 }
 0x5b2   :  { %v2940_v51 = vsel %vm2939_vm6, %v2937_v46, %v2929_v49  ;;  %v3195_v46 = vld [vmem:[%s8663_s5 + $0x40] sm:$0xff]  ;;  %v3194_v49 = vld [vmem:[%s8663_s5 + $0x38] sm:$0xff] }
 0x5b3   :  { %7046 = vmatprep.mubr.msk.f32.mxu0 %vm177_vm1, %v2940_v51  ;;  %v3193_v51 = vld [vmem:[%s8663_s5 + $0x30] sm:$0xff] }
 0x5d5   :  { %v2915_v44 = vpop.permute.xlu1 %2914 }
 0x5d6   :  { %v2935_v45 = vsel %vm1357_vm3, %v2906_v25, %v2915_v44  ;;  %v3192_v44 = vld [vmem:[%s8663_s5 + $0x28] sm:$0xff] }
 0x5d9   :  { %v2923_v52 = vpop.permute.xlu1 %2922 }
 0x5da   :  { %v2938_v53 = vsel %vm2936_vm5, %v2935_v45, %v2923_v52  ;;  %v3191_v52 = vld [vmem:[%s8663_s5 + $0x20] sm:$0xff]  ;;  %v3190_v45 = vld [vmem:[%s8663_s5 + $0x18] sm:$0xff] }
 0x5dd   :  { %v2931_v54 = vpop.permute.xlu1 %2930 }
 0x5de   :  { %v2941_v55 = vsel %vm2939_vm6, %v2938_v53, %v2931_v54  ;;  %v3189_v53 = vld [vmem:[%s8663_s5 + $0x10] sm:$0xff]  ;;  %v3188_v54 = vld [vmem:[%s8663_s5 + $0x8] sm:$0xff] }
 0x5df   :  { %7047 = vmatmul.mubr.msk.f32.vlgmr.msra.gmra.mxu0 %vm177_vm1, %v2941_v55  ;;  %v3187_v55 = vld [vmem:[%s8663_s5] sm:$0xff] }
 0x5e0   :  { %7061 = vmatpush3.msra.mxu0 %v3202_v26 }
 0x5e1   :  { %7062 = vmatprep.subr.mxu0 %v3201_v27 }
 0x5e2   :  { %7063 = vmatpush3.msra.mxu0 %v3201_v27 }
 0x5e3   :  { %7064 = vmatprep.subr.mxu0 %v3200_v28 }
 0x5e4   :  { %7065 = vmatpush3.msra.mxu0 %v3200_v28 }
 0x5e5   :  { %7066 = vmatprep.subr.mxu0 %v3199_v30 }
 0x5e6   :  { %7067 = vmatpush3.msra.mxu0 %v3199_v30 }
 0x5e7   :  { %7068 = vmatprep.subr.mxu0 %v3198_v31 }
 0x5e8   :  { %7069 = vmatpush3.msra.mxu0 %v3198_v31 }
 0x5e9   :  { %7070 = vmatprep.subr.mxu0 %v3197_v13 }
 0x5ea   :  { %7071 = vmatpush3.msra.mxu0 %v3197_v13 }
 0x5eb   :  { %7072 = vmatprep.subr.mxu0 %v3196_v41 }
 0x5ec   :  { %7073 = vmatpush3.msra.mxu0 %v3196_v41 }
 0x5ed   :  { %7074 = vmatprep.subr.mxu0 %v3195_v46 }
 0x5ee   :  { %7075 = vmatpush3.msra.mxu0 %v3195_v46 }
 0x5ef   :  { %7076 = vmatprep.subr.mxu0 %v3194_v49 }
 0x5f0   :  { %7077 = vmatpush3.msra.mxu0 %v3194_v49 }
 0x5f1   :  { %7078 = vmatprep.subr.mxu0 %v3193_v51 }
 0x5f2   :  { %7079 = vmatpush3.msra.mxu0 %v3193_v51 }
 0x5f3   :  { %7080 = vmatprep.subr.mxu0 %v3192_v44 }
 0x5f4   :  { %7081 = vmatpush3.msra.mxu0 %v3192_v44 }
 0x5f5   :  { %7082 = vmatprep.subr.mxu0 %v3191_v52 }
 0x5f6   :  { %7083 = vmatpush3.msra.mxu0 %v3191_v52 }
 0x5f7   :  { %7084 = vmatprep.subr.mxu0 %v3190_v45 }
 0x5f8   :  { %7085 = vmatpush3.msra.mxu0 %v3190_v45 }
 0x5f9   :  { %7086 = vmatprep.subr.mxu0 %v3189_v53 }
 0x5fa   :  { %7087 = vmatpush3.msra.mxu0 %v3189_v53 }
 0x5fb   :  { %7088 = vmatprep.subr.mxu0 %v3188_v54 }
 0x5fc   :  { %7089 = vmatpush3.msra.mxu0 %v3188_v54 }
 0x5fd   :  { %7090 = vmatprep.subr.mxu0 %v3187_v55 }
 0x5fe   :  { %7091 = vmatpush3.msra.mxu0 %v3187_v55  ;;  %v6654_v55 = vld [vmem:[#allocation7 + $0xa] ss:$0 sm:$0xff] }
 0x5ff   :  { %7138 = vmatprep.subr.mxu0 %v7449_v15 }
 0x69f   :  { %v7048_v38 = vpop.f32.mrf.mxu0 }
 0x6a0   :  { %v3030_v40 = vadd.f32 %v7048_v38, %v6645_v37 }
 0x6a1   :  { %v3024_v12 = vpop.f32.mrf.mxu0 }
 0x6a2   :  { %v8032_v17 = vadd.f32 %v3030_v40, %v7578_v24  ;;  %v3025_v19 = vadd.f32 %v6645_v37, %v3024_v12  ;;  %v6650_v37 = vld [vmem:[#allocation7 + $0x8] ss:$0 sm:$0xff] }
 0x6a4   :  { %v8035_v20 = vadd.f32 %v3025_v19, %v7570_v18  ;;  %v3040_v56 = vsel %vm177_vm1, %v8032_v17, 0.0  ;;  %v3046_v24 = vmul.f32 %v8032_v17, %v8032_v17 }
 0x6a5   :  { %3041 = vadd.xlane.f32.xlu1 %v3040_v56 }
 0x6a6   :  { %v3037_v57 = vsel %vm177_vm1, %v8035_v20, 0.0  ;;  %v3045_v47 = vmul.f32 %v8035_v20, %v8035_v20  ;;  %v3050_v18 = vsel %vm177_vm1, %v3046_v24, 0.0 }
 0x6a7   :  { %3038 = vadd.xlane.f32.xlu0 %v3037_v57 }
 0x6a8   :  { %v3047_v21 = vsel %vm177_vm1, %v3045_v47, 0.0 }
 0x6ab   :  { %3048 = vadd.xlane.f32.xlu0 %v3047_v21 }
 0x6af   :  { %3051 = vadd.xlane.f32.xlu0 %v3050_v18 }
 0x72e   :  { %v3042_v50 = vpop.xlane.xlu1 %3041 }
 0x72f   :  { %v3044_v39 = vmul.f32 0.03125, %v3042_v50 }
 0x730   :  { %v3039_v42 = vpop.xlane.xlu0 %3038 }
 0x731   :  { %v3043_v43 = vmul.f32 0.03125, %v3039_v42  ;;  %v3056_v14 = vmul.f32 %v3044_v39, %v3044_v39  ;;  %v3060_v9 = vsub.f32 %v8032_v17, %v3044_v39 }
 0x733   :  { %v3055_v34 = vmul.f32 %v3043_v43, %v3043_v43  ;;  %v3059_v4 = vsub.f32 %v8035_v20, %v3043_v43 }
 0x734   :  { %v3049_v16 = vpop.xlane.xlu0 %3048 }
 0x735   :  { %v3053_v35 = vmul.f32 0.03125, %v3049_v16 }
 0x737   :  { %v3057_v61 = vsub.f32 %v3053_v35, %v3055_v34 }
 0x738   :  { %v3052_v62 = vpop.xlane.xlu0 %3051 }
 0x739   :  { %v3061_v63 = vadd.f32 1e-05, %v3057_v61  ;;  %v3054_v0 = vmul.f32 0.03125, %v3052_v62  ;;  %v6653_v62 = vld [vmem:[#allocation7 + $0x9] ss:$0 sm:$0xff] }
 0x73b   :  { %7328 = vrsqrt.f32 %v3061_v63  ;;  %v3058_v23 = vsub.f32 %v3054_v0, %v3056_v14 }
 0x73d   :  { %v3062_v1 = vadd.f32 1e-05, %v3058_v23 }
 0x73f   :  { %7330 = vrsqrt.f32 %v3062_v1 }
 0x748   :  { %v7329_v3 = vpop.eup %7328 }
 0x749   :  { %v3065_v7 = vmul.f32 %v7329_v3, %v3059_v4 }
 0x74b   :  { %v3071_v5 = vmul.f32 %v6648_v6, %v3065_v7 }
 0x74c   :  { %v7331_v2 = vpop.eup %7330 }
 0x74d   :  { %v3066_v10 = vmul.f32 %v7331_v2, %v3060_v9  ;;  %v3077_v11 = vadd.f32 %v6649_v8, %v3071_v5  ;;  %v6659_v9 = vld [vmem:[%s8661_s3 + $0x98] sm:$0xff]  ;;  %v6658_v5 = vld [vmem:[%s8661_s3 + $0x90] sm:$0xff]  ;;  %v6657_v2 = vld [vmem:[%s8661_s3 + $0x88] sm:$0xff] }
 0x74e   :  { %7095 = vmatprep.subr.mxu1 %v6659_v9 }
 0x74f   :  { %v3072_v22 = vmul.f32 %v6648_v6, %v3066_v10  ;;  %7057 = vmatprep.mubr.msk.f32.mxu1 %vm177_vm1, %v3077_v11  ;;  %v6656_v10 = vld [vmem:[%s8661_s3 + $0x80] sm:$0xff]  ;;  %v6666_v11 = vld [vmem:[%s8661_s3 + $0xb8] sm:$0xff] }
 0x751   :  { %v3078_v25 = vadd.f32 %v6649_v8, %v3072_v22 }
 0x753   :  { %7058 = vmatmul.mubr.msk.f32.vlgmr.msra.gmra.mxu1 %vm177_vm1, %v3078_v25 }
 0x754   :  { %7096 = vmatpush3.msra.mxu1 %v6659_v9 }
 0x755   :  { %7097 = vmatprep.subr.mxu1 %v6658_v5 }
 0x756   :  { %7098 = vmatpush3.msra.mxu1 %v6658_v5 }
 0x757   :  { %7099 = vmatprep.subr.mxu1 %v6657_v2 }
 0x758   :  { %7100 = vmatpush3.msra.mxu1 %v6657_v2 }
 0x759   :  { %7101 = vmatprep.subr.mxu1 %v6656_v10 }
 0x75a   :  { %7102 = vmatpush3.msra.mxu1 %v6656_v10 }
 0x75b   :  { %7106 = vmatprep.subr.mxu1 %v6666_v11 }
 0x813   :  { %v7059_v38 = vpop.f32.mrf.mxu1 }
 0x814   :  { %v3166_v40 = vadd.f32 %v7059_v38, %v6650_v37 }
 0x815   :  { %v3160_v12 = vpop.f32.mrf.mxu1 }
 0x816   :  { %v3172_v19 = vmul.f32 0.044715, %v3166_v40  ;;  %v3161_v56 = vadd.f32 %v6650_v37, %v3160_v12  ;;  %v3170_v34 = vmul.f32 0.5, %v3166_v40 }
 0x818   :  { %v3174_v57 = vmul.f32 %v3172_v19, %v3166_v40  ;;  %v3171_v47 = vmul.f32 0.044715, %v3161_v56  ;;  %v3169_v16 = vmul.f32 0.5, %v3161_v56  ;;  %v6655_v19 = vld [vmem:[#allocation7 + $0xb] ss:$0 sm:$0xff] }
 0x81a   :  { %v3176_v21 = vmul.f32 %v3174_v57, %v3166_v40  ;;  %v3173_v24 = vmul.f32 %v3171_v47, %v3161_v56 }
 0x81c   :  { %v3178_v18 = vadd.f32 %v3176_v21, %v3166_v40  ;;  %v3175_v59 = vmul.f32 %v3173_v24, %v3161_v56  ;;  %v6665_v21 = vld [vmem:[%s8661_s3 + $0xb0] sm:$0xff]  ;;  %v6664_v24 = vld [vmem:[%s8661_s3 + $0xa8] sm:$0xff] }
 0x81e   :  { %v3177_v60 = vadd.f32 %v3175_v59, %v3161_v56  ;;  %v3180_v32 = vmul.f32 0.7978846, %v3178_v18  ;;  %v6663_v18 = vld [vmem:[%s8661_s3 + $0xa0] sm:$0xff]  ;;  %v6673_v59 = vld [vmem:[%s8661_s3 + $0xd8] sm:$0xff] }
 0x820   :  { %v3179_v33 = vmul.f32 0.7978846, %v3177_v60  ;;  %7332 = vtanh.f32 %v3180_v32  ;;  %v6672_v60 = vld [vmem:[%s8661_s3 + $0xd0] sm:$0xff]  ;;  %v6671_v32 = vld [vmem:[%s8661_s3 + $0xc8] sm:$0xff] }
 0x822   :  { %7334 = vtanh.f32 %v3179_v33  ;;  %v6670_v33 = vld [vmem:[%s8661_s3 + $0xc0] sm:$0xff] }
 0x82d   :  { %v7333_v42 = vpop.eup %7332 }
 0x82e   :  { %v3184_v50 = vadd.f32 1.0, %v7333_v42 }
 0x82f   :  { %v7335_v43 = vpop.eup %7334 }
 0x830   :  { %v3183_v39 = vadd.f32 1.0, %v7335_v43  ;;  %v3186_v61 = vmul.f32 %v3184_v50, %v3170_v34  ;;  %v6660_v43 = vld [vmem:[#allocation7 + $0xc] ss:$0 sm:$0xff]  ;;  %v6667_v34 = vld [vmem:[#allocation7 + $0xd] ss:$0 sm:$0xff] }
 0x832   :  { %v3185_v35 = vmul.f32 %v3183_v39, %v3169_v16 }
 0x834   :  { %7092 = vmatprep.mubr.f32.mxu0 %v3185_v35 }
 0x835   :  { %7093 = vmatmul.mubr.f32.vlgmr.msra.gmra.mxu0 %v3186_v61 }
 0x836   :  { %7140 = vmatprep.mubr.msk.f32.mxu0 %vm7450_vm2, %v7449_v15 }
 0x8f5   :  { %v7094_v14 = vpop.f32.mrf.mxu0 }
 0x8f6   :  { %v3280_v63 = vadd.f32 %v7094_v14, %v6653_v62 }
 0x8f7   :  { %v3274_v0 = vpop.f32.mrf.mxu0 }
 0x8f8   :  { %v8115_v23 = vadd.f32 %v3280_v63, %v8032_v17  ;;  %v3275_v1 = vadd.f32 %v6653_v62, %v3274_v0  ;;  %v8180_v62 = vld [vmem:[#allocation7 + $0xe] ss:$0 sm:$0xff] }
 0x8fa   :  { %v8118_v4 = vadd.f32 %v3275_v1, %v8035_v20  ;;  %v3290_v3 = vsel %vm177_vm1, %v8115_v23, 0.0  ;;  %v3296_v6 = vmul.f32 %v8115_v23, %v8115_v23 }
 0x8fb   :  { %3291 = vadd.xlane.f32.xlu1 %v3290_v3 }
 0x8fc   :  { %v3287_v7 = vsel %vm177_vm1, %v8118_v4, 0.0  ;;  %v3295_v8 = vmul.f32 %v8118_v4, %v8118_v4  ;;  %v3300_v17 = vsel %vm177_vm1, %v3296_v6, 0.0 }
 0x8fd   :  { %3288 = vadd.xlane.f32.xlu0 %v3287_v7 }
 0x8fe   :  { %v3297_v20 = vsel %vm177_vm1, %v3295_v8, 0.0 }
 0x8ff   :  { %3301 = vadd.xlane.f32.xlu1 %v3300_v17 }
 0x901   :  { %3298 = vadd.xlane.f32.xlu0 %v3297_v20 }
 0x984   :  { %v3292_v22 = vpop.xlane.xlu1 %3291 }
 0x985   :  { %v3294_v25 = vmul.f32 0.03125, %v3292_v22 }
 0x986   :  { %v3289_v26 = vpop.xlane.xlu0 %3288 }
 0x987   :  { %v3293_v27 = vmul.f32 0.03125, %v3289_v26  ;;  %v3306_v30 = vmul.f32 %v3294_v25, %v3294_v25  ;;  %v3310_v45 = vsub.f32 %v8115_v23, %v3294_v25 }
 0x988   :  { %v3302_v28 = vpop.xlane.xlu1 %3301 }
 0x989   :  { %v3304_v31 = vmul.f32 0.03125, %v3302_v28  ;;  %v3305_v41 = vmul.f32 %v3293_v27, %v3293_v27  ;;  %v3309_v54 = vsub.f32 %v8118_v4, %v3293_v27 }
 0x98a   :  { %v3299_v13 = vpop.xlane.xlu0 %3298 }
 0x98b   :  { %v3308_v46 = vsub.f32 %v3304_v31, %v3306_v30  ;;  %v3303_v49 = vmul.f32 0.03125, %v3299_v13 }
 0x98d   :  { %v3312_v51 = vadd.f32 1e-05, %v3308_v46  ;;  %v3307_v44 = vsub.f32 %v3303_v49, %v3305_v41 }
 0x98f   :  { %7336 = vrsqrt.f32 %v3312_v51  ;;  %v3311_v52 = vadd.f32 1e-05, %v3307_v44 }
 0x991   :  { %7338 = vrsqrt.f32 %v3311_v52 }
 0x99c   :  { %v7337_v53 = vpop.eup %7336 }
 0x99d   :  { %v3316_v37 = vmul.f32 %v7337_v53, %v3310_v45 }
 0x99e   :  { %v7339_v38 = vpop.eup %7338 }
 0x99f   :  { %v3315_v40 = vmul.f32 %v7339_v38, %v3309_v54  ;;  %v3322_v12 = vmul.f32 %v6654_v55, %v3316_v37 }
 0x9a1   :  { %v3321_v56 = vmul.f32 %v6654_v55, %v3315_v40  ;;  %v3328_v47 = vadd.f32 %v6655_v19, %v3322_v12 }
 0x9a3   :  { %v3327_v57 = vadd.f32 %v6655_v19, %v3321_v56 }
 0x9a5   :  { %7103 = vmatprep.mubr.msk.f32.mxu1 %vm177_vm1, %v3327_v57 }
 0x9a6   :  { %7104 = vmatmul.mubr.msk.f32.vlgmr.msra.gmra.mxu1 %vm177_vm1, %v3328_v47 }
 0x9a7   :  { %7107 = vmatpush3.msra.mxu1 %v6666_v11  ;;  %7114 = vmatprep.mubr.msk.f32.mxu1 %vm177_vm1, %v3327_v57 }
 0x9a8   :  { %7108 = vmatprep.subr.mxu1 %v6665_v21 }
 0x9a9   :  { %7109 = vmatpush3.msra.mxu1 %v6665_v21 }
 0x9aa   :  { %7110 = vmatprep.subr.mxu1 %v6664_v24 }
 0x9ab   :  { %7111 = vmatpush3.msra.mxu1 %v6664_v24 }
 0x9ac   :  { %7112 = vmatprep.subr.mxu1 %v6663_v18 }
 0x9ad   :  { %7113 = vmatpush3.msra.mxu1 %v6663_v18 }
 0x9ae   :  { %7115 = vmatmul.mubr.msk.f32.vlgmr.msra.gmra.mxu1 %vm177_vm1, %v3328_v47  ;;  %7117 = vmatprep.subr.mxu1 %v6673_v59 }
 0x9af   :  { %7118 = vmatpush3.msra.mxu1 %v6673_v59  ;;  %7125 = vmatprep.mubr.msk.f32.mxu1 %vm177_vm1, %v3327_v57 }
 0x9b0   :  { %7119 = vmatprep.subr.mxu1 %v6672_v60 }
 0x9b1   :  { %7120 = vmatpush3.msra.mxu1 %v6672_v60 }
 0x9b2   :  { %7121 = vmatprep.subr.mxu1 %v6671_v32 }
 0x9b3   :  { %7122 = vmatpush3.msra.mxu1 %v6671_v32 }
 0x9b4   :  { %7123 = vmatprep.subr.mxu1 %v6670_v33 }
 0x9b5   :  { %7124 = vmatpush3.msra.mxu1 %v6670_v33 }
 0x9b6   :  { %7126 = vmatmul.mubr.msk.f32.vlgmr.msra.gmra.mxu1 %vm177_vm1, %v3328_v47  ;;  %7128 = vmatprep.subr.mxu1 %v7449_v15 }
 0x9b7   :  { %7130 = vmatprep.mubr.msk.f32.mxu1 %vm7450_vm2, %v7449_v15 }
 0xa66   :  { %v7105_v42 = vpop.f32.mrf.mxu1 }
 0xa67   :  { %v8196_v1 = vadd.f32 %v7105_v42, %v6660_v43 }
 0xa68   :  { %v3411_v50 = vpop.f32.mrf.mxu1 }
 0xa69   :  { %v3412_v16 = vadd.f32 %v6660_v43, %v3411_v50 }
 0xa6b   :  { %3592 = vrot.lane.b32.xlu1 %v3412_v16, %s7446_s2 }
 0xa6e   :  { %v7116_v39 = vpop.f32.mrf.mxu1 }
 0xa6f   :  { %v8187_v0 = vadd.f32 %v7116_v39, %v6667_v34 }
 0xa70   :  { %v3496_v35 = vpop.f32.mrf.mxu1 }
 0xa71   :  { %v3497_v61 = vadd.f32 %v6667_v34, %v3496_v35 }
 0xa73   :  { %3884 = vrot.lane.b32.xlu0 %v3497_v61, %s7446_s2  ;;  %3890 = vrot.lane.b32.xlu1 %v3497_v61, %s7447_s29 }
 0xa76   :  { %v7127_v14 = vpop.f32.mrf.mxu1 }
 0xa77   :  { %v8183_v63 = vadd.f32 %v7127_v14, %v8180_v62  ;;  %3598 = vrot.lane.b32.xlu0 %v3412_v16, %s7447_s29  ;;  %3896 = vrot.lane.b32.xlu1 %v3497_v61, %s7448_s11 }
 0xa7b   :  { %3886 = vrot.lane.b32.xlu0 %v8187_v0, %s7446_s2  ;;  %3604 = vrot.lane.b32.xlu1 %v3412_v16, %s7448_s11 }
 0xa7f   :  { %3898 = vrot.lane.b32.xlu0 %v8187_v0, %s7448_s11  ;;  %3892 = vrot.lane.b32.xlu1 %v8187_v0, %s7447_s29 }
 0xa83   :  { %3600 = vrot.lane.b32.xlu0 %v8196_v1, %s7447_s29  ;;  %3594 = vrot.lane.b32.xlu1 %v8196_v1, %s7446_s2 }
 0xa87   :  { %3606 = vrot.lane.b32.xlu1 %v8196_v1, %s7448_s11 }
 0xadd   :  { %v3593_v3 = vpop.permute.xlu1 %3592 }
 0xae5   :  { %v3885_v6 = vpop.permute.xlu0 %3884  ;;  %v3891_v7 = vpop.permute.xlu1 %3890 }
 0xae6   :  { %v3902_v8 = vcombine.low %v3497_v61, %v3891_v7  ;;  %v3903_v17 = vcombine.high %v3497_v61, %v3891_v7 }
 0xae8   :  { %v3910_v10 = vrot.slane %v3902_v8, %v7671_v29  ;;  %v3917_v11 = vrot.slane %v3903_v17, %v7671_v29 }
 0xae9   :  { %v3599_v20 = vpop.permute.xlu0 %3598  ;;  %v3897_v9 = vpop.permute.xlu1 %3896 }
 0xaea   :  { %v3918_v5 = vcombine.low %v3885_v6, %v3897_v9  ;;  %v3919_v2 = vcombine.high %v3885_v6, %v3897_v9  ;;  %v3610_v26 = vcombine.low %v3412_v16, %v3599_v20  ;;  %v3611_v27 = vcombine.high %v3412_v16, %v3599_v20 }
 0xaec   :  { %v3926_v22 = vrot.slane %v3918_v5, %v7671_v29  ;;  %v3933_v25 = vrot.slane %v3919_v2, %v7671_v29  ;;  %v3618_v54 = vrot.slane %v3610_v26, %v7671_v29  ;;  %v3625_v55 = vrot.slane %v3611_v27, %v7671_v29 }
 0xaed   :  { %v3605_v28 = vpop.permute.xlu1 %3604  ;;  %v3887_v46 = vpop.permute.xlu0 %3886 }
 0xaee   :  { %v3934_v30 = vcombine.low %v3910_v10, %v3926_v22  ;;  %v3935_v31 = vcombine.high %v3910_v10, %v3926_v22  ;;  %v3950_v13 = vcombine.low %v3917_v11, %v3933_v25  ;;  %v3951_v41 = vcombine.high %v3917_v11, %v3933_v25 }
 0xaef   :  { %v3626_v49 = vcombine.low %v3593_v3, %v3605_v28  ;;  %v3627_v51 = vcombine.high %v3593_v3, %v3605_v28 }
 0xaf0   :  { %v3942_v44 = vrot.slane %v3934_v30, %v7674_v36  ;;  %v3949_v52 = vrot.slane %v3935_v31, %v7674_v36  ;;  %v3958_v45 = vrot.slane %v3950_v13, %v7674_v36  ;;  %v3965_v53 = vrot.slane %v3951_v41, %v7674_v36 }
 0xaf1   :  { %v3634_v37 = vrot.slane %v3626_v49, %v7671_v29  ;;  %v3641_v38 = vrot.slane %v3627_v51, %v7671_v29  ;;  %v3893_v40 = vpop.permute.xlu1 %3892  ;;  %v3899_v42 = vpop.permute.xlu0 %3898 }
 0xaf2   :  { %v4038_v12 = vcombine.low %v3942_v44, %v3949_v52  ;;  %v6681_v19 = vcombine.high %v3942_v44, %v3949_v52  ;;  %v4054_v56 = vcombine.low %v3958_v45, %v3965_v53  ;;  %v6682_v57 = vcombine.high %v3958_v45, %v3965_v53 }
 0xaf3   :  { %v3642_v47 = vcombine.low %v3618_v54, %v3634_v37  ;;  %v3643_v21 = vcombine.high %v3618_v54, %v3634_v37  ;;  %v3658_v24 = vcombine.low %v3625_v55, %v3641_v38  ;;  %v3659_v18 = vcombine.high %v3625_v55, %v3641_v38 }
 0xaf4   :  { %v8217_v59 = vrot.slane %v4038_v12, %v7671_v29  ;;  %v8220_v60 = vrot.slane %v6681_v19, %v7671_v29  ;;  %v8223_v32 = vrot.slane %v4054_v56, %v7671_v29  ;;  %v8226_v33 = vrot.slane %v6682_v57, %v7671_v29 }
 0xaf5   :  { %v3650_v43 = vrot.slane %v3642_v47, %v7674_v36  ;;  %v3657_v50 = vrot.slane %v3643_v21, %v7674_v36  ;;  %v3666_v16 = vrot.slane %v3658_v24, %v7674_v36  ;;  %v3673_v39 = vrot.slane %v3659_v18, %v7674_v36  ;;  %v3595_v34 = vpop.permute.xlu1 %3594  ;;  %v3601_v27 = vpop.permute.xlu0 %3600 }
 0xaf6   :  { %v4070_v35 = vcombine.low %v8217_v59, %v8220_v60  ;;  %v4071_v61 = vcombine.high %v8217_v59, %v8220_v60  ;;  %v3986_v8 = vcombine.low %v3887_v46, %v3899_v42  ;;  %v3987_v17 = vcombine.high %v3887_v46, %v3899_v42 }
 0xaf7   :  { %v3746_v14 = vcombine.low %v3650_v43, %v3657_v50  ;;  %v6677_v3 = vcombine.high %v3650_v43, %v3657_v50  ;;  %v3762_v6 = vcombine.low %v3666_v16, %v3673_v39  ;;  %v6678_v7 = vcombine.high %v3666_v16, %v3673_v39 }
 0xaf8   :  { %v3970_v20 = vcombine.low %v8187_v0, %v3893_v40  ;;  %v3971_v9 = vcombine.high %v8187_v0, %v3893_v40  ;;  %v4086_v5 = vcombine.low %v8223_v32, %v8226_v33  ;;  %v4087_v2 = vcombine.high %v8223_v32, %v8226_v33 }
 0xaf9   :  { %v8243_v10 = vrot.slane %v3746_v14, %v7671_v29  ;;  %v8246_v11 = vrot.slane %v6677_v3, %v7671_v29  ;;  %v3994_v22 = vrot.slane %v3986_v8, %v7671_v29  ;;  %v4001_v25 = vrot.slane %v3987_v17, %v7671_v29  ;;  %v3607_v28 = vpop.permute.xlu1 %3606 }
 0xafa   :  { %v3978_v26 = vrot.slane %v3970_v20, %v7671_v29  ;;  %v3985_v0 = vrot.slane %v3971_v9, %v7671_v29  ;;  %v8253_v30 = vrot.slane %v3762_v6, %v7671_v29  ;;  %v8256_v31 = vrot.slane %v6678_v7, %v7671_v29 }
 0xafb   :  { %v3778_v13 = vcombine.low %v8243_v10, %v8246_v11  ;;  %v3779_v41 = vcombine.high %v8243_v10, %v8246_v11  ;;  %v3678_v52 = vcombine.low %v8196_v1, %v3601_v27  ;;  %v3679_v45 = vcombine.high %v8196_v1, %v3601_v27 }
 0xafc   :  { %v4002_v46 = vcombine.low %v3978_v26, %v3994_v22  ;;  %v4003_v49 = vcombine.high %v3978_v26, %v3994_v22  ;;  %v4018_v51 = vcombine.low %v3985_v0, %v4001_v25  ;;  %v4019_v44 = vcombine.high %v3985_v0, %v4001_v25 }
 0xafd   :  { %v3694_v53 = vcombine.low %v3595_v34, %v3607_v28  ;;  %v3695_v54 = vcombine.high %v3595_v34, %v3607_v28  ;;  %v3686_v12 = vrot.slane %v3678_v52, %v7671_v29  ;;  %v3693_v19 = vrot.slane %v3679_v45, %v7671_v29 }
 0xafe   :  { %v4010_v55 = vrot.slane %v4002_v46, %v7674_v36  ;;  %v4017_v37 = vrot.slane %v4003_v49, %v7674_v36  ;;  %v4026_v38 = vrot.slane %v4018_v51, %v7674_v36  ;;  %v4033_v40 = vrot.slane %v4019_v44, %v7674_v36 }
 0xaff   :  { %v3702_v56 = vrot.slane %v3694_v53, %v7671_v29  ;;  %v3709_v57 = vrot.slane %v3695_v54, %v7671_v29  ;;  %v3794_v7 = vcombine.low %v8253_v30, %v8256_v31  ;;  %v3795_v8 = vcombine.high %v8253_v30, %v8256_v31 }
 0xb00   :  { %v4106_v47 = vcombine.low %v4010_v55, %v4017_v37  ;;  %v6683_v1 = vcombine.high %v4010_v55, %v4017_v37  ;;  %v4122_v21 = vcombine.low %v4026_v38, %v4033_v40  ;;  %v6684_v24 = vcombine.high %v4026_v38, %v4033_v40 }
 0xb01   :  { %v3710_v18 = vcombine.low %v3686_v12, %v3702_v56  ;;  %v3711_v32 = vcombine.high %v3686_v12, %v3702_v56  ;;  %v3726_v33 = vcombine.low %v3693_v19, %v3709_v57  ;;  %v3727_v42 = vcombine.high %v3693_v19, %v3709_v57 }
 0xb02   :  { %v4113_v43 = vrot.slane %v4106_v47, %v7671_v29  ;;  %v4121_v50 = vrot.slane %v6683_v1, %v7671_v29  ;;  %v4129_v16 = vrot.slane %v4122_v21, %v7671_v29  ;;  %v4137_v39 = vrot.slane %v6684_v24, %v7671_v29 }
 0xb03   :  { %v3718_v34 = vrot.slane %v3710_v18, %v7674_v36  ;;  %v3725_v14 = vrot.slane %v3711_v32, %v7674_v36  ;;  %v3734_v3 = vrot.slane %v3726_v33, %v7674_v36  ;;  %v3741_v6 = vrot.slane %v3727_v42, %v7674_v36 }
 0xb04   :  { %v4138_v17 = vcombine.low %v4113_v43, %v4121_v50  ;;  %v4154_v20 = vcombine.low %v4129_v16, %v4137_v39  ;;  %v4078_v25 = vrot.slane %v4070_v35, %v7674_v36  ;;  %v4094_v26 = vrot.slane %v4086_v5, %v7674_v36 }
 0xb05   :  { %v3814_v9 = vcombine.low %v3718_v34, %v3725_v14  ;;  %v6679_v10 = vcombine.high %v3718_v34, %v3725_v14  ;;  %v3830_v11 = vcombine.low %v3734_v3, %v3741_v6  ;;  %v6680_v22 = vcombine.high %v3734_v3, %v3741_v6 }
 0xb06   :  { %v4085_v0 = vrot.slane %v4071_v61, %v7674_v36  ;;  %v4101_v27 = vrot.slane %v4087_v2, %v7674_v36  ;;  %v4102_v49 = vcombine.low %v4078_v25, %v4094_v26  ;;  %v3786_v35 = vrot.slane %v3778_v13, %v7674_v36 }
 0xb07   :  { %v3821_v28 = vrot.slane %v3814_v9, %v7671_v29  ;;  %v3829_v30 = vrot.slane %v6679_v10, %v7671_v29  ;;  %v3837_v31 = vrot.slane %v3830_v11, %v7671_v29  ;;  %v3845_v46 = vrot.slane %v6680_v22, %v7671_v29 }
 0xb08   :  { %v4104_v51 = vcombine.low %v4085_v0, %v4101_v27  ;;  %v3802_v5 = vrot.slane %v3794_v7, %v7674_v36  ;;  %v4139_v44 = vcombine.high %v4113_v43, %v4121_v50  ;;  %v4155_v60 = vcombine.high %v4129_v16, %v4137_v39  ;;  %7129 = vmatpush3.xpose.msk.msra.mxu1 %vm1357_vm3, %v4102_v49  ;;  %v3581_v39 = vpop.f32.mrf.mxu1 }
 0xb09   :  { %v3846_v52 = vcombine.low %v3821_v28, %v3829_v30  ;;  %v3862_v59 = vcombine.low %v3837_v31, %v3845_v46  ;;  %v3793_v2 = vrot.slane %v3779_v41, %v7674_v36  ;;  %7133 = vmatprep.subr.mxu1 %v7449_v15  ;;  %v4103_v45 = vcombine.high %v4078_v25, %v4094_v26 }
 0xb0a   :  { %7139 = vmatpush3.xpose.msk.msra.mxu0 %vm1357_vm3, %v4104_v51  ;;  %v3810_v61 = vcombine.low %v3786_v35, %v3802_v5  ;;  %v3809_v53 = vrot.slane %v3795_v8, %v7674_v36  ;;  %v4146_v13 = vrot.slane %v4138_v17, %v7674_v36  ;;  %v4162_v54 = vrot.slane %v4154_v20, %v7674_v36 }
 0xb0b   :  { %7148 = vmatprep.subr.mxu0 %v7449_v15  ;;  %v3854_v55 = vrot.slane %v3846_v52, %v7674_v36  ;;  %v3870_v37 = vrot.slane %v3862_v59, %v7674_v36  ;;  %v3847_v38 = vcombine.high %v3821_v28, %v3829_v30  ;;  %v3863_v40 = vcombine.high %v3837_v31, %v3845_v46 }
 0xb0c   :  { %7131 = vmatmul.mubr.msk.f32.vlgmr.msra.gmra.mxu1 %vm1357_vm3, %v3810_v61  ;;  %v3812_v41 = vcombine.low %v3793_v2, %v3809_v53  ;;  %v4170_v12 = vcombine.low %v4146_v13, %v4162_v54  ;;  %v4153_v19 = vrot.slane %v4139_v44, %v7674_v36  ;;  %v4169_v56 = vrot.slane %v4155_v60, %v7674_v36 }
 0xb0d   :  { %7134 = vmatpush3.xpose.msk.msra.mxu1 %vm1357_vm3, %v4103_v45  ;;  %7135 = vmatprep.mubr.msk.f32.mxu1 %vm7450_vm2, %v7449_v15  ;;  %v3811_v57 = vcombine.high %v3786_v35, %v3802_v5  ;;  %v3878_v47 = vcombine.low %v3854_v55, %v3870_v37  ;;  %v4105_v1 = vcombine.high %v4085_v0, %v4101_v27 }
 0xb0e   :  { %7141 = vmatmul.mubr.msk.f32.vlgmr.msra.gmra.mxu0 %vm1357_vm3, %v3812_v41  ;;  %7143 = vmatprep.subr.mxu1 %v7449_v15  ;;  %v3861_v21 = vrot.slane %v3847_v38, %v7674_v36  ;;  %v3877_v24 = vrot.slane %v3863_v40, %v7674_v36  ;;  %v4172_v18 = vcombine.low %v4153_v19, %v4169_v56 }
 0xb0f   :  { %7149 = vmatpush3.xpose.msk.msra.mxu0 %vm1357_vm3, %v4170_v12  ;;  %7150 = vmatprep.mubr.msk.f32.mxu0 %vm7450_vm2, %v7449_v15  ;;  %v3813_v32 = vcombine.high %v3793_v2, %v3809_v53  ;;  %v4171_v33 = vcombine.high %v4146_v13, %v4162_v54  ;;  %v3879_v42 = vcombine.high %v3854_v55, %v3870_v37 }
 0xb10   :  { %7136 = vmatmul.mubr.msk.f32.vlgmr.msra.gmra.mxu1 %vm1357_vm3, %v3811_v57  ;;  %7158 = vmatprep.subr.mxu0 %v7449_v15  ;;  %v3880_v43 = vcombine.low %v3861_v21, %v3877_v24  ;;  %v4173_v50 = vcombine.high %v4153_v19, %v4169_v56  ;;  %v3881_v16 = vcombine.high %v3861_v21, %v3877_v24 }
 0xb11   :  { %7144 = vmatpush3.xpose.msk.msra.mxu1 %vm1357_vm3, %v4105_v1  ;;  %7145 = vmatprep.mubr.msk.f32.mxu1 %vm7450_vm2, %v7449_v15 }
 0xb12   :  { %7153 = vmatprep.subr.mxu1 %v7449_v15  ;;  %7151 = vmatmul.mubr.msk.f32.vlgmr.msra.gmra.mxu0 %vm1357_vm3, %v3878_v47 }
 0xb13   :  { %7159 = vmatpush3.xpose.msk.msra.mxu0 %vm1357_vm3, %v4172_v18  ;;  %7160 = vmatprep.mubr.msk.f32.mxu0 %vm7450_vm2, %v7449_v15 }
 0xb14   :  { %7146 = vmatmul.mubr.msk.f32.vlgmr.msra.gmra.mxu1 %vm1357_vm3, %v3813_v32  ;;  %7168 = vmatprep.subr.mxu0 %v7449_v15 }
 0xb15   :  { %7154 = vmatpush3.xpose.msk.msra.mxu1 %vm1357_vm3, %v4171_v33  ;;  %7155 = vmatprep.mubr.msk.f32.mxu1 %vm7450_vm2, %v7449_v15 }
 0xb16   :  { %7163 = vmatprep.subr.mxu1 %v7449_v15  ;;  %7161 = vmatmul.mubr.msk.f32.vlgmr.msra.gmra.mxu0 %vm1357_vm3, %v3880_v43 }
 0xb17   :  { %7170 = vmatprep.mubr.msk.f32.mxu0 %vm7450_vm2, %v7449_v15 }
 0xb18   :  { %7156 = vmatmul.mubr.msk.f32.vlgmr.msra.gmra.mxu1 %vm1357_vm3, %v3879_v42 }
 0xb19   :  { %7164 = vmatpush3.xpose.msk.msra.mxu1 %vm1357_vm3, %v4173_v50  ;;  %7165 = vmatprep.mubr.msk.f32.mxu1 %vm7450_vm2, %v7449_v15 }
 0xb1a   :  { %7173 = vmatprep.subr.mxu1 %v7449_v15 }
 0xb1c   :  { %7166 = vmatmul.mubr.msk.f32.vlgmr.msra.gmra.mxu1 %vm1357_vm3, %v3881_v16 }
 0xb1d   :  { %7175 = vmatprep.mubr.msk.f32.mxu1 %vm7450_vm2, %v7449_v15 }
 0xbcc   :  { %v4538_v34 = vpop.f32.mrf.mxu1 }
 0xbcd   :  { %v4539_v14 = vadd.f32 %v4538_v34, %v7825_v48 }
 0xbce   :  { %v4690_v3 = vpop.f32.mrf.mxu0  ;;  %v7132_v6 = vpop.f32.mrf.mxu1 }
 0xbcf   :  { %v4691_v7 = vadd.f32 %v4690_v3, %v7825_v48  ;;  %v5074_v8 = vsel %vm1357_vm3, %v4539_v14, -inf }
 0xbd0   :  { %v7142_v17 = vpop.f32.mrf.mxu0  ;;  %5075 = vmax.xlane.f32.xlu0 %v5074_v8  ;;  %v4614_v20 = vpop.f32.mrf.mxu1 }
 0xbd1   :  { %v4615_v9 = vadd.f32 %v4614_v20, %v7825_v48  ;;  %v5080_v22 = vsel %vm1357_vm3, %v4691_v7, -inf }
 0xbd2   :  { %v7137_v10 = vpop.f32.mrf.mxu1  ;;  %v4842_v11 = vpop.f32.mrf.mxu0 }
 0xbd3   :  { %v5077_v25 = vsel %vm1357_vm3, %v4615_v9, -inf  ;;  %v4843_v28 = vadd.f32 %v4842_v11, %v7833_v58 }
 0xbd4   :  { %5081 = vmax.xlane.f32.xlu0 %v5080_v22  ;;  %5078 = vmax.xlane.f32.xlu1 %v5077_v25  ;;  %v4766_v26 = vpop.f32.mrf.mxu1  ;;  %v7152_v0 = vpop.f32.mrf.mxu0 }
 0xbd5   :  { %v4767_v27 = vadd.f32 %v4766_v26, %v7825_v48  ;;  %v5086_v35 = vsel %vm1357_vm3, %v4843_v28, -inf  ;;  %v8363_v48 = vadd.f32 %v8180_v62, %v3581_v39 }
 0xbd6   :  { %v7147_v30 = vpop.f32.mrf.mxu1  ;;  %v4994_v31 = vpop.f32.mrf.mxu0 }
 0xbd7   :  { %v5083_v46 = vsel %vm1357_vm3, %v4767_v27, -inf  ;;  %v4995_v5 = vadd.f32 %v4994_v31, %v7833_v58 }
 0xbd8   :  { %5084 = vmax.xlane.f32.xlu0 %v5083_v46  ;;  %v4918_v49 = vpop.f32.mrf.mxu1  ;;  %v7162_v51 = vpop.f32.mrf.mxu0 }
 0xbd9   :  { %v5092_v59 = vsel %vm1357_vm3, %v4995_v5, -inf  ;;  %v4919_v61 = vadd.f32 %v4918_v49, %v7833_v58 }
 0xbda   :  { %v7157_v44 = vpop.f32.mrf.mxu1 }
 0xbdb   :  { %v5089_v45 = vsel %vm1357_vm3, %v4919_v61, -inf }
 0xbdc   :  { %v5070_v52 = vpop.f32.mrf.mxu1  ;;  %5087 = vmax.xlane.f32.xlu0 %v5086_v35 }
 0xbdd   :  { %v5071_v2 = vadd.f32 %v5070_v52, %v7833_v58 }
 0xbde   :  { %v7167_v60 = vpop.f32.mrf.mxu1 }
 0xbdf   :  { %v5095_v53 = vsel %vm1357_vm3, %v5071_v2, -inf }
 0xbe0   :  { %5093 = vmax.xlane.f32.xlu0 %v5092_v59 }
 0xbe5   :  { %4182 = vrot.lane.b32.xlu1 %v8363_v48, %s7447_s29 }
 0xbf6   :  { %4176 = vrot.lane.b32.xlu0 %v8363_v48, %s7446_s2 }
 0xc09   :  { %5090 = vmax.xlane.f32.xlu1 %v5089_v45 }
 0xc0d   :  { %5096 = vmax.xlane.f32.xlu1 %v5095_v53 }
 0xc1e   :  { %4188 = vrot.lane.b32.xlu1 %v8363_v48, %s7448_s11 }
 0xc59   :  { %v5076_v62 = vpop.xlane.xlu0 %5075 }
 0xc5a   :  { %v5098_v13 = vsub.f32 %v4539_v14, %v5076_v62 }
 0xc5c   :  { %v5106_v54 = vmul.f32 1.442695, %v5098_v13 }
 0xc5d   :  { %v5082_v55 = vpop.xlane.xlu0 %5081  ;;  %v5079_v37 = vpop.xlane.xlu1 %5078 }
 0xc5e   :  { %7340 = vpow2.f32 %v5106_v54  ;;  %v5100_v38 = vsub.f32 %v4691_v7, %v5082_v55  ;;  %v5099_v40 = vsub.f32 %v4615_v9, %v5079_v37 }
 0xc60   :  { %v5110_v41 = vmul.f32 1.442695, %v5100_v38  ;;  %v5108_v12 = vmul.f32 1.442695, %v5099_v40 }
 0xc61   :  { %v5085_v58 = vpop.xlane.xlu0 %5084  ;;  %v4183_v8 = vpop.permute.xlu1 %4182 }
 0xc62   :  { %7342 = vpow2.f32 %v5110_v41  ;;  %v5101_v19 = vsub.f32 %v4767_v27, %v5085_v58  ;;  %v4194_v22 = vcombine.low %v8363_v48, %v4183_v8  ;;  %v4195_v25 = vcombine.high %v8363_v48, %v4183_v8 }
 0xc63   :  { %7344 = vpow2.f32 %v5108_v12 }
 0xc64   :  { %v5112_v56 = vmul.f32 1.442695, %v5101_v19  ;;  %v4202_v31 = vrot.slane %v4194_v22, %v7671_v29  ;;  %v4209_v46 = vrot.slane %v4195_v25, %v7671_v29 }
 0xc65   :  { %v5088_v57 = vpop.xlane.xlu0 %5087 }
 0xc66   :  { %7346 = vpow2.f32 %v5112_v56  ;;  %v5102_v47 = vsub.f32 %v4843_v28, %v5088_v57 }
 0xc68   :  { %v5114_v1 = vmul.f32 1.442695, %v5102_v47 }
 0xc69   :  { %v5094_v21 = vpop.xlane.xlu0 %5093 }
 0xc6a   :  { %7348 = vpow2.f32 %v5114_v1  ;;  %v5104_v24 = vsub.f32 %v4995_v5, %v5094_v21 }
 0xc6b   :  { %v8375_v18 = vpop.eup %7340 }
 0xc6c   :  { %v5118_v32 = vmul.f32 1.442695, %v5104_v24  ;;  %v5122_v33 = vsel %vm1357_vm3, %v8375_v18, 0.0 }
 0xc6d   :  { %5123 = vadd.xlane.f32.xlu0 %v5122_v33  ;;  %v4177_v0 = vpop.permute.xlu0 %4176 }
 0xc6e   :  { %7350 = vpow2.f32 %v5118_v32 }
 0xc6f   :  { %v8379_v42 = vpop.eup %7342 }
 0xc70   :  { %v8381_v43 = vpop.eup %7344  ;;  %v5128_v50 = vsel %vm1357_vm3, %v8379_v42, 0.0 }
 0xc71   :  { %5129 = vadd.xlane.f32.xlu0 %v5128_v50  ;;  %v5125_v16 = vsel %vm1357_vm3, %v8381_v43, 0.0 }
 0xc72   :  { %5126 = vadd.xlane.f32.xlu1 %v5125_v16 }
 0xc73   :  { %v8387_v39 = vpop.eup %7346 }
 0xc74   :  { %v5131_v34 = vsel %vm1357_vm3, %v8387_v39, 0.0 }
 0xc76   :  { %5132 = vadd.xlane.f32.xlu1 %v5131_v34 }
 0xc77   :  { %v8391_v14 = vpop.eup %7348 }
 0xc78   :  { %v5134_v3 = vsel %vm1357_vm3, %v8391_v14, 0.0 }
 0xc79   :  { %5135 = vadd.xlane.f32.xlu0 %v5134_v3 }
 0xc7b   :  { %v8395_v6 = vpop.eup %7350 }
 0xc7c   :  { %v5140_v7 = vsel %vm1357_vm3, %v8395_v6, 0.0 }
 0xc7d   :  { %5141 = vadd.xlane.f32.xlu1 %v5140_v7 }
 0xc92   :  { %v5091_v17 = vpop.xlane.xlu1 %5090 }
 0xc93   :  { %v5103_v20 = vsub.f32 %v4919_v61, %v5091_v17 }
 0xc95   :  { %v5116_v9 = vmul.f32 1.442695, %v5103_v20 }
 0xc96   :  { %v5097_v10 = vpop.xlane.xlu1 %5096 }
 0xc97   :  { %7352 = vpow2.f32 %v5116_v9  ;;  %v5105_v11 = vsub.f32 %v5071_v2, %v5097_v10 }
 0xc99   :  { %v5120_v26 = vmul.f32 1.442695, %v5105_v11 }
 0xc9a   :  { %v4189_v27 = vpop.permute.xlu1 %4188 }
 0xc9b   :  { %7354 = vpow2.f32 %v5120_v26  ;;  %v4210_v28 = vcombine.low %v4177_v0, %v4189_v27  ;;  %v4211_v30 = vcombine.high %v4177_v0, %v4189_v27 }
 0xc9d   :  { %v4218_v49 = vrot.slane %v4210_v28, %v7671_v29  ;;  %v4225_v51 = vrot.slane %v4211_v30, %v7671_v29 }
 0xc9f   :  { %v4226_v35 = vcombine.low %v4202_v31, %v4218_v49  ;;  %v4227_v5 = vcombine.high %v4202_v31, %v4218_v49  ;;  %v4242_v44 = vcombine.low %v4209_v46, %v4225_v51  ;;  %v4243_v52 = vcombine.high %v4209_v46, %v4225_v51 }
 0xca1   :  { %v4234_v59 = vrot.slane %v4226_v35, %v7674_v36  ;;  %v4241_v60 = vrot.slane %v4227_v5, %v7674_v36  ;;  %v4250_v48 = vrot.slane %v4242_v44, %v7674_v36  ;;  %v4257_v61 = vrot.slane %v4243_v52, %v7674_v36 }
 0xca3   :  { %v4330_v2 = vcombine.low %v4234_v59, %v4241_v60  ;;  %v6685_v45 = vcombine.high %v4234_v59, %v4241_v60  ;;  %v4346_v53 = vcombine.low %v4250_v48, %v4257_v61  ;;  %v6686_v62 = vcombine.high %v4250_v48, %v4257_v61 }
 0xca4   :  { %v8409_v13 = vpop.eup %7352 }
 0xca5   :  { %v4337_v54 = vrot.slane %v4330_v2, %v7671_v29  ;;  %v4345_v55 = vrot.slane %v6685_v45, %v7671_v29  ;;  %v4353_v37 = vrot.slane %v4346_v53, %v7671_v29  ;;  %v4361_v38 = vrot.slane %v6686_v62, %v7671_v29 }
 0xca6   :  { %v5137_v40 = vsel %vm1357_vm3, %v8409_v13, 0.0 }
 0xca7   :  { %5138 = vadd.xlane.f32.xlu1 %v5137_v40  ;;  %v4362_v41 = vcombine.low %v4337_v54, %v4345_v55  ;;  %v4378_v12 = vcombine.low %v4353_v37, %v4361_v38  ;;  %v4363_v58 = vcombine.high %v4337_v54, %v4345_v55  ;;  %v4379_v19 = vcombine.high %v4353_v37, %v4361_v38 }
 0xca8   :  { %v8417_v56 = vpop.eup %7354 }
 0xca9   :  { %v5143_v57 = vsel %vm1357_vm3, %v8417_v56, 0.0  ;;  %v4370_v47 = vrot.slane %v4362_v41, %v7674_v36  ;;  %v4386_v1 = vrot.slane %v4378_v12, %v7674_v36  ;;  %v4377_v21 = vrot.slane %v4363_v58, %v7674_v36 }
 0xcaa   :  { %5144 = vadd.xlane.f32.xlu0 %v5143_v57  ;;  %v4393_v24 = vrot.slane %v4379_v19, %v7674_v36 }
 0xcab   :  { %v4394_v32 = vcombine.low %v4370_v47, %v4386_v1  ;;  %v4395_v33 = vcombine.high %v4370_v47, %v4386_v1 }
 0xcac   :  { %v4396_v50 = vcombine.low %v4377_v21, %v4393_v24  ;;  %v4397_v16 = vcombine.high %v4377_v21, %v4393_v24 }
 0xcad   :  { %7169 = vmatpush3.msra.mxu0 %v4394_v32  ;;  %7174 = vmatpush3.msra.mxu1 %v4395_v33 }
 0xcae   :  { %7178 = vmatprep.subr.mxu0 %v7449_v15  ;;  %7183 = vmatprep.subr.mxu1 %v7449_v15 }
 0xcb8   :  { %4184 = vrot.lane.b32.xlu1 %v8183_v63, %s7447_s29 }
 0xcbc   :  { %4190 = vrot.lane.b32.xlu1 %v8183_v63, %s7448_s11 }
 0xcc0   :  { %4178 = vrot.lane.b32.xlu0 %v8183_v63, %s7446_s2 }
 0xcf6   :  { %v5124_v34 = vpop.xlane.xlu0 %5123 }
 0xcf7   :  { %7356 = vrcp.f32 %v5124_v34 }
 0xcfa   :  { %v5130_v3 = vpop.xlane.xlu0 %5129 }
 0xcfb   :  { %7358 = vrcp.f32 %v5130_v3  ;;  %v5127_v7 = vpop.xlane.xlu1 %5126 }
 0xcfc   :  { %7360 = vrcp.f32 %v5127_v7 }
 0xcff   :  { %v5133_v8 = vpop.xlane.xlu1 %5132 }
 0xd00   :  { %7362 = vrcp.f32 %v5133_v8 }
 0xd04   :  { %v7357_v17 = vpop.eup %7356 }
 0xd05   :  { %v5154_v20 = vmul.f32 %v7357_v17, %v8375_v18 }
 0xd07   :  { %7171 = vmatmul.mubr.msk.f32.vlgmr.msra.gmra.mxu0 %vm1357_vm3, %v5154_v20 }
 0xd08   :  { %v7359_v9 = vpop.eup %7358  ;;  %7179 = vmatpush3.msra.mxu0 %v4396_v50  ;;  %7180 = vmatprep.mubr.msk.f32.mxu0 %vm7450_vm2, %v7449_v15 }
 0xd09   :  { %v7361_v10 = vpop.eup %7360  ;;  %v5156_v11 = vmul.f32 %v7359_v9, %v8379_v42  ;;  %7188 = vmatprep.subr.mxu0 %v7449_v15  ;;  %v5142_v42 = vpop.xlane.xlu1 %5141 }
 0xd0a   :  { %v5155_v22 = vmul.f32 %v7361_v10, %v8381_v43  ;;  %v5136_v43 = vpop.xlane.xlu0 %5135 }
 0xd0b   :  { %7181 = vmatmul.mubr.msk.f32.vlgmr.msra.gmra.mxu0 %vm1357_vm3, %v5156_v11  ;;  %7364 = vrcp.f32 %v5136_v43 }
 0xd0c   :  { %7176 = vmatmul.mubr.msk.f32.vlgmr.msra.gmra.mxu1 %vm1357_vm3, %v5155_v22  ;;  %7190 = vmatprep.mubr.msk.f32.mxu0 %vm7450_vm2, %v7449_v15 }
 0xd0d   :  { %v7363_v18 = vpop.eup %7362  ;;  %7184 = vmatpush3.msra.mxu1 %v4397_v16  ;;  %7185 = vmatprep.mubr.msk.f32.mxu1 %vm7450_vm2, %v7449_v15 }
 0xd0e   :  { %v5157_v25 = vmul.f32 %v7363_v18, %v8387_v39  ;;  %7193 = vmatprep.subr.mxu1 %v7449_v15 }
 0xd10   :  { %7186 = vmatmul.mubr.msk.f32.vlgmr.msra.gmra.mxu1 %vm1357_vm3, %v5157_v25 }
 0xd11   :  { %7195 = vmatprep.mubr.msk.f32.mxu1 %vm7450_vm2, %v7449_v15 }
 0xd18   :  { %v7365_v47 = vpop.eup %7364 }
 0xd19   :  { %v5158_v3 = vmul.f32 %v7365_v47, %v8391_v14 }
 0xd30   :  { %v5139_v26 = vpop.xlane.xlu1 %5138 }
 0xd31   :  { %7366 = vrcp.f32 %v5139_v26 }
 0xd32   :  { %7368 = vrcp.f32 %v5142_v42 }
 0xd33   :  { %v5145_v0 = vpop.xlane.xlu0 %5144 }
 0xd34   :  { %v4185_v27 = vpop.permute.xlu1 %4184  ;;  %7370 = vrcp.f32 %v5145_v0 }
 0xd35   :  { %v4262_v28 = vcombine.low %v8183_v63, %v4185_v27  ;;  %v4263_v30 = vcombine.high %v8183_v63, %v4185_v27 }
 0xd37   :  { %v4179_v31 = vpop.permute.xlu0 %4178  ;;  %v4270_v51 = vrot.slane %v4262_v28, %v7671_v29  ;;  %v4277_v35 = vrot.slane %v4263_v30, %v7671_v29 }
 0xd38   :  { %v4191_v46 = vpop.permute.xlu1 %4190 }
 0xd39   :  { %v4278_v39 = vcombine.low %v4179_v31, %v4191_v46  ;;  %v4279_v49 = vcombine.high %v4179_v31, %v4191_v46 }
 0xd3b   :  { %v4286_v5 = vrot.slane %v4278_v39, %v7671_v29  ;;  %v4293_v44 = vrot.slane %v4279_v49, %v7671_v29 }
 0xd3d   :  { %v4294_v52 = vcombine.low %v4270_v51, %v4286_v5  ;;  %v4295_v59 = vcombine.high %v4270_v51, %v4286_v5  ;;  %v4310_v60 = vcombine.low %v4277_v35, %v4293_v44  ;;  %v4311_v48 = vcombine.high %v4277_v35, %v4293_v44 }
 0xd3e   :  { %v7367_v1 = vpop.eup %7366 }
 0xd3f   :  { %v4302_v63 = vrot.slane %v4294_v52, %v7674_v36  ;;  %v4309_v61 = vrot.slane %v4295_v59, %v7674_v36  ;;  %v4318_v2 = vrot.slane %v4310_v60, %v7674_v36  ;;  %v4325_v45 = vrot.slane %v4311_v48, %v7674_v36  ;;  %v7369_v50 = vpop.eup %7368 }
 0xd40   :  { %v5159_v7 = vmul.f32 %v7367_v1, %v8409_v13  ;;  %v5160_v9 = vmul.f32 %v7369_v50, %v8395_v6 }
 0xd41   :  { %v4398_v53 = vcombine.low %v4302_v63, %v4309_v61  ;;  %v6687_v62 = vcombine.high %v4302_v63, %v4309_v61  ;;  %v4414_v54 = vcombine.low %v4318_v2, %v4325_v45  ;;  %v6688_v55 = vcombine.high %v4318_v2, %v4325_v45  ;;  %v7371_v8 = vpop.eup %7370 }
 0xd42   :  { %v5161_v14 = vmul.f32 %v7371_v8, %v8417_v56 }
 0xd43   :  { %v4405_v37 = vrot.slane %v4398_v53, %v7671_v29  ;;  %v4413_v38 = vrot.slane %v6687_v62, %v7671_v29  ;;  %v4421_v40 = vrot.slane %v4414_v54, %v7671_v29  ;;  %v4429_v41 = vrot.slane %v6688_v55, %v7671_v29 }
 0xd45   :  { %v4430_v12 = vcombine.low %v4405_v37, %v4413_v38  ;;  %v4446_v58 = vcombine.low %v4421_v40, %v4429_v41  ;;  %v4431_v19 = vcombine.high %v4405_v37, %v4413_v38  ;;  %v4447_v57 = vcombine.high %v4421_v40, %v4429_v41 }
 0xd47   :  { %v4438_v21 = vrot.slane %v4430_v12, %v7674_v36  ;;  %v4454_v24 = vrot.slane %v4446_v58, %v7674_v36  ;;  %v4445_v32 = vrot.slane %v4431_v19, %v7674_v36  ;;  %v4461_v33 = vrot.slane %v4447_v57, %v7674_v36 }
 0xd49   :  { %v4462_v16 = vcombine.low %v4438_v21, %v4454_v24  ;;  %v4463_v34 = vcombine.high %v4438_v21, %v4454_v24  ;;  %v4464_v17 = vcombine.low %v4445_v32, %v4461_v33  ;;  %v4465_v20 = vcombine.high %v4445_v32, %v4461_v33 }
 0xd4b   :  { %7189 = vmatpush3.msra.mxu0 %v4462_v16  ;;  %7194 = vmatpush3.msra.mxu1 %v4463_v34 }
 0xd4c   :  { %7191 = vmatmul.mubr.msk.f32.vlgmr.msra.gmra.mxu0 %vm1357_vm3, %v5158_v3  ;;  %7196 = vmatmul.mubr.msk.f32.vlgmr.msra.gmra.mxu1 %vm1357_vm3, %v5159_v7 }
 0xd4d   :  { %7198 = vmatprep.subr.mxu0 %v7449_v15  ;;  %7203 = vmatprep.subr.mxu1 %v7449_v15 }
 0xd4e   :  { %7199 = vmatpush3.msra.mxu0 %v4464_v17  ;;  %7204 = vmatpush3.msra.mxu1 %v4465_v20 }
 0xd4f   :  { %7200 = vmatprep.mubr.msk.f32.mxu0 %vm7450_vm2, %v7449_v15  ;;  %7205 = vmatprep.mubr.msk.f32.mxu1 %vm7450_vm2, %v7449_v15 }
 0xd50   :  { %7201 = vmatmul.mubr.msk.f32.vlgmr.msra.gmra.mxu0 %vm1357_vm3, %v5160_v9  ;;  %7206 = vmatmul.mubr.msk.f32.vlgmr.msra.gmra.mxu1 %vm1357_vm3, %v5161_v14 }
 0xdc7   :  { %v5231_v13 = vpop.f32.mrf.mxu0 }
 0xdc9   :  { %v7172_v10 = vpop.f32.mrf.mxu0 }
 0xdcb   :  { %v5377_v11 = vpop.f32.mrf.mxu0 }
 0xdcc   :  { %v5304_v22 = vpop.f32.mrf.mxu1  ;;  %v5746_v42 = vcombine.low %v5231_v13, %v5377_v11  ;;  %v5747_v6 = vcombine.high %v5231_v13, %v5377_v11 }
 0xdcd   :  { %v7182_v18 = vpop.f32.mrf.mxu0 }
 0xdce   :  { %v7177_v25 = vpop.f32.mrf.mxu1  ;;  %v5754_v27 = vrot.slane %v5746_v42, %v7671_v29  ;;  %v5761_v15 = vrot.slane %v5747_v6, %v7671_v29  ;;  %v6720_v18 = vld [vmem:[%s8661_s3 + $0xf8] sm:$0xff] }
 0xdcf   :  { %v6719_v25 = vld [vmem:[%s8661_s3 + $0xf0] sm:$0xff]  ;;  %7208 = vmatprep.subr.mxu0 %v6720_v18 }
 0xdd0   :  { %v5450_v43 = vpop.f32.mrf.mxu1  ;;  %7209 = vmatpush3.msra.mxu0 %v6720_v18 }
 0xdd1   :  { %v5762_v56 = vcombine.low %v5304_v22, %v5450_v43  ;;  %v5763_v26 = vcombine.high %v5304_v22, %v5450_v43  ;;  %7210 = vmatprep.subr.mxu0 %v6719_v25 }
 0xdd2   :  { %v7187_v0 = vpop.f32.mrf.mxu1  ;;  %7211 = vmatpush3.msra.mxu0 %v6719_v25 }
 0xdd3   :  { %v5770_v28 = vrot.slane %v5762_v56, %v7671_v29  ;;  %v5777_v30 = vrot.slane %v5763_v26, %v7671_v29 }
 0xdd5   :  { %v5778_v31 = vcombine.low %v5754_v27, %v5770_v28  ;;  %v5779_v46 = vcombine.high %v5754_v27, %v5770_v28  ;;  %v5794_v39 = vcombine.low %v5761_v15, %v5777_v30  ;;  %v5795_v49 = vcombine.high %v5761_v15, %v5777_v30  ;;  %v6718_v28 = vld [vmem:[%s8661_s3 + $0xe8] sm:$0xff]  ;;  %v6717_v30 = vld [vmem:[%s8661_s3 + $0xe0] sm:$0xff] }
 0xdd6   :  { %7212 = vmatprep.subr.mxu0 %v6718_v28 }
 0xdd7   :  { %v5786_v51 = vrot.slane %v5778_v31, %v7674_v36  ;;  %v5793_v35 = vrot.slane %v5779_v46, %v7674_v36  ;;  %v5802_v5 = vrot.slane %v5794_v39, %v7674_v36  ;;  %v5809_v44 = vrot.slane %v5795_v49, %v7674_v36  ;;  %7213 = vmatpush3.msra.mxu0 %v6718_v28 }
 0xdd8   :  { %7214 = vmatprep.subr.mxu0 %v6717_v30 }
 0xdd9   :  { %v5882_v52 = vcombine.low %v5786_v51, %v5793_v35  ;;  %v6713_v59 = vcombine.high %v5786_v51, %v5793_v35  ;;  %v5898_v60 = vcombine.low %v5802_v5, %v5809_v44  ;;  %v6714_v48 = vcombine.high %v5802_v5, %v5809_v44  ;;  %7215 = vmatpush3.msra.mxu0 %v6717_v30  ;;  %v6725_v30 = vld [vmem:[#allocation7 + $0x11] ss:$0 sm:$0xff] }
 0xddb   :  { %v5889_v63 = vrot.slane %v5882_v52, %v7671_v29  ;;  %v5897_v61 = vrot.slane %v6713_v59, %v7671_v29  ;;  %v5905_v2 = vrot.slane %v5898_v60, %v7671_v29  ;;  %v5913_v45 = vrot.slane %v6714_v48, %v7671_v29 }
 0xddd   :  { %v5914_v53 = vcombine.low %v5889_v63, %v5897_v61  ;;  %v5930_v62 = vcombine.low %v5905_v2, %v5913_v45  ;;  %v5915_v54 = vcombine.high %v5889_v63, %v5897_v61  ;;  %v5931_v55 = vcombine.high %v5905_v2, %v5913_v45 }
 0xddf   :  { %v8496_v37 = vrot.slane %v5914_v53, %v7674_v36  ;;  %v8499_v38 = vrot.slane %v5930_v62, %v7674_v36  ;;  %v5929_v12 = vrot.slane %v5915_v54, %v7674_v36  ;;  %v5945_v58 = vrot.slane %v5931_v55, %v7674_v36 }
 0xde1   :  { %v5947_v40 = vcombine.high %v8496_v37, %v8499_v38  ;;  %v5946_v41 = vcombine.low %v8496_v37, %v8499_v38  ;;  %v5948_v19 = vcombine.low %v5929_v12, %v5945_v58  ;;  %v5949_v57 = vcombine.high %v5929_v12, %v5945_v58  ;;  %v6721_v37 = vld [vmem:[#allocation7 + $0xf] ss:$0 sm:$0xff] }
 0xde3   :  { %6020 = vrot.lane.b32.xlu0 %v5947_v40, %s7445_s9 }
 0xde7   :  { %6028 = vrot.lane.b32.xlu0 %v5948_v19, %s7455_s1 }
 0xdeb   :  { %6036 = vrot.lane.b32.xlu0 %v5949_v57, %s7456_s14 }
 0xe0c   :  { %v5523_v47 = vpop.f32.mrf.mxu0  ;;  %v5596_v1 = vpop.f32.mrf.mxu1 }
 0xe0e   :  { %v7192_v21 = vpop.f32.mrf.mxu0  ;;  %v7197_v24 = vpop.f32.mrf.mxu1 }
 0xe10   :  { %v5669_v32 = vpop.f32.mrf.mxu0  ;;  %v5742_v33 = vpop.f32.mrf.mxu1 }
 0xe11   :  { %v5814_v50 = vcombine.low %v5523_v47, %v5669_v32  ;;  %v5815_v16 = vcombine.high %v5523_v47, %v5669_v32  ;;  %v5830_v34 = vcombine.low %v5596_v1, %v5742_v33  ;;  %v5831_v3 = vcombine.high %v5596_v1, %v5742_v33 }
 0xe12   :  { %v7202_v7 = vpop.f32.mrf.mxu0  ;;  %v7207_v8 = vpop.f32.mrf.mxu1 }
 0xe13   :  { %v5822_v17 = vrot.slane %v5814_v50, %v7671_v29  ;;  %v5829_v20 = vrot.slane %v5815_v16, %v7671_v29  ;;  %v5838_v9 = vrot.slane %v5830_v34, %v7671_v29  ;;  %v5845_v14 = vrot.slane %v5831_v3, %v7671_v29  ;;  %v6729_v3 = vld [vmem:[%s8662_s4 + $0x38] sm:$0xff]  ;;  %v6728_v7 = vld [vmem:[%s8662_s4 + $0x30] sm:$0xff]  ;;  %v6727_v8 = vld [vmem:[%s8662_s4 + $0x28] sm:$0xff] }
 0xe14   :  { %7219 = vmatprep.subr.mxu1 %v6729_v3 }
 0xe15   :  { %v5846_v13 = vcombine.low %v5822_v17, %v5838_v9  ;;  %v5847_v10 = vcombine.high %v5822_v17, %v5838_v9  ;;  %v5862_v11 = vcombine.low %v5829_v20, %v5845_v14  ;;  %v5863_v22 = vcombine.high %v5829_v20, %v5845_v14  ;;  %7220 = vmatpush3.msra.mxu1 %v6729_v3  ;;  %v6726_v17 = vld [vmem:[%s8662_s4 + $0x20] sm:$0xff] }
 0xe16   :  { %7221 = vmatprep.subr.mxu1 %v6728_v7 }
 0xe17   :  { %v5854_v42 = vrot.slane %v5846_v13, %v7674_v36  ;;  %v5861_v6 = vrot.slane %v5847_v10, %v7674_v36  ;;  %v5870_v43 = vrot.slane %v5862_v11, %v7674_v36  ;;  %v5877_v56 = vrot.slane %v5863_v22, %v7674_v36  ;;  %7222 = vmatpush3.msra.mxu1 %v6728_v7 }
 0xe18   :  { %7223 = vmatprep.subr.mxu1 %v6727_v8 }
 0xe19   :  { %v5950_v26 = vcombine.low %v5854_v42, %v5861_v6  ;;  %v6715_v0 = vcombine.high %v5854_v42, %v5861_v6  ;;  %v5966_v27 = vcombine.low %v5870_v43, %v5877_v56  ;;  %v6716_v15 = vcombine.high %v5870_v43, %v5877_v56  ;;  %7224 = vmatpush3.msra.mxu1 %v6727_v8 }
 0xe1a   :  { %7225 = vmatprep.subr.mxu1 %v6726_v17 }
 0xe1b   :  { %v5957_v31 = vrot.slane %v5950_v26, %v7671_v29  ;;  %v5965_v46 = vrot.slane %v6715_v0, %v7671_v29  ;;  %v5973_v39 = vrot.slane %v5966_v27, %v7671_v29  ;;  %v5981_v49 = vrot.slane %v6716_v15, %v7671_v29  ;;  %7226 = vmatpush3.msra.mxu1 %v6726_v17  ;;  %v6724_v15 = vld [vmem:[#allocation7 + $0x10] ss:$0 sm:$0xff] }
 0xe1d   :  { %v5982_v51 = vcombine.low %v5957_v31, %v5965_v46  ;;  %v5998_v35 = vcombine.low %v5973_v39, %v5981_v49  ;;  %v5983_v5 = vcombine.high %v5957_v31, %v5965_v46  ;;  %v5999_v44 = vcombine.high %v5973_v39, %v5981_v49 }
 0xe1f   :  { %v5990_v52 = vrot.slane %v5982_v51, %v7674_v36  ;;  %v6006_v59 = vrot.slane %v5998_v35, %v7674_v36  ;;  %v5997_v63 = vrot.slane %v5983_v5, %v7674_v36  ;;  %v6013_v61 = vrot.slane %v5999_v44, %v7674_v36  ;;  %v6748_v44 = vld [vmem:[%s8663_s5 + $0xf8] sm:$0xff] }
 0xe20   :  { %7230 = vmatprep.subr.mxu0 %v6748_v44 }
 0xe21   :  { %v6015_v60 = vcombine.high %v5990_v52, %v6006_v59  ;;  %v6014_v48 = vcombine.low %v5990_v52, %v6006_v59  ;;  %v6016_v29 = vcombine.low %v5997_v63, %v6013_v61  ;;  %v6017_v2 = vcombine.high %v5997_v63, %v6013_v61  ;;  %v6747_v52 = vld [vmem:[%s8663_s5 + $0xf0] sm:$0xff]  ;;  %v6746_v59 = vld [vmem:[%s8663_s5 + $0xe8] sm:$0xff] }
 0xe22   :  { %v6743_v63 = vld [vmem:[%s8663_s5 + $0xd0] sm:$0xff]  ;;  %v6742_v61 = vld [vmem:[%s8663_s5 + $0xc8] sm:$0xff] }
 0xe23   :  { %6022 = vrot.lane.b32.xlu1 %v6015_v60, %s7445_s9  ;;  %v6745_v60 = vld [vmem:[%s8663_s5 + $0xe0] sm:$0xff] }
 0xe27   :  { %6030 = vrot.lane.b32.xlu1 %v6016_v29, %s7455_s1  ;;  %v6741_v29 = vld [vmem:[%s8663_s5 + $0xc0] sm:$0xff] }
 0xe2b   :  { %6038 = vrot.lane.b32.xlu1 %v6017_v2, %s7456_s14  ;;  %v6740_v2 = vld [vmem:[%s8663_s5 + $0xb8] sm:$0xff] }
 0xe55   :  { %v6021_v45 = vpop.permute.xlu0 %6020 }
 0xe56   :  { %v6042_v62 = vsel %vm1357_vm3, %v5946_v41, %v6021_v45  ;;  %v6739_v45 = vld [vmem:[%s8663_s5 + $0xb0] sm:$0xff] }
 0xe59   :  { %v6029_v53 = vpop.permute.xlu0 %6028 }
 0xe5a   :  { %v6044_v54 = vsel %vm2936_vm5, %v6042_v62, %v6029_v53  ;;  %v6738_v53 = vld [vmem:[%s8663_s5 + $0xa8] sm:$0xff]  ;;  %v6737_v62 = vld [vmem:[%s8663_s5 + $0xa0] sm:$0xff] }
 0xe5d   :  { %v6037_v55 = vpop.permute.xlu0 %6036 }
 0xe5e   :  { %v6046_v36 = vsel %vm2939_vm6, %v6044_v54, %v6037_v55  ;;  %v6736_v54 = vld [vmem:[%s8663_s5 + $0x98] sm:$0xff]  ;;  %v6735_v55 = vld [vmem:[%s8663_s5 + $0x90] sm:$0xff] }
 0xe5f   :  { %7216 = vmatprep.mubr.msk.f32.mxu0 %vm177_vm1, %v6046_v36  ;;  %v6734_v36 = vld [vmem:[%s8663_s5 + $0x88] sm:$0xff] }
 0xe95   :  { %v6023_v40 = vpop.permute.xlu1 %6022 }
 0xe96   :  { %v6043_v58 = vsel %vm1357_vm3, %v6014_v48, %v6023_v40  ;;  %v6744_v48 = vld [vmem:[%s8663_s5 + $0xd8] sm:$0xff]  ;;  %v6733_v40 = vld [vmem:[%s8663_s5 + $0x80] sm:$0xff] }
 0xe99   :  { %v6031_v12 = vpop.permute.xlu1 %6030 }
 0xe9a   :  { %v6045_v19 = vsel %vm2936_vm5, %v6043_v58, %v6031_v12  ;;  %v6730_v12 = vld [vmem:[#allocation7 + $0x12] ss:$0 sm:$0xff] }
 0xe9d   :  { %v6039_v57 = vpop.permute.xlu1 %6038 }
 0xe9e   :  { %v6047_v47 = vsel %vm2939_vm6, %v6045_v19, %v6039_v57 }
 0xe9f   :  { %7217 = vmatmul.mubr.msk.f32.vlgmr.msra.gmra.mxu0 %vm177_vm1, %v6047_v47 }
 0xea0   :  { %7231 = vmatpush3.msra.mxu0 %v6748_v44 }
 0xea1   :  { %7232 = vmatprep.subr.mxu0 %v6747_v52 }
 0xea2   :  { %7233 = vmatpush3.msra.mxu0 %v6747_v52 }
 0xea3   :  { %7234 = vmatprep.subr.mxu0 %v6746_v59 }
 0xea4   :  { %7235 = vmatpush3.msra.mxu0 %v6746_v59 }
 0xea5   :  { %7236 = vmatprep.subr.mxu0 %v6745_v60 }
 0xea6   :  { %7237 = vmatpush3.msra.mxu0 %v6745_v60 }
 0xea7   :  { %7238 = vmatprep.subr.mxu0 %v6744_v48 }
 0xea8   :  { %7239 = vmatpush3.msra.mxu0 %v6744_v48 }
 0xea9   :  { %7240 = vmatprep.subr.mxu0 %v6743_v63 }
 0xeaa   :  { %7241 = vmatpush3.msra.mxu0 %v6743_v63 }
 0xeab   :  { %7242 = vmatprep.subr.mxu0 %v6742_v61 }
 0xeac   :  { %7243 = vmatpush3.msra.mxu0 %v6742_v61 }
 0xead   :  { %7244 = vmatprep.subr.mxu0 %v6741_v29 }
 0xeae   :  { %7245 = vmatpush3.msra.mxu0 %v6741_v29 }
 0xeaf   :  { %7246 = vmatprep.subr.mxu0 %v6740_v2 }
 0xeb0   :  { %7247 = vmatpush3.msra.mxu0 %v6740_v2 }
 0xeb1   :  { %7248 = vmatprep.subr.mxu0 %v6739_v45 }
 0xeb2   :  { %7249 = vmatpush3.msra.mxu0 %v6739_v45  ;;  %v6750_v45 = vld [vmem:[#allocation7 + $0x14] ss:$0 sm:$0xff] }
 0xeb3   :  { %7250 = vmatprep.subr.mxu0 %v6738_v53 }
 0xeb4   :  { %7251 = vmatpush3.msra.mxu0 %v6738_v53 }
 0xeb5   :  { %7252 = vmatprep.subr.mxu0 %v6737_v62 }
 0xeb6   :  { %7253 = vmatpush3.msra.mxu0 %v6737_v62 }
 0xeb7   :  { %7254 = vmatprep.subr.mxu0 %v6736_v54 }
 0xeb8   :  { %7255 = vmatpush3.msra.mxu0 %v6736_v54 }
 0xeb9   :  { %7256 = vmatprep.subr.mxu0 %v6735_v55 }
 0xeba   :  { %7257 = vmatpush3.msra.mxu0 %v6735_v55 }
 0xebb   :  { %7258 = vmatprep.subr.mxu0 %v6734_v36 }
 0xebc   :  { %7259 = vmatpush3.msra.mxu0 %v6734_v36  ;;  %v6751_v36 = vld [vmem:[#allocation7 + $0x15] ss:$0 sm:$0xff] }
 0xebd   :  { %7260 = vmatprep.subr.mxu0 %v6733_v40 }
 0xebe   :  { %7261 = vmatpush3.msra.mxu0 %v6733_v40 }
 0xf5f   :  { %v7218_v38 = vpop.f32.mrf.mxu0 }
 0xf60   :  { %v6136_v41 = vadd.f32 %v7218_v38, %v6721_v37 }
 0xf61   :  { %v6130_v1 = vpop.f32.mrf.mxu0 }
 0xf62   :  { %v8553_v21 = vadd.f32 %v6136_v41, %v8115_v23  ;;  %v6131_v24 = vadd.f32 %v6721_v37, %v6130_v1 }
 0xf64   :  { %v8556_v32 = vadd.f32 %v6131_v24, %v8118_v4  ;;  %v6146_v33 = vsel %vm177_vm1, %v8553_v21, 0.0  ;;  %v6152_v23 = vmul.f32 %v8553_v21, %v8553_v21 }
 0xf65   :  { %6147 = vadd.xlane.f32.xlu1 %v6146_v33 }
 0xf66   :  { %v6143_v50 = vsel %vm177_vm1, %v8556_v32, 0.0  ;;  %v6151_v16 = vmul.f32 %v8556_v32, %v8556_v32  ;;  %v6156_v4 = vsel %vm177_vm1, %v6152_v23, 0.0 }
 0xf67   :  { %6144 = vadd.xlane.f32.xlu0 %v6143_v50 }
 0xf68   :  { %v6153_v34 = vsel %vm177_vm1, %v6151_v16, 0.0 }
 0xf6b   :  { %6154 = vadd.xlane.f32.xlu0 %v6153_v34 }
 0xf6f   :  { %6157 = vadd.xlane.f32.xlu0 %v6156_v4 }
 0xfee   :  { %v6148_v14 = vpop.xlane.xlu1 %6147 }
 0xfef   :  { %v6150_v10 = vmul.f32 0.03125, %v6148_v14 }
 0xff0   :  { %v6145_v20 = vpop.xlane.xlu0 %6144 }
 0xff1   :  { %v6149_v9 = vmul.f32 0.03125, %v6145_v20  ;;  %v6162_v42 = vmul.f32 %v6150_v10, %v6150_v10  ;;  %v6166_v31 = vsub.f32 %v8553_v21, %v6150_v10 }
 0xff3   :  { %v6161_v11 = vmul.f32 %v6149_v9, %v6149_v9  ;;  %v6165_v0 = vsub.f32 %v8556_v32, %v6149_v9 }
 0xff4   :  { %v6155_v13 = vpop.xlane.xlu0 %6154 }
 0xff5   :  { %v6159_v22 = vmul.f32 0.03125, %v6155_v13  ;;  %v6749_v13 = vld [vmem:[#allocation7 + $0x13] ss:$0 sm:$0xff] }
 0xff7   :  { %v6163_v18 = vsub.f32 %v6159_v22, %v6161_v11 }
 0xff8   :  { %v6158_v25 = vpop.xlane.xlu0 %6157 }
 0xff9   :  { %v6167_v6 = vadd.f32 1e-05, %v6163_v18  ;;  %v6160_v43 = vmul.f32 0.03125, %v6158_v25 }
 0xffb   :  { %7372 = vrsqrt.f32 %v6167_v6  ;;  %v6164_v56 = vsub.f32 %v6160_v43, %v6162_v42 }
 0xffd   :  { %v6168_v26 = vadd.f32 1e-05, %v6164_v56 }
 0xfff   :  { %7374 = vrsqrt.f32 %v6168_v26 }
0x1008   :  { %v7373_v27 = vpop.eup %7372 }
0x1009   :  { %v6171_v28 = vmul.f32 %v7373_v27, %v6165_v0 }
0x100b   :  { %v6177_v46 = vmul.f32 %v6724_v15, %v6171_v28  ;;  %v6752_v28 = vld [vmem:[%s8662_s4 + $0x40] sm:$0xff] }
0x100c   :  { %v7375_v39 = vpop.eup %7374 }
0x100d   :  { %v6172_v49 = vmul.f32 %v7375_v39, %v6166_v31  ;;  %v6183_v51 = vadd.f32 %v6725_v30, %v6177_v46 }
0x100f   :  { %v6178_v35 = vmul.f32 %v6724_v15, %v6172_v49  ;;  %7227 = vmatprep.mubr.msk.f32.mxu1 %vm177_vm1, %v6183_v51  ;;  %v6753_v15 = vld [vmem:[%s8662_s4 + $0x48] sm:$0xff] }
0x1011   :  { %v6184_v5 = vadd.f32 %v6725_v30, %v6178_v35 }
0x1013   :  { %7228 = vmatmul.mubr.msk.f32.vlgmr.msra.gmra.mxu1 %vm177_vm1, %v6184_v5 }
0x10d3   :  { %v7229_v58 = vpop.f32.mrf.mxu1 }
0x10d4   :  { %v6273_v19 = vadd.f32 %v7229_v58, %v6730_v12 }
0x10d5   :  { %v6267_v57 = vpop.f32.mrf.mxu1 }
0x10d6   :  { %v6279_v47 = vmul.f32 0.044715, %v6273_v19  ;;  %v6268_v37 = vadd.f32 %v6730_v12, %v6267_v57  ;;  %v6277_v20 = vmul.f32 0.5, %v6273_v19 }
0x10d8   :  { %v6281_v38 = vmul.f32 %v6279_v47, %v6273_v19  ;;  %v6278_v41 = vmul.f32 0.044715, %v6268_v37  ;;  %v6276_v8 = vmul.f32 0.5, %v6268_v37 }
0x10da   :  { %v6283_v1 = vmul.f32 %v6281_v38, %v6273_v19  ;;  %v6280_v24 = vmul.f32 %v6278_v41, %v6268_v37 }
0x10dc   :  { %v6285_v33 = vadd.f32 %v6283_v1, %v6273_v19  ;;  %v6282_v50 = vmul.f32 %v6280_v24, %v6268_v37  ;;  %v6758_v19 = vld [vmem:[#allocation7 + $0x16] ss:$0 sm:$0xff] }
0x10de   :  { %v6284_v16 = vadd.f32 %v6282_v50, %v6268_v37  ;;  %v6287_v34 = vmul.f32 0.7978846, %v6285_v33 }
0x10e0   :  { %v6286_v23 = vmul.f32 0.7978846, %v6284_v16  ;;  %7376 = vtanh.f32 %v6287_v34 }
0x10e2   :  { %7378 = vtanh.f32 %v6286_v23 }
0x10ed   :  { %v7377_v4 = vpop.eup %7376 }
0x10ee   :  { %v6291_v7 = vadd.f32 1.0, %v7377_v4 }
0x10ef   :  { %v7379_v3 = vpop.eup %7378 }
0x10f0   :  { %v6290_v17 = vadd.f32 1.0, %v7379_v3  ;;  %v6293_v14 = vmul.f32 %v6291_v7, %v6277_v20 }
0x10f2   :  { %v6292_v9 = vmul.f32 %v6290_v17, %v6276_v8 }
0x10f4   :  { %7262 = vmatprep.mubr.f32.mxu0 %v6292_v9 }
0x10f5   :  { %7263 = vmatmul.mubr.f32.vlgmr.msra.gmra.mxu0 %v6293_v14 }
0x11b5   :  { %v7264_v10 = vpop.f32.mrf.mxu0 }
0x11b6   :  { %v6388_v11 = vadd.f32 %v7264_v10, %v6749_v13 }
0x11b7   :  { %v6382_v22 = vpop.f32.mrf.mxu0 }
0x11b8   :  { %v6392_v18 = vadd.f32 %v6388_v11, %v8553_v21  ;;  %v6383_v25 = vadd.f32 %v6749_v13, %v6382_v22  ;;  %v6755_v21 = vld [vmem:[%s8662_s4 + $0x58] sm:$0xff] }
0x11b9   :  { %7265 = vmatprep.subr.mxu1 %v6755_v21 }
0x11ba   :  { %v6391_v42 = vadd.f32 %v6383_v25, %v8556_v32  ;;  %v6398_v6 = vsel %vm177_vm1, %v6392_v18, 0.0  ;;  %v6404_v43 = vmul.f32 %v6392_v18, %v6392_v18  ;;  %v6754_v32 = vld [vmem:[%s8662_s4 + $0x50] sm:$0xff]  ;;  %7266 = vmatpush3.msra.mxu1 %v6755_v21  ;;  %s7457_s4 = smov [#allocation8]  }
0x11bb   :  { %6399 = vadd.xlane.f32.xlu1 %v6398_v6  ;;  %7267 = vmatprep.subr.mxu1 %v6754_v32  ;;  %s6538_s17 = sshll.u32 %s7457_s4, 4  ;;  %s6539_s17 = int_to_ptr.vmem [resolvable:$true] %s6538_s17 }
0x11bc   :  { %v6395_v56 = vsel %vm177_vm1, %v6391_v42, 0.0  ;;  %v6403_v26 = vmul.f32 %v6391_v42, %v6391_v42  ;;  %v6408_v0 = vsel %vm177_vm1, %v6404_v43, 0.0  ;;  %7268 = vmatpush3.msra.mxu1 %v6754_v32  ;;  %s7416_s22 = scalar_lea.vmem %s6539_s17, 256  ;;  %p7421_p11 = scmp.lt.s32.totalorder %s6539_s17, %s6539_s17 }
0x11bd   :  { %6396 = vadd.xlane.f32.xlu0 %v6395_v56  ;;  %7269 = vmatprep.subr.mxu1 %v6753_v15  ;;  %p7417_p10 = scmp.ne.s32.totalorder %s6539_s17, %s7416_s22  ;;  %p7422_p12 = scmp.lt.s32.totalorder %s7416_s22, %s7416_s22 }
0x11be   :  { %v6405_v27 = vsel %vm177_vm1, %v6403_v26, 0.0  ;;  %7270 = vmatpush3.msra.mxu1 %v6753_v15 }
0x11bf   :  { %6409 = vadd.xlane.f32.xlu1 %v6408_v0  ;;  %7271 = vmatprep.subr.mxu1 %v6752_v28  ;;  %p7423_p13 = por %p7422_p12, %p7421_p11 }
0x11c0   :  { %7272 = vmatpush3.msra.mxu1 %v6752_v28 }
0x11c1   :  { %6406 = vadd.xlane.f32.xlu0 %v6405_v27  ;;  %p7424_p0 = pnand %p7423_p13, %p7417_p10 }
0x1244   :  { %v6400_v30 = vpop.xlane.xlu1 %6399 }
0x1245   :  { %v6402_v31 = vmul.f32 0.03125, %v6400_v30 }
0x1246   :  { %v6397_v46 = vpop.xlane.xlu0 %6396 }
0x1247   :  { %v6401_v39 = vmul.f32 0.03125, %v6397_v46  ;;  %v6414_v51 = vmul.f32 %v6402_v31, %v6402_v31  ;;  %v6418_v61 = vsub.f32 %v6392_v18, %v6402_v31 }
0x1248   :  { %v6410_v49 = vpop.xlane.xlu1 %6409 }
0x1249   :  { %v6412_v35 = vmul.f32 0.03125, %v6410_v49  ;;  %v6413_v44 = vmul.f32 %v6401_v39, %v6401_v39  ;;  %v6417_v2 = vsub.f32 %v6391_v42, %v6401_v39 }
0x124a   :  { %v6407_v5 = vpop.xlane.xlu0 %6406 }
0x124b   :  { %v6416_v52 = vsub.f32 %v6412_v35, %v6414_v51  ;;  %v6411_v59 = vmul.f32 0.03125, %v6407_v5 }
0x124d   :  { %v6420_v60 = vadd.f32 1e-05, %v6416_v52  ;;  %v6415_v48 = vsub.f32 %v6411_v59, %v6413_v44 }
0x124f   :  { %7380 = vrsqrt.f32 %v6420_v60  ;;  %v6419_v63 = vadd.f32 1e-05, %v6415_v48 }
0x1251   :  { %7382 = vrsqrt.f32 %v6419_v63 }
0x125c   :  { %v7381_v29 = vpop.eup %7380 }
0x125d   :  { %v6424_v53 = vmul.f32 %v7381_v29, %v6418_v61 }
0x125e   :  { %v7383_v62 = vpop.eup %7382 }
0x125f   :  { %v6423_v54 = vmul.f32 %v7383_v62, %v6417_v2  ;;  %v6430_v55 = vmul.f32 %v6750_v45, %v6424_v53 }
0x1261   :  { %v6429_v40 = vmul.f32 %v6750_v45, %v6423_v54  ;;  %v6436_v58 = vadd.f32 %v6751_v36, %v6430_v55 }
0x1263   :  { %v6435_v12 = vadd.f32 %v6751_v36, %v6429_v40 }
0x1265   :  { %7273 = vmatprep.mubr.msk.f32.mxu1 %vm177_vm1, %v6435_v12 }
0x1266   :  { %7274 = vmatmul.mubr.msk.f32.vlgmr.msra.gmra.mxu1 %vm177_vm1, %v6436_v58 }
0x1326   :  { %v7275_v57 = vpop.f32.mrf.mxu1 }
0x1327   :  { %v6529_v47 = vadd.f32 %v7275_v57, %v6758_v19 }
0x1328   :  { %v6514_v37 = vpop.f32.mrf.mxu1 }
0x1329   :  { %v6528_v38 = vadd.f32 %v6758_v19, %v6514_v37  ;;  %6532 = vst.msk [vmem:[#allocation8 + $0x8] sm:$0xff] %vm6530_vm7, %v6529_v47 }
0x132b   :  { %6531 = vst.msk [vmem:[#allocation8] sm:$0xff] %vm6530_vm7, %v6528_v38 }
0x132c   :  { %7427 = shalt.err (!%p7424_p0)
}
0x132d   :  { %6544 = dma.vmem_to_hbm [thread:$0]  %s6539_s17, 256, %s8665_s7, [#allocation5], %s7444_s0, %s7444_s0, %s7445_s9  }
0x132e   :  { %7440 = dma.done.wait [#allocation5], 256  }
0x132f   :  { %7441 = vsyncadd [#allocation5], 4294967040 }
0x1330   :  { %6548 = vsyncpa [#allocation4], 1 }
0x1331   :  { %6549 = vsyncpa [#allocation5], 1 }
0x1332   :  { %6550 = vsyncpa [#allocation6], 1 }

</bundles_post_ra>
